<compile_context>
chip_gen: v7x
topology: tpu7x:2x2x1
jax: 0.10.0
libtpu: 0.0.40
codegen_flags: <defaults>
</compile_context>

<pallas_src>
import functools
import math

import jax
import jax.numpy as jnp
from jax import lax
from jax.experimental import pallas as pl
from jax.experimental.pallas import tpu as pltpu


def _decoder_layer_kernel(
    # activations: (Bblk, Lt, E) / (Bblk, Lm, E)
    tgt_ref, mem_ref, qpos_ref, pos_ref,
    # self-attention: fused Q|K (E,2E), V (E,E), out-proj (E,E) + biases
    w_sa_qk_ref, b_sa_qk_ref, w_sa_v_ref, b_sa_v_ref, w_sa_o_ref, b_sa_o_ref,
    # cross-attention: Q, K, V, out-proj (each (E,E)) + biases
    w_ca_q_ref, b_ca_q_ref, w_ca_k_ref, b_ca_k_ref, w_ca_v_ref, b_ca_v_ref,
    w_ca_o_ref, b_ca_o_ref,
    # LayerNorm (3,1,E) and FFN weights
    ln_g_ref, ln_b_ref, w1_ref, b1_ref, w2_ref, b2_ref,
    # output
    o_ref,
    *, nhead):
    Bblk, Lt, E = tgt_ref.shape
    Lm = mem_ref.shape[1]
    H = nhead
    Dh = E // H
    scale = 1.0 / math.sqrt(Dh)
    cdt = w1_ref.dtype   # MXU operand dtype (bf16 by default, f32 for parity)

    # Fatten M: every projection / FFN / LayerNorm is row-wise, so run them on
    # the flattened (Bblk*L, E) lane-dense slab (layout-preserving reshape).
    tgt = tgt_ref[...].reshape(Bblk * Lt, E)
    mem = mem_ref[...].reshape(Bblk * Lm, E)
    qpos = qpos_ref[...].reshape(Bblk * Lt, E)
    pos = pos_ref[...].reshape(Bblk * Lm, E)

    def mm(x, w_ref, b_ref):
        # cdt operands on the MXU, f32 accumulation, f32 bias add on the VPU.
        return jnp.dot(x.astype(cdt), w_ref[...],
                       preferred_element_type=jnp.float32) + b_ref[...]

    def layer_norm(x, i):
        mu = jnp.mean(x, axis=-1, keepdims=True)
        xc = x - mu
        var = jnp.mean(xc * xc, axis=-1, keepdims=True)
        return xc * lax.rsqrt(var + 1e-5) * ln_g_ref[i] + ln_b_ref[i]

    def attention(q, k, v, Lq, Lk):
        """Score/softmax/ctx on already-projected q/k/v; returns (Bblk*Lq, E)."""
        qc = q.astype(cdt)
        kc = k.astype(cdt)
        vc = v.astype(cdt)
        rows = []
        # Static loops are fine at Bblk*H = 8 tiny score tiles (review note).
        # TODO(synk): at DETR-scale Lm (~1000) switch to flash-style online
        # softmax over Lm tiles + lax.fori_loop to bound vreg live ranges.
        for b in range(Bblk):
            heads = []
            for h in range(H):
                qs = qc[b * Lq:(b + 1) * Lq, h * Dh:(h + 1) * Dh]
                ks = kc[b * Lk:(b + 1) * Lk, h * Dh:(h + 1) * Dh]
                vs = vc[b * Lk:(b + 1) * Lk, h * Dh:(h + 1) * Dh]
                # q @ k^T without an explicit transpose: contract dim 1 of both.
                s = lax.dot_general(qs, ks, (((1,), (1,)), ((), ())),
                                    preferred_element_type=jnp.float32) * scale
                m = jnp.max(s, axis=-1, keepdims=True)
                e = jnp.exp(s - m)
                p = e * pl.reciprocal(jnp.sum(e, axis=-1, keepdims=True),
                                      approx=True)
                heads.append(jnp.dot(p.astype(cdt), vs,
                                     preferred_element_type=jnp.float32))
            rows.append(jnp.concatenate(heads, axis=-1))   # (Lq, E)
        return jnp.concatenate(rows, axis=0)               # (Bblk*Lq, E)

    # ---- self-attention block (dropout1 identity in eval mode) ----
    qk = mm(tgt + qpos, w_sa_qk_ref, b_sa_qk_ref)        # fused Q|K: (B*Lt, 2E)
    v_sa = mm(tgt, w_sa_v_ref, b_sa_v_ref)               # (B*Lt, E)
    ctx = attention(qk[:, :E], qk[:, E:], v_sa, Lt, Lt)
    x = layer_norm(tgt + mm(ctx, w_sa_o_ref, b_sa_o_ref), 0)

    # ---- cross-attention block (dropout2 identity) ----
    q_ca = mm(x + qpos, w_ca_q_ref, b_ca_q_ref)
    k_ca = mm(mem + pos, w_ca_k_ref, b_ca_k_ref)
    v_ca = mm(mem, w_ca_v_ref, b_ca_v_ref)
    ctx = attention(q_ca, k_ca, v_ca, Lt, Lm)
    x = layer_norm(x + mm(ctx, w_ca_o_ref, b_ca_o_ref), 1)

    # ---- feed-forward block, relu (dropout / dropout3 identity) ----
    hdn = jnp.maximum(mm(x, w1_ref, b1_ref), 0.0)
    x = layer_norm(x + mm(hdn, w2_ref, b2_ref), 2)
    # TODO(synk): training-mode dropout would use pltpu.prng_seed / prng_random_bits.

    o_ref[...] = x.reshape(Bblk, Lt, E).astype(o_ref.dtype)


def pack_params(params, compute_dtype=jnp.bfloat16):
    """One-time weight packing — call at model load, NOT per forward call.

    MXU-operand weights go to `compute_dtype` (bf16 by default → v6e/v7x MXU
    rate and half the constant DMA bytes); biases / LayerNorm params stay f32
    because they feed VPU elementwise math on f32 accumulators.
    """
    E = params["sa_wq"].shape[0]
    cdt = compute_dtype
    f32 = jnp.float32
    return {
        "nhead": params["nhead"],
        "d_ff": params["w1"].shape[1],
        # self-attn Q and K share their input (tgt + query_pos) -> fuse columns.
        "w_sa_qk": jnp.concatenate([params["sa_wq"], params["sa_wk"]], 1).astype(cdt),
        "b_sa_qk": jnp.concatenate([params["sa_bq"], params["sa_bk"]]).reshape(1, 2 * E).astype(f32),
        "w_sa_v": params["sa_wv"].astype(cdt),
        "b_sa_v": params["sa_bv"].reshape(1, E).astype(f32),
        "w_sa_o": params["sa_wo"].astype(cdt),
        "b_sa_o": params["sa_bo"].reshape(1, E).astype(f32),
        # cross-attn q/k/v inputs all differ -> three full-width matmuls.
        "w_ca_q": params["ca_wq"].astype(cdt),
        "b_ca_q": params["ca_bq"].reshape(1, E).astype(f32),
        "w_ca_k": params["ca_wk"].astype(cdt),
        "b_ca_k": params["ca_bk"].reshape(1, E).astype(f32),
        "w_ca_v": params["ca_wv"].astype(cdt),
        "b_ca_v": params["ca_bv"].reshape(1, E).astype(f32),
        "w_ca_o": params["ca_wo"].astype(cdt),
        "b_ca_o": params["ca_bo"].reshape(1, E).astype(f32),
        "ln_g": jnp.stack([params["g1"], params["g2"], params["g3"]]).reshape(3, 1, E).astype(f32),
        "ln_b": jnp.stack([params["b1"], params["b2"], params["b3"]]).reshape(3, 1, E).astype(f32),
        "w1": params["w1"].astype(cdt),
        "b1": params["b1f"].reshape(1, -1).astype(f32),
        "w2": params["w2"].astype(cdt),
        "b2": params["b2f"].reshape(1, E).astype(f32),
    }


def transformer_decoder_layer(tgt, memory, query_pos, pos, packed, *, batch_block=None):
    """tgt/query_pos: (B, Lt, E); memory/pos: (B, Lm, E). Returns (B, Lt, E)."""
    B, Lt, E = tgt.shape
    Lm = memory.shape[1]
    H = packed["nhead"]
    Fd = packed["d_ff"]
    if batch_block is None:
        # One fat grid step over the whole batch: M = B*Lt rows feed the MXU and
        # single-TC chips (v5e/v6e) pay no per-step pipeline overhead.
        # On v7x pass batch_block=B//2 so both TensorCores get a "parallel" step.
        batch_block = B
    assert B % batch_block == 0
    nblk = B // batch_block

    consts = (packed["w_sa_qk"], packed["b_sa_qk"], packed["w_sa_v"], packed["b_sa_v"],
              packed["w_sa_o"], packed["b_sa_o"],
              packed["w_ca_q"], packed["b_ca_q"], packed["w_ca_k"], packed["b_ca_k"],
              packed["w_ca_v"], packed["b_ca_v"], packed["w_ca_o"], packed["b_ca_o"],
              packed["ln_g"], packed["ln_b"],
              packed["w1"], packed["b1"], packed["w2"], packed["b2"])

    def act_spec(L):
        return pl.BlockSpec((batch_block, L, E), lambda b: (b, 0, 0))

    def const_spec(arr):
        nd = arr.ndim
        return pl.BlockSpec(arr.shape, lambda b, nd=nd: (0,) * nd)
    # NOTE: constants have a constant index_map (fetched once per call); the
    # doubled VMEM buffering is <1 MiB in bf16 at these shapes, so we skip
    # pl.Buffered(1) single-buffering here (revisit at production E/F on v7x).

    # Advisory cost estimate so XLA can schedule neighbouring ops around the call.
    flops = 2 * B * (
        Lt * E * 2 * E          # self-attn fused Q|K projection
        + Lt * E * E            # self-attn V projection
        + 2 * Lt * Lt * E       # self-attn scores + ctx
        + Lt * E * E            # self-attn out projection
        + Lt * E * E            # cross-attn Q projection
        + 2 * Lm * E * E        # cross-attn K, V projections
        + 2 * Lt * Lm * E       # cross-attn scores + ctx
        + Lt * E * E            # cross-attn out projection
        + 2 * Lt * E * Fd)      # FFN linear1 + linear2
    transcendentals = B * H * (Lt * Lt + Lt * Lm)          # softmax exp
    act_bytes = sum(a.size * a.dtype.itemsize for a in (tgt, memory, query_pos, pos))
    const_bytes = sum(a.size * a.dtype.itemsize for a in consts)
    out_bytes = B * Lt * E * tgt.dtype.itemsize
    cost = pl.CostEstimate(flops=int(flops), transcendentals=int(transcendentals),
                           bytes_accessed=int(act_bytes + out_bytes + const_bytes * nblk))

    return pl.pallas_call(
        functools.partial(_decoder_layer_kernel, nhead=H),
        out_shape=jax.ShapeDtypeStruct((B, Lt, E), tgt.dtype),
        grid_spec=pltpu.PrefetchScalarGridSpec(
            num_scalar_prefetch=0,
            grid=(nblk,),
            in_specs=[act_spec(Lt), act_spec(Lm), act_spec(Lt), act_spec(Lm)]
                     + [const_spec(a) for a in consts],
            out_specs=pl.BlockSpec((batch_block, Lt, E), lambda b: (b, 0, 0)),
        ),
        compiler_params=pltpu.CompilerParams(
            dimension_semantics=("parallel",)),
        cost_estimate=cost,
    )(tgt, memory, query_pos, pos, *consts)


def _reference(tgt, memory, query_pos, pos, p):
    """Pure-JAX mirror of TransformerDecoderLayer.forward_post (eval, no masks)."""
    E = tgt.shape[-1]
    H = p["nhead"]
    Dh = E // H

    def mha(q_in, k_in, v_in, wq, bq, wk, bk, wv, bv, wo, bo):
        q = q_in @ wq + bq
        k = k_in @ wk + bk
        v = v_in @ wv + bv
        B, Lq, _ = q.shape
        Lk = k.shape[1]
        qh = q.reshape(B, Lq, H, Dh).transpose(0, 2, 1, 3)
        kh = k.reshape(B, Lk, H, Dh).transpose(0, 2, 1, 3)
        vh = v.reshape(B, Lk, H, Dh).transpose(0, 2, 1, 3)
        s = jnp.einsum("bhqd,bhkd->bhqk", qh, kh) / math.sqrt(Dh)
        a = jax.nn.softmax(s, axis=-1)
        o = jnp.einsum("bhqk,bhkd->bhqd", a, vh)
        o = o.transpose(0, 2, 1, 3).reshape(B, Lq, E)
        return o @ wo + bo

    def ln(x, g, b):
        mu = x.mean(-1, keepdims=True)
        var = ((x - mu) ** 2).mean(-1, keepdims=True)
        return (x - mu) / jnp.sqrt(var + 1e-5) * g + b

    qk = tgt + query_pos
    x = tgt + mha(qk, qk, tgt,
                  p["sa_wq"], p["sa_bq"], p["sa_wk"], p["sa_bk"],
                  p["sa_wv"], p["sa_bv"], p["sa_wo"], p["sa_bo"])
    x = ln(x, p["g1"], p["b1"])
    x = x + mha(x + query_pos, memory + pos, memory,
                p["ca_wq"], p["ca_bq"], p["ca_wk"], p["ca_bk"],
                p["ca_wv"], p["ca_bv"], p["ca_wo"], p["ca_bo"])
    x = ln(x, p["g2"], p["b2"])
    h = jax.nn.relu(x @ p["w1"] + p["b1f"])
    x = x + h @ p["w2"] + p["b2f"]
    x = ln(x, p["g3"], p["b3"])
    return x


if __name__ == "__main__":
    # batch, tgt len, memory len, d_model, nhead, ffn dim
    B, Lt, Lm, E, H, F = 2, 16, 32, 128, 4, 256
    key = jax.random.PRNGKey(0)
    ks = iter(jax.random.split(key, 40))

    def draw(shape, s=0.05):
        return s * jax.random.normal(next(ks), shape, dtype=jnp.float32)

    tgt = draw((B, Lt, E), 1.0)
    memory = draw((B, Lm, E), 1.0)
    query_pos = draw((B, Lt, E), 1.0)
    pos = draw((B, Lm, E), 1.0)

    params = {"nhead": H}
    for pfx in ("sa", "ca"):
        params[f"{pfx}_wq"] = draw((E, E)); params[f"{pfx}_bq"] = draw((E,))
        params[f"{pfx}_wk"] = draw((E, E)); params[f"{pfx}_bk"] = draw((E,))
        params[f"{pfx}_wv"] = draw((E, E)); params[f"{pfx}_bv"] = draw((E,))
        params[f"{pfx}_wo"] = draw((E, E)); params[f"{pfx}_bo"] = draw((E,))
    for i in (1, 2, 3):
        params[f"g{i}"] = 1.0 + draw((E,))
        params[f"b{i}"] = draw((E,))
    params["w1"] = draw((E, F)); params["b1f"] = draw((F,))
    params["w2"] = draw((F, E)); params["b2f"] = draw((E,))

    ref = _reference(tgt, memory, query_pos, pos, params)

    # f32 MXU-operand variant: tight structural check (the only deviation from
    # the PyTorch math is the approx EUP reciprocal in the softmax denominator).
    out_f32 = transformer_decoder_layer(
        tgt, memory, query_pos, pos, pack_params(params, jnp.float32))
    out_f32 = jax.block_until_ready(out_f32)
    assert out_f32.shape == (B, Lt, E)
    assert jnp.allclose(out_f32, ref, atol=5e-3, rtol=5e-3), \
        float(jnp.max(jnp.abs(out_f32 - ref)))

    # bf16 MXU-operand variant (default perf config per the review); looser
    # tolerance accounts for bf16 rounding of matmul operands.
    out = transformer_decoder_layer(
        tgt, memory, query_pos, pos, pack_params(params, jnp.bfloat16))
    out = jax.block_until_ready(out)
    assert out.shape == (B, Lt, E)
    assert jnp.allclose(out, ref, atol=3e-2, rtol=3e-2), \
        float(jnp.max(jnp.abs(out - ref)))

    print("KERNEL_OK")
</pallas_src>

<mosaic_0001>
module attributes {stable_mosaic.version = 11 : i64} {
  func.func @_decoder_layer_kernel(%arg0: i32, %arg1: memref<2x16x128xf32, #tpu.memory_space<vmem>>, %arg2: memref<2x32x128xf32, #tpu.memory_space<vmem>>, %arg3: memref<2x16x128xf32, #tpu.memory_space<vmem>>, %arg4: memref<2x32x128xf32, #tpu.memory_space<vmem>>, %arg5: memref<128x256xf32, #tpu.memory_space<vmem>>, %arg6: memref<1x256xf32, #tpu.memory_space<vmem>>, %arg7: memref<128x128xf32, #tpu.memory_space<vmem>>, %arg8: memref<1x128xf32, #tpu.memory_space<vmem>>, %arg9: memref<128x128xf32, #tpu.memory_space<vmem>>, %arg10: memref<1x128xf32, #tpu.memory_space<vmem>>, %arg11: memref<128x128xf32, #tpu.memory_space<vmem>>, %arg12: memref<1x128xf32, #tpu.memory_space<vmem>>, %arg13: memref<128x128xf32, #tpu.memory_space<vmem>>, %arg14: memref<1x128xf32, #tpu.memory_space<vmem>>, %arg15: memref<128x128xf32, #tpu.memory_space<vmem>>, %arg16: memref<1x128xf32, #tpu.memory_space<vmem>>, %arg17: memref<128x128xf32, #tpu.memory_space<vmem>>, %arg18: memref<1x128xf32, #tpu.memory_space<vmem>>, %arg19: memref<3x1x128xf32, #tpu.memory_space<vmem>>, %arg20: memref<3x1x128xf32, #tpu.memory_space<vmem>>, %arg21: memref<128x256xf32, #tpu.memory_space<vmem>>, %arg22: memref<1x256xf32, #tpu.memory_space<vmem>>, %arg23: memref<256x128xf32, #tpu.memory_space<vmem>>, %arg24: memref<1x128xf32, #tpu.memory_space<vmem>>, %arg25: memref<2x16x128xf32, #tpu.memory_space<vmem>>) attributes {dimension_semantics = [#tpu.dimension_semantics<parallel>], iteration_bounds = array<i64: 1>, scalar_prefetch = 0 : i64, scratch_operands = 0 : i64, tpu.core_type = #tpu.core_type<tc>, window_params = [{transform_indices = @transform_0, window_bounds = array<i64: 2, 16, 128>}, {transform_indices = @transform_1, window_bounds = array<i64: 2, 32, 128>}, {transform_indices = @transform_2, window_bounds = array<i64: 2, 16, 128>}, {transform_indices = @transform_3, window_bounds = array<i64: 2, 32, 128>}, {pipeline_mode = #tpu.pipeline_mode<synchronous>, transform_indices = @transform_4, window_bounds = array<i64: 128, 256>}, {pipeline_mode = #tpu.pipeline_mode<synchronous>, transform_indices = @transform_5, window_bounds = array<i64: 1, 256>}, {pipeline_mode = #tpu.pipeline_mode<synchronous>, transform_indices = @transform_6, window_bounds = array<i64: 128, 128>}, {pipeline_mode = #tpu.pipeline_mode<synchronous>, transform_indices = @transform_7, window_bounds = array<i64: 1, 128>}, {pipeline_mode = #tpu.pipeline_mode<synchronous>, transform_indices = @transform_8, window_bounds = array<i64: 128, 128>}, {pipeline_mode = #tpu.pipeline_mode<synchronous>, transform_indices = @transform_9, window_bounds = array<i64: 1, 128>}, {pipeline_mode = #tpu.pipeline_mode<synchronous>, transform_indices = @transform_10, window_bounds = array<i64: 128, 128>}, {pipeline_mode = #tpu.pipeline_mode<synchronous>, transform_indices = @transform_11, window_bounds = array<i64: 1, 128>}, {pipeline_mode = #tpu.pipeline_mode<synchronous>, transform_indices = @transform_12, window_bounds = array<i64: 128, 128>}, {pipeline_mode = #tpu.pipeline_mode<synchronous>, transform_indices = @transform_13, window_bounds = array<i64: 1, 128>}, {pipeline_mode = #tpu.pipeline_mode<synchronous>, transform_indices = @transform_14, window_bounds = array<i64: 128, 128>}, {pipeline_mode = #tpu.pipeline_mode<synchronous>, transform_indices = @transform_15, window_bounds = array<i64: 1, 128>}, {pipeline_mode = #tpu.pipeline_mode<synchronous>, transform_indices = @transform_16, window_bounds = array<i64: 128, 128>}, {pipeline_mode = #tpu.pipeline_mode<synchronous>, transform_indices = @transform_17, window_bounds = array<i64: 1, 128>}, {pipeline_mode = #tpu.pipeline_mode<synchronous>, transform_indices = @transform_18, window_bounds = array<i64: 3, 1, 128>}, {pipeline_mode = #tpu.pipeline_mode<synchronous>, transform_indices = @transform_19, window_bounds = array<i64: 3, 1, 128>}, {pipeline_mode = #tpu.pipeline_mode<synchronous>, transform_indices = @transform_20, window_bounds = array<i64: 128, 256>}, {pipeline_mode = #tpu.pipeline_mode<synchronous>, transform_indices = @transform_21, window_bounds = array<i64: 1, 256>}, {pipeline_mode = #tpu.pipeline_mode<synchronous>, transform_indices = @transform_22, window_bounds = array<i64: 256, 128>}, {pipeline_mode = #tpu.pipeline_mode<synchronous>, transform_indices = @transform_23, window_bounds = array<i64: 1, 128>}, {transform_indices = @transform_24, window_bounds = array<i64: 2, 16, 128>}]} {
    %c0 = arith.constant 0 : index
    %c0_0 = arith.constant 0 : index
    %c0_1 = arith.constant 0 : index
    %0 = vector.load %arg1[%c0, %c0_0, %c0_1] : memref<2x16x128xf32, #tpu.memory_space<vmem>>, vector<2x16x128xf32>
    %1 = vector.shape_cast %0 : vector<2x16x128xf32> to vector<32x128xf32>
    %c0_2 = arith.constant 0 : index
    %c0_3 = arith.constant 0 : index
    %c0_4 = arith.constant 0 : index
    %2 = vector.load %arg2[%c0_2, %c0_3, %c0_4] : memref<2x32x128xf32, #tpu.memory_space<vmem>>, vector<2x32x128xf32>
    %3 = vector.shape_cast %2 : vector<2x32x128xf32> to vector<64x128xf32>
    %c0_5 = arith.constant 0 : index
    %c0_6 = arith.constant 0 : index
    %c0_7 = arith.constant 0 : index
    %4 = vector.load %arg3[%c0_5, %c0_6, %c0_7] : memref<2x16x128xf32, #tpu.memory_space<vmem>>, vector<2x16x128xf32>
    %5 = vector.shape_cast %4 : vector<2x16x128xf32> to vector<32x128xf32>
    %c0_8 = arith.constant 0 : index
    %c0_9 = arith.constant 0 : index
    %c0_10 = arith.constant 0 : index
    %6 = vector.load %arg4[%c0_8, %c0_9, %c0_10] : memref<2x32x128xf32, #tpu.memory_space<vmem>>, vector<2x32x128xf32>
    %7 = vector.shape_cast %6 : vector<2x32x128xf32> to vector<64x128xf32>
    %8 = arith.addf %1, %5 : vector<32x128xf32>
    %c0_11 = arith.constant 0 : index
    %c0_12 = arith.constant 0 : index
    %9 = vector.load %arg5[%c0_11, %c0_12] : memref<128x256xf32, #tpu.memory_space<vmem>>, vector<128x256xf32>
    %cst = arith.constant dense<0.000000e+00> : vector<32x256xf32>
    %10 = tpu.matmul %8, %9, %cst {dimension_numbers = #tpu.dot_dimension_numbers<[1], [0], [0], [1], [0, 0, 1, 1], [], []>} : vector<32x128xf32>, vector<128x256xf32>, vector<32x256xf32> -> vector<32x256xf32>
    %c0_13 = arith.constant 0 : index
    %c0_14 = arith.constant 0 : index
    %11 = vector.load %arg6[%c0_13, %c0_14] : memref<1x256xf32, #tpu.memory_space<vmem>>, vector<1x256xf32>
    %12 = vector.broadcast %11 : vector<1x256xf32> to vector<32x256xf32>
    %13 = arith.addf %10, %12 : vector<32x256xf32>
    %c0_15 = arith.constant 0 : index
    %c0_16 = arith.constant 0 : index
    %14 = vector.load %arg7[%c0_15, %c0_16] : memref<128x128xf32, #tpu.memory_space<vmem>>, vector<128x128xf32>
    %cst_17 = arith.constant dense<0.000000e+00> : vector<32x128xf32>
    %15 = tpu.matmul %1, %14, %cst_17 {dimension_numbers = #tpu.dot_dimension_numbers<[1], [0], [0], [1], [0, 0, 1, 1], [], []>} : vector<32x128xf32>, vector<128x128xf32>, vector<32x128xf32> -> vector<32x128xf32>
    %c0_18 = arith.constant 0 : index
    %c0_19 = arith.constant 0 : index
    %16 = vector.load %arg8[%c0_18, %c0_19] : memref<1x128xf32, #tpu.memory_space<vmem>>, vector<1x128xf32>
    %17 = vector.broadcast %16 : vector<1x128xf32> to vector<32x128xf32>
    %18 = arith.addf %15, %17 : vector<32x128xf32>
    %19 = vector.extract_strided_slice %13 {offsets = [0, 0], sizes = [32, 128], strides = [1, 1]} : vector<32x256xf32> to vector<32x128xf32>
    %20 = vector.extract_strided_slice %13 {offsets = [0, 128], sizes = [32, 128], strides = [1, 1]} : vector<32x256xf32> to vector<32x128xf32>
    %21 = vector.extract_strided_slice %19 {offsets = [0, 0], sizes = [16, 32], strides = [1, 1]} : vector<32x128xf32> to vector<16x32xf32>
    %22 = vector.extract_strided_slice %20 {offsets = [0, 0], sizes = [16, 32], strides = [1, 1]} : vector<32x128xf32> to vector<16x32xf32>
    %23 = vector.extract_strided_slice %18 {offsets = [0, 0], sizes = [16, 32], strides = [1, 1]} : vector<32x128xf32> to vector<16x32xf32>
    %cst_20 = arith.constant dense<0.000000e+00> : vector<16x16xf32>
    %24 = tpu.matmul %21, %22, %cst_20 {dimension_numbers = #tpu.dot_dimension_numbers<[1], [1], [0], [0], [0, 0, 1, 0], [], []>} : vector<16x32xf32>, vector<16x32xf32>, vector<16x16xf32> -> vector<16x16xf32>
    %cst_21 = arith.constant 0.176776692 : f32
    %25 = vector.broadcast %cst_21 : f32 to vector<16x16xf32>
    %26 = arith.mulf %24, %25 : vector<16x16xf32>
    %cst_22 = arith.constant dense<0xFF800000> : vector<16xf32>
    %27 = vector.multi_reduction <maximumf>, %26, %cst_22 [1] : vector<16x16xf32> to vector<16xf32>
    %28 = vector.shape_cast %27 : vector<16xf32> to vector<16x1xf32>
    %29 = vector.broadcast %28 : vector<16x1xf32> to vector<16x16xf32>
    %30 = arith.subf %26, %29 : vector<16x16xf32>
    %31 = math.exp %30 : vector<16x16xf32>
    %cst_23 = arith.constant dense<0.000000e+00> : vector<16xf32>
    %32 = vector.multi_reduction <add>, %31, %cst_23 [1] : vector<16x16xf32> to vector<16xf32>
    %33 = vector.shape_cast %32 : vector<16xf32> to vector<16x1xf32>
    %34 = tpu.reciprocal %33 {approx = true} : vector<16x1xf32> -> vector<16x1xf32>
    %35 = vector.broadcast %34 : vector<16x1xf32> to vector<16x16xf32>
    %36 = arith.mulf %31, %35 : vector<16x16xf32>
    %cst_24 = arith.constant dense<0.000000e+00> : vector<16x32xf32>
    %37 = tpu.matmul %36, %23, %cst_24 {dimension_numbers = #tpu.dot_dimension_numbers<[1], [0], [0], [1], [0, 0, 1, 1], [], []>} : vector<16x16xf32>, vector<16x32xf32>, vector<16x32xf32> -> vector<16x32xf32>
    %38 = vector.extract_strided_slice %19 {offsets = [0, 32], sizes = [16, 32], strides = [1, 1]} : vector<32x128xf32> to vector<16x32xf32>
    %39 = vector.extract_strided_slice %20 {offsets = [0, 32], sizes = [16, 32], strides = [1, 1]} : vector<32x128xf32> to vector<16x32xf32>
    %40 = vector.extract_strided_slice %18 {offsets = [0, 32], sizes = [16, 32], strides = [1, 1]} : vector<32x128xf32> to vector<16x32xf32>
    %cst_25 = arith.constant dense<0.000000e+00> : vector<16x16xf32>
    %41 = tpu.matmul %38, %39, %cst_25 {dimension_numbers = #tpu.dot_dimension_numbers<[1], [1], [0], [0], [0, 0, 1, 0], [], []>} : vector<16x32xf32>, vector<16x32xf32>, vector<16x16xf32> -> vector<16x16xf32>
    %cst_26 = arith.constant 0.176776692 : f32
    %42 = vector.broadcast %cst_26 : f32 to vector<16x16xf32>
    %43 = arith.mulf %41, %42 : vector<16x16xf32>
    %cst_27 = arith.constant dense<0xFF800000> : vector<16xf32>
    %44 = vector.multi_reduction <maximumf>, %43, %cst_27 [1] : vector<16x16xf32> to vector<16xf32>
    %45 = vector.shape_cast %44 : vector<16xf32> to vector<16x1xf32>
    %46 = vector.broadcast %45 : vector<16x1xf32> to vector<16x16xf32>
    %47 = arith.subf %43, %46 : vector<16x16xf32>
    %48 = math.exp %47 : vector<16x16xf32>
    %cst_28 = arith.constant dense<0.000000e+00> : vector<16xf32>
    %49 = vector.multi_reduction <add>, %48, %cst_28 [1] : vector<16x16xf32> to vector<16xf32>
    %50 = vector.shape_cast %49 : vector<16xf32> to vector<16x1xf32>
    %51 = tpu.reciprocal %50 {approx = true} : vector<16x1xf32> -> vector<16x1xf32>
    %52 = vector.broadcast %51 : vector<16x1xf32> to vector<16x16xf32>
    %53 = arith.mulf %48, %52 : vector<16x16xf32>
    %cst_29 = arith.constant dense<0.000000e+00> : vector<16x32xf32>
    %54 = tpu.matmul %53, %40, %cst_29 {dimension_numbers = #tpu.dot_dimension_numbers<[1], [0], [0], [1], [0, 0, 1, 1], [], []>} : vector<16x16xf32>, vector<16x32xf32>, vector<16x32xf32> -> vector<16x32xf32>
    %55 = vector.extract_strided_slice %19 {offsets = [0, 64], sizes = [16, 32], strides = [1, 1]} : vector<32x128xf32> to vector<16x32xf32>
    %56 = vector.extract_strided_slice %20 {offsets = [0, 64], sizes = [16, 32], strides = [1, 1]} : vector<32x128xf32> to vector<16x32xf32>
    %57 = vector.extract_strided_slice %18 {offsets = [0, 64], sizes = [16, 32], strides = [1, 1]} : vector<32x128xf32> to vector<16x32xf32>
    %cst_30 = arith.constant dense<0.000000e+00> : vector<16x16xf32>
    %58 = tpu.matmul %55, %56, %cst_30 {dimension_numbers = #tpu.dot_dimension_numbers<[1], [1], [0], [0], [0, 0, 1, 0], [], []>} : vector<16x32xf32>, vector<16x32xf32>, vector<16x16xf32> -> vector<16x16xf32>
    %cst_31 = arith.constant 0.176776692 : f32
    %59 = vector.broadcast %cst_31 : f32 to vector<16x16xf32>
    %60 = arith.mulf %58, %59 : vector<16x16xf32>
    %cst_32 = arith.constant dense<0xFF800000> : vector<16xf32>
    %61 = vector.multi_reduction <maximumf>, %60, %cst_32 [1] : vector<16x16xf32> to vector<16xf32>
    %62 = vector.shape_cast %61 : vector<16xf32> to vector<16x1xf32>
    %63 = vector.broadcast %62 : vector<16x1xf32> to vector<16x16xf32>
    %64 = arith.subf %60, %63 : vector<16x16xf32>
    %65 = math.exp %64 : vector<16x16xf32>
    %cst_33 = arith.constant dense<0.000000e+00> : vector<16xf32>
    %66 = vector.multi_reduction <add>, %65, %cst_33 [1] : vector<16x16xf32> to vector<16xf32>
    %67 = vector.shape_cast %66 : vector<16xf32> to vector<16x1xf32>
    %68 = tpu.reciprocal %67 {approx = true} : vector<16x1xf32> -> vector<16x1xf32>
    %69 = vector.broadcast %68 : vector<16x1xf32> to vector<16x16xf32>
    %70 = arith.mulf %65, %69 : vector<16x16xf32>
    %cst_34 = arith.constant dense<0.000000e+00> : vector<16x32xf32>
    %71 = tpu.matmul %70, %57, %cst_34 {dimension_numbers = #tpu.dot_dimension_numbers<[1], [0], [0], [1], [0, 0, 1, 1], [], []>} : vector<16x16xf32>, vector<16x32xf32>, vector<16x32xf32> -> vector<16x32xf32>
    %72 = vector.extract_strided_slice %19 {offsets = [0, 96], sizes = [16, 32], strides = [1, 1]} : vector<32x128xf32> to vector<16x32xf32>
    %73 = vector.extract_strided_slice %20 {offsets = [0, 96], sizes = [16, 32], strides = [1, 1]} : vector<32x128xf32> to vector<16x32xf32>
    %74 = vector.extract_strided_slice %18 {offsets = [0, 96], sizes = [16, 32], strides = [1, 1]} : vector<32x128xf32> to vector<16x32xf32>
    %cst_35 = arith.constant dense<0.000000e+00> : vector<16x16xf32>
    %75 = tpu.matmul %72, %73, %cst_35 {dimension_numbers = #tpu.dot_dimension_numbers<[1], [1], [0], [0], [0, 0, 1, 0], [], []>} : vector<16x32xf32>, vector<16x32xf32>, vector<16x16xf32> -> vector<16x16xf32>
    %cst_36 = arith.constant 0.176776692 : f32
    %76 = vector.broadcast %cst_36 : f32 to vector<16x16xf32>
    %77 = arith.mulf %75, %76 : vector<16x16xf32>
    %cst_37 = arith.constant dense<0xFF800000> : vector<16xf32>
    %78 = vector.multi_reduction <maximumf>, %77, %cst_37 [1] : vector<16x16xf32> to vector<16xf32>
    %79 = vector.shape_cast %78 : vector<16xf32> to vector<16x1xf32>
    %80 = vector.broadcast %79 : vector<16x1xf32> to vector<16x16xf32>
    %81 = arith.subf %77, %80 : vector<16x16xf32>
    %82 = math.exp %81 : vector<16x16xf32>
    %cst_38 = arith.constant dense<0.000000e+00> : vector<16xf32>
    %83 = vector.multi_reduction <add>, %82, %cst_38 [1] : vector<16x16xf32> to vector<16xf32>
    %84 = vector.shape_cast %83 : vector<16xf32> to vector<16x1xf32>
    %85 = tpu.reciprocal %84 {approx = true} : vector<16x1xf32> -> vector<16x1xf32>
    %86 = vector.broadcast %85 : vector<16x1xf32> to vector<16x16xf32>
    %87 = arith.mulf %82, %86 : vector<16x16xf32>
    %cst_39 = arith.constant dense<0.000000e+00> : vector<16x32xf32>
    %88 = tpu.matmul %87, %74, %cst_39 {dimension_numbers = #tpu.dot_dimension_numbers<[1], [0], [0], [1], [0, 0, 1, 1], [], []>} : vector<16x16xf32>, vector<16x32xf32>, vector<16x32xf32> -> vector<16x32xf32>
    %89 = tpu.concatenate %37, %54, %71, %88 in 1 : vector<16x32xf32>, vector<16x32xf32>, vector<16x32xf32>, vector<16x32xf32> -> vector<16x128xf32>
    %90 = vector.extract_strided_slice %19 {offsets = [16, 0], sizes = [16, 32], strides = [1, 1]} : vector<32x128xf32> to vector<16x32xf32>
    %91 = vector.extract_strided_slice %20 {offsets = [16, 0], sizes = [16, 32], strides = [1, 1]} : vector<32x128xf32> to vector<16x32xf32>
    %92 = vector.extract_strided_slice %18 {offsets = [16, 0], sizes = [16, 32], strides = [1, 1]} : vector<32x128xf32> to vector<16x32xf32>
    %cst_40 = arith.constant dense<0.000000e+00> : vector<16x16xf32>
    %93 = tpu.matmul %90, %91, %cst_40 {dimension_numbers = #tpu.dot_dimension_numbers<[1], [1], [0], [0], [0, 0, 1, 0], [], []>} : vector<16x32xf32>, vector<16x32xf32>, vector<16x16xf32> -> vector<16x16xf32>
    %cst_41 = arith.constant 0.176776692 : f32
    %94 = vector.broadcast %cst_41 : f32 to vector<16x16xf32>
    %95 = arith.mulf %93, %94 : vector<16x16xf32>
    %cst_42 = arith.constant dense<0xFF800000> : vector<16xf32>
    %96 = vector.multi_reduction <maximumf>, %95, %cst_42 [1] : vector<16x16xf32> to vector<16xf32>
    %97 = vector.shape_cast %96 : vector<16xf32> to vector<16x1xf32>
    %98 = vector.broadcast %97 : vector<16x1xf32> to vector<16x16xf32>
    %99 = arith.subf %95, %98 : vector<16x16xf32>
    %100 = math.exp %99 : vector<16x16xf32>
    %cst_43 = arith.constant dense<0.000000e+00> : vector<16xf32>
    %101 = vector.multi_reduction <add>, %100, %cst_43 [1] : vector<16x16xf32> to vector<16xf32>
    %102 = vector.shape_cast %101 : vector<16xf32> to vector<16x1xf32>
    %103 = tpu.reciprocal %102 {approx = true} : vector<16x1xf32> -> vector<16x1xf32>
    %104 = vector.broadcast %103 : vector<16x1xf32> to vector<16x16xf32>
    %105 = arith.mulf %100, %104 : vector<16x16xf32>
    %cst_44 = arith.constant dense<0.000000e+00> : vector<16x32xf32>
    %106 = tpu.matmul %105, %92, %cst_44 {dimension_numbers = #tpu.dot_dimension_numbers<[1], [0], [0], [1], [0, 0, 1, 1], [], []>} : vector<16x16xf32>, vector<16x32xf32>, vector<16x32xf32> -> vector<16x32xf32>
    %107 = vector.extract_strided_slice %19 {offsets = [16, 32], sizes = [16, 32], strides = [1, 1]} : vector<32x128xf32> to vector<16x32xf32>
    %108 = vector.extract_strided_slice %20 {offsets = [16, 32], sizes = [16, 32], strides = [1, 1]} : vector<32x128xf32> to vector<16x32xf32>
    %109 = vector.extract_strided_slice %18 {offsets = [16, 32], sizes = [16, 32], strides = [1, 1]} : vector<32x128xf32> to vector<16x32xf32>
    %cst_45 = arith.constant dense<0.000000e+00> : vector<16x16xf32>
    %110 = tpu.matmul %107, %108, %cst_45 {dimension_numbers = #tpu.dot_dimension_numbers<[1], [1], [0], [0], [0, 0, 1, 0], [], []>} : vector<16x32xf32>, vector<16x32xf32>, vector<16x16xf32> -> vector<16x16xf32>
    %cst_46 = arith.constant 0.176776692 : f32
    %111 = vector.broadcast %cst_46 : f32 to vector<16x16xf32>
    %112 = arith.mulf %110, %111 : vector<16x16xf32>
    %cst_47 = arith.constant dense<0xFF800000> : vector<16xf32>
    %113 = vector.multi_reduction <maximumf>, %112, %cst_47 [1] : vector<16x16xf32> to vector<16xf32>
    %114 = vector.shape_cast %113 : vector<16xf32> to vector<16x1xf32>
    %115 = vector.broadcast %114 : vector<16x1xf32> to vector<16x16xf32>
    %116 = arith.subf %112, %115 : vector<16x16xf32>
    %117 = math.exp %116 : vector<16x16xf32>
    %cst_48 = arith.constant dense<0.000000e+00> : vector<16xf32>
    %118 = vector.multi_reduction <add>, %117, %cst_48 [1] : vector<16x16xf32> to vector<16xf32>
    %119 = vector.shape_cast %118 : vector<16xf32> to vector<16x1xf32>
    %120 = tpu.reciprocal %119 {approx = true} : vector<16x1xf32> -> vector<16x1xf32>
    %121 = vector.broadcast %120 : vector<16x1xf32> to vector<16x16xf32>
    %122 = arith.mulf %117, %121 : vector<16x16xf32>
    %cst_49 = arith.constant dense<0.000000e+00> : vector<16x32xf32>
    %123 = tpu.matmul %122, %109, %cst_49 {dimension_numbers = #tpu.dot_dimension_numbers<[1], [0], [0], [1], [0, 0, 1, 1], [], []>} : vector<16x16xf32>, vector<16x32xf32>, vector<16x32xf32> -> vector<16x32xf32>
    %124 = vector.extract_strided_slice %19 {offsets = [16, 64], sizes = [16, 32], strides = [1, 1]} : vector<32x128xf32> to vector<16x32xf32>
    %125 = vector.extract_strided_slice %20 {offsets = [16, 64], sizes = [16, 32], strides = [1, 1]} : vector<32x128xf32> to vector<16x32xf32>
    %126 = vector.extract_strided_slice %18 {offsets = [16, 64], sizes = [16, 32], strides = [1, 1]} : vector<32x128xf32> to vector<16x32xf32>
    %cst_50 = arith.constant dense<0.000000e+00> : vector<16x16xf32>
    %127 = tpu.matmul %124, %125, %cst_50 {dimension_numbers = #tpu.dot_dimension_numbers<[1], [1], [0], [0], [0, 0, 1, 0], [], []>} : vector<16x32xf32>, vector<16x32xf32>, vector<16x16xf32> -> vector<16x16xf32>
    %cst_51 = arith.constant 0.176776692 : f32
    %128 = vector.broadcast %cst_51 : f32 to vector<16x16xf32>
    %129 = arith.mulf %127, %128 : vector<16x16xf32>
    %cst_52 = arith.constant dense<0xFF800000> : vector<16xf32>
    %130 = vector.multi_reduction <maximumf>, %129, %cst_52 [1] : vector<16x16xf32> to vector<16xf32>
    %131 = vector.shape_cast %130 : vector<16xf32> to vector<16x1xf32>
    %132 = vector.broadcast %131 : vector<16x1xf32> to vector<16x16xf32>
    %133 = arith.subf %129, %132 : vector<16x16xf32>
    %134 = math.exp %133 : vector<16x16xf32>
    %cst_53 = arith.constant dense<0.000000e+00> : vector<16xf32>
    %135 = vector.multi_reduction <add>, %134, %cst_53 [1] : vector<16x16xf32> to vector<16xf32>
    %136 = vector.shape_cast %135 : vector<16xf32> to vector<16x1xf32>
    %137 = tpu.reciprocal %136 {approx = true} : vector<16x1xf32> -> vector<16x1xf32>
    %138 = vector.broadcast %137 : vector<16x1xf32> to vector<16x16xf32>
    %139 = arith.mulf %134, %138 : vector<16x16xf32>
    %cst_54 = arith.constant dense<0.000000e+00> : vector<16x32xf32>
    %140 = tpu.matmul %139, %126, %cst_54 {dimension_numbers = #tpu.dot_dimension_numbers<[1], [0], [0], [1], [0, 0, 1, 1], [], []>} : vector<16x16xf32>, vector<16x32xf32>, vector<16x32xf32> -> vector<16x32xf32>
    %141 = vector.extract_strided_slice %19 {offsets = [16, 96], sizes = [16, 32], strides = [1, 1]} : vector<32x128xf32> to vector<16x32xf32>
    %142 = vector.extract_strided_slice %20 {offsets = [16, 96], sizes = [16, 32], strides = [1, 1]} : vector<32x128xf32> to vector<16x32xf32>
    %143 = vector.extract_strided_slice %18 {offsets = [16, 96], sizes = [16, 32], strides = [1, 1]} : vector<32x128xf32> to vector<16x32xf32>
    %cst_55 = arith.constant dense<0.000000e+00> : vector<16x16xf32>
    %144 = tpu.matmul %141, %142, %cst_55 {dimension_numbers = #tpu.dot_dimension_numbers<[1], [1], [0], [0], [0, 0, 1, 0], [], []>} : vector<16x32xf32>, vector<16x32xf32>, vector<16x16xf32> -> vector<16x16xf32>
    %cst_56 = arith.constant 0.176776692 : f32
    %145 = vector.broadcast %cst_56 : f32 to vector<16x16xf32>
    %146 = arith.mulf %144, %145 : vector<16x16xf32>
    %cst_57 = arith.constant dense<0xFF800000> : vector<16xf32>
    %147 = vector.multi_reduction <maximumf>, %146, %cst_57 [1] : vector<16x16xf32> to vector<16xf32>
    %148 = vector.shape_cast %147 : vector<16xf32> to vector<16x1xf32>
    %149 = vector.broadcast %148 : vector<16x1xf32> to vector<16x16xf32>
    %150 = arith.subf %146, %149 : vector<16x16xf32>
    %151 = math.exp %150 : vector<16x16xf32>
    %cst_58 = arith.constant dense<0.000000e+00> : vector<16xf32>
    %152 = vector.multi_reduction <add>, %151, %cst_58 [1] : vector<16x16xf32> to vector<16xf32>
    %153 = vector.shape_cast %152 : vector<16xf32> to vector<16x1xf32>
    %154 = tpu.reciprocal %153 {approx = true} : vector<16x1xf32> -> vector<16x1xf32>
    %155 = vector.broadcast %154 : vector<16x1xf32> to vector<16x16xf32>
    %156 = arith.mulf %151, %155 : vector<16x16xf32>
    %cst_59 = arith.constant dense<0.000000e+00> : vector<16x32xf32>
    %157 = tpu.matmul %156, %143, %cst_59 {dimension_numbers = #tpu.dot_dimension_numbers<[1], [0], [0], [1], [0, 0, 1, 1], [], []>} : vector<16x16xf32>, vector<16x32xf32>, vector<16x32xf32> -> vector<16x32xf32>
    %158 = tpu.concatenate %106, %123, %140, %157 in 1 : vector<16x32xf32>, vector<16x32xf32>, vector<16x32xf32>, vector<16x32xf32> -> vector<16x128xf32>
    %159 = tpu.concatenate %89, %158 in 0 : vector<16x128xf32>, vector<16x128xf32> -> vector<32x128xf32>
    %c0_60 = arith.constant 0 : index
    %c0_61 = arith.constant 0 : index
    %160 = vector.load %arg9[%c0_60, %c0_61] : memref<128x128xf32, #tpu.memory_space<vmem>>, vector<128x128xf32>
    %cst_62 = arith.constant dense<0.000000e+00> : vector<32x128xf32>
    %161 = tpu.matmul %159, %160, %cst_62 {dimension_numbers = #tpu.dot_dimension_numbers<[1], [0], [0], [1], [0, 0, 1, 1], [], []>} : vector<32x128xf32>, vector<128x128xf32>, vector<32x128xf32> -> vector<32x128xf32>
    %c0_63 = arith.constant 0 : index
    %c0_64 = arith.constant 0 : index
    %162 = vector.load %arg10[%c0_63, %c0_64] : memref<1x128xf32, #tpu.memory_space<vmem>>, vector<1x128xf32>
    %163 = vector.broadcast %162 : vector<1x128xf32> to vector<32x128xf32>
    %164 = arith.addf %161, %163 : vector<32x128xf32>
    %165 = arith.addf %1, %164 : vector<32x128xf32>
    %cst_65 = arith.constant dense<0.000000e+00> : vector<32xf32>
    %166 = vector.multi_reduction <add>, %165, %cst_65 [1] : vector<32x128xf32> to vector<32xf32>
    %167 = vector.shape_cast %166 : vector<32xf32> to vector<32x1xf32>
    %cst_66 = arith.constant 1.280000e+02 : f32
    %168 = vector.broadcast %cst_66 : f32 to vector<32x1xf32>
    %169 = arith.divf %167, %168 : vector<32x1xf32>
    %170 = vector.broadcast %169 : vector<32x1xf32> to vector<32x128xf32>
    %171 = arith.subf %165, %170 : vector<32x128xf32>
    %172 = arith.mulf %171, %171 : vector<32x128xf32>
    %cst_67 = arith.constant dense<0.000000e+00> : vector<32xf32>
    %173 = vector.multi_reduction <add>, %172, %cst_67 [1] : vector<32x128xf32> to vector<32xf32>
    %174 = vector.shape_cast %173 : vector<32xf32> to vector<32x1xf32>
    %cst_68 = arith.constant 1.280000e+02 : f32
    %175 = vector.broadcast %cst_68 : f32 to vector<32x1xf32>
    %176 = arith.divf %174, %175 : vector<32x1xf32>
    %cst_69 = arith.constant 9.99999974E-6 : f32
    %177 = vector.broadcast %cst_69 : f32 to vector<32x1xf32>
    %178 = arith.addf %176, %177 : vector<32x1xf32>
    %179 = math.rsqrt %178 : vector<32x1xf32>
    %180 = vector.broadcast %179 : vector<32x1xf32> to vector<32x128xf32>
    %181 = arith.mulf %171, %180 : vector<32x128xf32>
    %c0_70 = arith.constant 0 : index
    %c0_71 = arith.constant 0 : index
    %c0_72 = arith.constant 0 : index
    %182 = vector.load %arg19[%c0_70, %c0_71, %c0_72] : memref<3x1x128xf32, #tpu.memory_space<vmem>>, vector<1x1x128xf32>
    %183 = vector.shape_cast %182 : vector<1x1x128xf32> to vector<1x128xf32>
    %184 = vector.broadcast %183 : vector<1x128xf32> to vector<32x128xf32>
    %185 = arith.mulf %181, %184 : vector<32x128xf32>
    %c0_73 = arith.constant 0 : index
    %c0_74 = arith.constant 0 : index
    %c0_75 = arith.constant 0 : index
    %186 = vector.load %arg20[%c0_73, %c0_74, %c0_75] : memref<3x1x128xf32, #tpu.memory_space<vmem>>, vector<1x1x128xf32>
    %187 = vector.shape_cast %186 : vector<1x1x128xf32> to vector<1x128xf32>
    %188 = vector.broadcast %187 : vector<1x128xf32> to vector<32x128xf32>
    %189 = arith.addf %185, %188 : vector<32x128xf32>
    %190 = arith.addf %189, %5 : vector<32x128xf32>
    %c0_76 = arith.constant 0 : index
    %c0_77 = arith.constant 0 : index
    %191 = vector.load %arg11[%c0_76, %c0_77] : memref<128x128xf32, #tpu.memory_space<vmem>>, vector<128x128xf32>
    %cst_78 = arith.constant dense<0.000000e+00> : vector<32x128xf32>
    %192 = tpu.matmul %190, %191, %cst_78 {dimension_numbers = #tpu.dot_dimension_numbers<[1], [0], [0], [1], [0, 0, 1, 1], [], []>} : vector<32x128xf32>, vector<128x128xf32>, vector<32x128xf32> -> vector<32x128xf32>
    %c0_79 = arith.constant 0 : index
    %c0_80 = arith.constant 0 : index
    %193 = vector.load %arg12[%c0_79, %c0_80] : memref<1x128xf32, #tpu.memory_space<vmem>>, vector<1x128xf32>
    %194 = vector.broadcast %193 : vector<1x128xf32> to vector<32x128xf32>
    %195 = arith.addf %192, %194 : vector<32x128xf32>
    %196 = arith.addf %3, %7 : vector<64x128xf32>
    %c0_81 = arith.constant 0 : index
    %c0_82 = arith.constant 0 : index
    %197 = vector.load %arg13[%c0_81, %c0_82] : memref<128x128xf32, #tpu.memory_space<vmem>>, vector<128x128xf32>
    %cst_83 = arith.constant dense<0.000000e+00> : vector<64x128xf32>
    %198 = tpu.matmul %196, %197, %cst_83 {dimension_numbers = #tpu.dot_dimension_numbers<[1], [0], [0], [1], [0, 0, 1, 1], [], []>} : vector<64x128xf32>, vector<128x128xf32>, vector<64x128xf32> -> vector<64x128xf32>
    %c0_84 = arith.constant 0 : index
    %c0_85 = arith.constant 0 : index
    %199 = vector.load %arg14[%c0_84, %c0_85] : memref<1x128xf32, #tpu.memory_space<vmem>>, vector<1x128xf32>
    %200 = vector.broadcast %199 : vector<1x128xf32> to vector<64x128xf32>
    %201 = arith.addf %198, %200 : vector<64x128xf32>
    %c0_86 = arith.constant 0 : index
    %c0_87 = arith.constant 0 : index
    %202 = vector.load %arg15[%c0_86, %c0_87] : memref<128x128xf32, #tpu.memory_space<vmem>>, vector<128x128xf32>
    %cst_88 = arith.constant dense<0.000000e+00> : vector<64x128xf32>
    %203 = tpu.matmul %3, %202, %cst_88 {dimension_numbers = #tpu.dot_dimension_numbers<[1], [0], [0], [1], [0, 0, 1, 1], [], []>} : vector<64x128xf32>, vector<128x128xf32>, vector<64x128xf32> -> vector<64x128xf32>
    %c0_89 = arith.constant 0 : index
    %c0_90 = arith.constant 0 : index
    %204 = vector.load %arg16[%c0_89, %c0_90] : memref<1x128xf32, #tpu.memory_space<vmem>>, vector<1x128xf32>
    %205 = vector.broadcast %204 : vector<1x128xf32> to vector<64x128xf32>
    %206 = arith.addf %203, %205 : vector<64x128xf32>
    %207 = vector.extract_strided_slice %195 {offsets = [0, 0], sizes = [16, 32], strides = [1, 1]} : vector<32x128xf32> to vector<16x32xf32>
    %208 = vector.extract_strided_slice %201 {offsets = [0, 0], sizes = [32, 32], strides = [1, 1]} : vector<64x128xf32> to vector<32x32xf32>
    %209 = vector.extract_strided_slice %206 {offsets = [0, 0], sizes = [32, 32], strides = [1, 1]} : vector<64x128xf32> to vector<32x32xf32>
    %cst_91 = arith.constant dense<0.000000e+00> : vector<16x32xf32>
    %210 = tpu.matmul %207, %208, %cst_91 {dimension_numbers = #tpu.dot_dimension_numbers<[1], [1], [0], [0], [0, 0, 1, 0], [], []>} : vector<16x32xf32>, vector<32x32xf32>, vector<16x32xf32> -> vector<16x32xf32>
    %cst_92 = arith.constant 0.176776692 : f32
    %211 = vector.broadcast %cst_92 : f32 to vector<16x32xf32>
    %212 = arith.mulf %210, %211 : vector<16x32xf32>
    %cst_93 = arith.constant dense<0xFF800000> : vector<16xf32>
    %213 = vector.multi_reduction <maximumf>, %212, %cst_93 [1] : vector<16x32xf32> to vector<16xf32>
    %214 = vector.shape_cast %213 : vector<16xf32> to vector<16x1xf32>
    %215 = vector.broadcast %214 : vector<16x1xf32> to vector<16x32xf32>
    %216 = arith.subf %212, %215 : vector<16x32xf32>
    %217 = math.exp %216 : vector<16x32xf32>
    %cst_94 = arith.constant dense<0.000000e+00> : vector<16xf32>
    %218 = vector.multi_reduction <add>, %217, %cst_94 [1] : vector<16x32xf32> to vector<16xf32>
    %219 = vector.shape_cast %218 : vector<16xf32> to vector<16x1xf32>
    %220 = tpu.reciprocal %219 {approx = true} : vector<16x1xf32> -> vector<16x1xf32>
    %221 = vector.broadcast %220 : vector<16x1xf32> to vector<16x32xf32>
    %222 = arith.mulf %217, %221 : vector<16x32xf32>
    %cst_95 = arith.constant dense<0.000000e+00> : vector<16x32xf32>
    %223 = tpu.matmul %222, %209, %cst_95 {dimension_numbers = #tpu.dot_dimension_numbers<[1], [0], [0], [1], [0, 0, 1, 1], [], []>} : vector<16x32xf32>, vector<32x32xf32>, vector<16x32xf32> -> vector<16x32xf32>
    %224 = vector.extract_strided_slice %195 {offsets = [0, 32], sizes = [16, 32], strides = [1, 1]} : vector<32x128xf32> to vector<16x32xf32>
    %225 = vector.extract_strided_slice %201 {offsets = [0, 32], sizes = [32, 32], strides = [1, 1]} : vector<64x128xf32> to vector<32x32xf32>
    %226 = vector.extract_strided_slice %206 {offsets = [0, 32], sizes = [32, 32], strides = [1, 1]} : vector<64x128xf32> to vector<32x32xf32>
    %cst_96 = arith.constant dense<0.000000e+00> : vector<16x32xf32>
    %227 = tpu.matmul %224, %225, %cst_96 {dimension_numbers = #tpu.dot_dimension_numbers<[1], [1], [0], [0], [0, 0, 1, 0], [], []>} : vector<16x32xf32>, vector<32x32xf32>, vector<16x32xf32> -> vector<16x32xf32>
    %cst_97 = arith.constant 0.176776692 : f32
    %228 = vector.broadcast %cst_97 : f32 to vector<16x32xf32>
    %229 = arith.mulf %227, %228 : vector<16x32xf32>
    %cst_98 = arith.constant dense<0xFF800000> : vector<16xf32>
    %230 = vector.multi_reduction <maximumf>, %229, %cst_98 [1] : vector<16x32xf32> to vector<16xf32>
    %231 = vector.shape_cast %230 : vector<16xf32> to vector<16x1xf32>
    %232 = vector.broadcast %231 : vector<16x1xf32> to vector<16x32xf32>
    %233 = arith.subf %229, %232 : vector<16x32xf32>
    %234 = math.exp %233 : vector<16x32xf32>
    %cst_99 = arith.constant dense<0.000000e+00> : vector<16xf32>
    %235 = vector.multi_reduction <add>, %234, %cst_99 [1] : vector<16x32xf32> to vector<16xf32>
    %236 = vector.shape_cast %235 : vector<16xf32> to vector<16x1xf32>
    %237 = tpu.reciprocal %236 {approx = true} : vector<16x1xf32> -> vector<16x1xf32>
    %238 = vector.broadcast %237 : vector<16x1xf32> to vector<16x32xf32>
    %239 = arith.mulf %234, %238 : vector<16x32xf32>
    %cst_100 = arith.constant dense<0.000000e+00> : vector<16x32xf32>
    %240 = tpu.matmul %239, %226, %cst_100 {dimension_numbers = #tpu.dot_dimension_numbers<[1], [0], [0], [1], [0, 0, 1, 1], [], []>} : vector<16x32xf32>, vector<32x32xf32>, vector<16x32xf32> -> vector<16x32xf32>
    %241 = vector.extract_strided_slice %195 {offsets = [0, 64], sizes = [16, 32], strides = [1, 1]} : vector<32x128xf32> to vector<16x32xf32>
    %242 = vector.extract_strided_slice %201 {offsets = [0, 64], sizes = [32, 32], strides = [1, 1]} : vector<64x128xf32> to vector<32x32xf32>
    %243 = vector.extract_strided_slice %206 {offsets = [0, 64], sizes = [32, 32], strides = [1, 1]} : vector<64x128xf32> to vector<32x32xf32>
    %cst_101 = arith.constant dense<0.000000e+00> : vector<16x32xf32>
    %244 = tpu.matmul %241, %242, %cst_101 {dimension_numbers = #tpu.dot_dimension_numbers<[1], [1], [0], [0], [0, 0, 1, 0], [], []>} : vector<16x32xf32>, vector<32x32xf32>, vector<16x32xf32> -> vector<16x32xf32>
    %cst_102 = arith.constant 0.176776692 : f32
    %245 = vector.broadcast %cst_102 : f32 to vector<16x32xf32>
    %246 = arith.mulf %244, %245 : vector<16x32xf32>
    %cst_103 = arith.constant dense<0xFF800000> : vector<16xf32>
    %247 = vector.multi_reduction <maximumf>, %246, %cst_103 [1] : vector<16x32xf32> to vector<16xf32>
    %248 = vector.shape_cast %247 : vector<16xf32> to vector<16x1xf32>
    %249 = vector.broadcast %248 : vector<16x1xf32> to vector<16x32xf32>
    %250 = arith.subf %246, %249 : vector<16x32xf32>
    %251 = math.exp %250 : vector<16x32xf32>
    %cst_104 = arith.constant dense<0.000000e+00> : vector<16xf32>
    %252 = vector.multi_reduction <add>, %251, %cst_104 [1] : vector<16x32xf32> to vector<16xf32>
    %253 = vector.shape_cast %252 : vector<16xf32> to vector<16x1xf32>
    %254 = tpu.reciprocal %253 {approx = true} : vector<16x1xf32> -> vector<16x1xf32>
    %255 = vector.broadcast %254 : vector<16x1xf32> to vector<16x32xf32>
    %256 = arith.mulf %251, %255 : vector<16x32xf32>
    %cst_105 = arith.constant dense<0.000000e+00> : vector<16x32xf32>
    %257 = tpu.matmul %256, %243, %cst_105 {dimension_numbers = #tpu.dot_dimension_numbers<[1], [0], [0], [1], [0, 0, 1, 1], [], []>} : vector<16x32xf32>, vector<32x32xf32>, vector<16x32xf32> -> vector<16x32xf32>
    %258 = vector.extract_strided_slice %195 {offsets = [0, 96], sizes = [16, 32], strides = [1, 1]} : vector<32x128xf32> to vector<16x32xf32>
    %259 = vector.extract_strided_slice %201 {offsets = [0, 96], sizes = [32, 32], strides = [1, 1]} : vector<64x128xf32> to vector<32x32xf32>
    %260 = vector.extract_strided_slice %206 {offsets = [0, 96], sizes = [32, 32], strides = [1, 1]} : vector<64x128xf32> to vector<32x32xf32>
    %cst_106 = arith.constant dense<0.000000e+00> : vector<16x32xf32>
    %261 = tpu.matmul %258, %259, %cst_106 {dimension_numbers = #tpu.dot_dimension_numbers<[1], [1], [0], [0], [0, 0, 1, 0], [], []>} : vector<16x32xf32>, vector<32x32xf32>, vector<16x32xf32> -> vector<16x32xf32>
    %cst_107 = arith.constant 0.176776692 : f32
    %262 = vector.broadcast %cst_107 : f32 to vector<16x32xf32>
    %263 = arith.mulf %261, %262 : vector<16x32xf32>
    %cst_108 = arith.constant dense<0xFF800000> : vector<16xf32>
    %264 = vector.multi_reduction <maximumf>, %263, %cst_108 [1] : vector<16x32xf32> to vector<16xf32>
    %265 = vector.shape_cast %264 : vector<16xf32> to vector<16x1xf32>
    %266 = vector.broadcast %265 : vector<16x1xf32> to vector<16x32xf32>
    %267 = arith.subf %263, %266 : vector<16x32xf32>
    %268 = math.exp %267 : vector<16x32xf32>
    %cst_109 = arith.constant dense<0.000000e+00> : vector<16xf32>
    %269 = vector.multi_reduction <add>, %268, %cst_109 [1] : vector<16x32xf32> to vector<16xf32>
    %270 = vector.shape_cast %269 : vector<16xf32> to vector<16x1xf32>
    %271 = tpu.reciprocal %270 {approx = true} : vector<16x1xf32> -> vector<16x1xf32>
    %272 = vector.broadcast %271 : vector<16x1xf32> to vector<16x32xf32>
    %273 = arith.mulf %268, %272 : vector<16x32xf32>
    %cst_110 = arith.constant dense<0.000000e+00> : vector<16x32xf32>
    %274 = tpu.matmul %273, %260, %cst_110 {dimension_numbers = #tpu.dot_dimension_numbers<[1], [0], [0], [1], [0, 0, 1, 1], [], []>} : vector<16x32xf32>, vector<32x32xf32>, vector<16x32xf32> -> vector<16x32xf32>
    %275 = tpu.concatenate %223, %240, %257, %274 in 1 : vector<16x32xf32>, vector<16x32xf32>, vector<16x32xf32>, vector<16x32xf32> -> vector<16x128xf32>
    %276 = vector.extract_strided_slice %195 {offsets = [16, 0], sizes = [16, 32], strides = [1, 1]} : vector<32x128xf32> to vector<16x32xf32>
    %277 = vector.extract_strided_slice %201 {offsets = [32, 0], sizes = [32, 32], strides = [1, 1]} : vector<64x128xf32> to vector<32x32xf32>
    %278 = vector.extract_strided_slice %206 {offsets = [32, 0], sizes = [32, 32], strides = [1, 1]} : vector<64x128xf32> to vector<32x32xf32>
    %cst_111 = arith.constant dense<0.000000e+00> : vector<16x32xf32>
    %279 = tpu.matmul %276, %277, %cst_111 {dimension_numbers = #tpu.dot_dimension_numbers<[1], [1], [0], [0], [0, 0, 1, 0], [], []>} : vector<16x32xf32>, vector<32x32xf32>, vector<16x32xf32> -> vector<16x32xf32>
    %cst_112 = arith.constant 0.176776692 : f32
    %280 = vector.broadcast %cst_112 : f32 to vector<16x32xf32>
    %281 = arith.mulf %279, %280 : vector<16x32xf32>
    %cst_113 = arith.constant dense<0xFF800000> : vector<16xf32>
    %282 = vector.multi_reduction <maximumf>, %281, %cst_113 [1] : vector<16x32xf32> to vector<16xf32>
    %283 = vector.shape_cast %282 : vector<16xf32> to vector<16x1xf32>
    %284 = vector.broadcast %283 : vector<16x1xf32> to vector<16x32xf32>
    %285 = arith.subf %281, %284 : vector<16x32xf32>
    %286 = math.exp %285 : vector<16x32xf32>
    %cst_114 = arith.constant dense<0.000000e+00> : vector<16xf32>
    %287 = vector.multi_reduction <add>, %286, %cst_114 [1] : vector<16x32xf32> to vector<16xf32>
    %288 = vector.shape_cast %287 : vector<16xf32> to vector<16x1xf32>
    %289 = tpu.reciprocal %288 {approx = true} : vector<16x1xf32> -> vector<16x1xf32>
    %290 = vector.broadcast %289 : vector<16x1xf32> to vector<16x32xf32>
    %291 = arith.mulf %286, %290 : vector<16x32xf32>
    %cst_115 = arith.constant dense<0.000000e+00> : vector<16x32xf32>
    %292 = tpu.matmul %291, %278, %cst_115 {dimension_numbers = #tpu.dot_dimension_numbers<[1], [0], [0], [1], [0, 0, 1, 1], [], []>} : vector<16x32xf32>, vector<32x32xf32>, vector<16x32xf32> -> vector<16x32xf32>
    %293 = vector.extract_strided_slice %195 {offsets = [16, 32], sizes = [16, 32], strides = [1, 1]} : vector<32x128xf32> to vector<16x32xf32>
    %294 = vector.extract_strided_slice %201 {offsets = [32, 32], sizes = [32, 32], strides = [1, 1]} : vector<64x128xf32> to vector<32x32xf32>
    %295 = vector.extract_strided_slice %206 {offsets = [32, 32], sizes = [32, 32], strides = [1, 1]} : vector<64x128xf32> to vector<32x32xf32>
    %cst_116 = arith.constant dense<0.000000e+00> : vector<16x32xf32>
    %296 = tpu.matmul %293, %294, %cst_116 {dimension_numbers = #tpu.dot_dimension_numbers<[1], [1], [0], [0], [0, 0, 1, 0], [], []>} : vector<16x32xf32>, vector<32x32xf32>, vector<16x32xf32> -> vector<16x32xf32>
    %cst_117 = arith.constant 0.176776692 : f32
    %297 = vector.broadcast %cst_117 : f32 to vector<16x32xf32>
    %298 = arith.mulf %296, %297 : vector<16x32xf32>
    %cst_118 = arith.constant dense<0xFF800000> : vector<16xf32>
    %299 = vector.multi_reduction <maximumf>, %298, %cst_118 [1] : vector<16x32xf32> to vector<16xf32>
    %300 = vector.shape_cast %299 : vector<16xf32> to vector<16x1xf32>
    %301 = vector.broadcast %300 : vector<16x1xf32> to vector<16x32xf32>
    %302 = arith.subf %298, %301 : vector<16x32xf32>
    %303 = math.exp %302 : vector<16x32xf32>
    %cst_119 = arith.constant dense<0.000000e+00> : vector<16xf32>
    %304 = vector.multi_reduction <add>, %303, %cst_119 [1] : vector<16x32xf32> to vector<16xf32>
    %305 = vector.shape_cast %304 : vector<16xf32> to vector<16x1xf32>
    %306 = tpu.reciprocal %305 {approx = true} : vector<16x1xf32> -> vector<16x1xf32>
    %307 = vector.broadcast %306 : vector<16x1xf32> to vector<16x32xf32>
    %308 = arith.mulf %303, %307 : vector<16x32xf32>
    %cst_120 = arith.constant dense<0.000000e+00> : vector<16x32xf32>
    %309 = tpu.matmul %308, %295, %cst_120 {dimension_numbers = #tpu.dot_dimension_numbers<[1], [0], [0], [1], [0, 0, 1, 1], [], []>} : vector<16x32xf32>, vector<32x32xf32>, vector<16x32xf32> -> vector<16x32xf32>
    %310 = vector.extract_strided_slice %195 {offsets = [16, 64], sizes = [16, 32], strides = [1, 1]} : vector<32x128xf32> to vector<16x32xf32>
    %311 = vector.extract_strided_slice %201 {offsets = [32, 64], sizes = [32, 32], strides = [1, 1]} : vector<64x128xf32> to vector<32x32xf32>
    %312 = vector.extract_strided_slice %206 {offsets = [32, 64], sizes = [32, 32], strides = [1, 1]} : vector<64x128xf32> to vector<32x32xf32>
    %cst_121 = arith.constant dense<0.000000e+00> : vector<16x32xf32>
    %313 = tpu.matmul %310, %311, %cst_121 {dimension_numbers = #tpu.dot_dimension_numbers<[1], [1], [0], [0], [0, 0, 1, 0], [], []>} : vector<16x32xf32>, vector<32x32xf32>, vector<16x32xf32> -> vector<16x32xf32>
    %cst_122 = arith.constant 0.176776692 : f32
    %314 = vector.broadcast %cst_122 : f32 to vector<16x32xf32>
    %315 = arith.mulf %313, %314 : vector<16x32xf32>
    %cst_123 = arith.constant dense<0xFF800000> : vector<16xf32>
    %316 = vector.multi_reduction <maximumf>, %315, %cst_123 [1] : vector<16x32xf32> to vector<16xf32>
    %317 = vector.shape_cast %316 : vector<16xf32> to vector<16x1xf32>
    %318 = vector.broadcast %317 : vector<16x1xf32> to vector<16x32xf32>
    %319 = arith.subf %315, %318 : vector<16x32xf32>
    %320 = math.exp %319 : vector<16x32xf32>
    %cst_124 = arith.constant dense<0.000000e+00> : vector<16xf32>
    %321 = vector.multi_reduction <add>, %320, %cst_124 [1] : vector<16x32xf32> to vector<16xf32>
    %322 = vector.shape_cast %321 : vector<16xf32> to vector<16x1xf32>
    %323 = tpu.reciprocal %322 {approx = true} : vector<16x1xf32> -> vector<16x1xf32>
    %324 = vector.broadcast %323 : vector<16x1xf32> to vector<16x32xf32>
    %325 = arith.mulf %320, %324 : vector<16x32xf32>
    %cst_125 = arith.constant dense<0.000000e+00> : vector<16x32xf32>
    %326 = tpu.matmul %325, %312, %cst_125 {dimension_numbers = #tpu.dot_dimension_numbers<[1], [0], [0], [1], [0, 0, 1, 1], [], []>} : vector<16x32xf32>, vector<32x32xf32>, vector<16x32xf32> -> vector<16x32xf32>
    %327 = vector.extract_strided_slice %195 {offsets = [16, 96], sizes = [16, 32], strides = [1, 1]} : vector<32x128xf32> to vector<16x32xf32>
    %328 = vector.extract_strided_slice %201 {offsets = [32, 96], sizes = [32, 32], strides = [1, 1]} : vector<64x128xf32> to vector<32x32xf32>
    %329 = vector.extract_strided_slice %206 {offsets = [32, 96], sizes = [32, 32], strides = [1, 1]} : vector<64x128xf32> to vector<32x32xf32>
    %cst_126 = arith.constant dense<0.000000e+00> : vector<16x32xf32>
    %330 = tpu.matmul %327, %328, %cst_126 {dimension_numbers = #tpu.dot_dimension_numbers<[1], [1], [0], [0], [0, 0, 1, 0], [], []>} : vector<16x32xf32>, vector<32x32xf32>, vector<16x32xf32> -> vector<16x32xf32>
    %cst_127 = arith.constant 0.176776692 : f32
    %331 = vector.broadcast %cst_127 : f32 to vector<16x32xf32>
    %332 = arith.mulf %330, %331 : vector<16x32xf32>
    %cst_128 = arith.constant dense<0xFF800000> : vector<16xf32>
    %333 = vector.multi_reduction <maximumf>, %332, %cst_128 [1] : vector<16x32xf32> to vector<16xf32>
    %334 = vector.shape_cast %333 : vector<16xf32> to vector<16x1xf32>
    %335 = vector.broadcast %334 : vector<16x1xf32> to vector<16x32xf32>
    %336 = arith.subf %332, %335 : vector<16x32xf32>
    %337 = math.exp %336 : vector<16x32xf32>
    %cst_129 = arith.constant dense<0.000000e+00> : vector<16xf32>
    %338 = vector.multi_reduction <add>, %337, %cst_129 [1] : vector<16x32xf32> to vector<16xf32>
    %339 = vector.shape_cast %338 : vector<16xf32> to vector<16x1xf32>
    %340 = tpu.reciprocal %339 {approx = true} : vector<16x1xf32> -> vector<16x1xf32>
    %341 = vector.broadcast %340 : vector<16x1xf32> to vector<16x32xf32>
    %342 = arith.mulf %337, %341 : vector<16x32xf32>
    %cst_130 = arith.constant dense<0.000000e+00> : vector<16x32xf32>
    %343 = tpu.matmul %342, %329, %cst_130 {dimension_numbers = #tpu.dot_dimension_numbers<[1], [0], [0], [1], [0, 0, 1, 1], [], []>} : vector<16x32xf32>, vector<32x32xf32>, vector<16x32xf32> -> vector<16x32xf32>
    %344 = tpu.concatenate %292, %309, %326, %343 in 1 : vector<16x32xf32>, vector<16x32xf32>, vector<16x32xf32>, vector<16x32xf32> -> vector<16x128xf32>
    %345 = tpu.concatenate %275, %344 in 0 : vector<16x128xf32>, vector<16x128xf32> -> vector<32x128xf32>
    %c0_131 = arith.constant 0 : index
    %c0_132 = arith.constant 0 : index
    %346 = vector.load %arg17[%c0_131, %c0_132] : memref<128x128xf32, #tpu.memory_space<vmem>>, vector<128x128xf32>
    %cst_133 = arith.constant dense<0.000000e+00> : vector<32x128xf32>
    %347 = tpu.matmul %345, %346, %cst_133 {dimension_numbers = #tpu.dot_dimension_numbers<[1], [0], [0], [1], [0, 0, 1, 1], [], []>} : vector<32x128xf32>, vector<128x128xf32>, vector<32x128xf32> -> vector<32x128xf32>
    %c0_134 = arith.constant 0 : index
    %c0_135 = arith.constant 0 : index
    %348 = vector.load %arg18[%c0_134, %c0_135] : memref<1x128xf32, #tpu.memory_space<vmem>>, vector<1x128xf32>
    %349 = vector.broadcast %348 : vector<1x128xf32> to vector<32x128xf32>
    %350 = arith.addf %347, %349 : vector<32x128xf32>
    %351 = arith.addf %189, %350 : vector<32x128xf32>
    %cst_136 = arith.constant dense<0.000000e+00> : vector<32xf32>
    %352 = vector.multi_reduction <add>, %351, %cst_136 [1] : vector<32x128xf32> to vector<32xf32>
    %353 = vector.shape_cast %352 : vector<32xf32> to vector<32x1xf32>
    %cst_137 = arith.constant 1.280000e+02 : f32
    %354 = vector.broadcast %cst_137 : f32 to vector<32x1xf32>
    %355 = arith.divf %353, %354 : vector<32x1xf32>
    %356 = vector.broadcast %355 : vector<32x1xf32> to vector<32x128xf32>
    %357 = arith.subf %351, %356 : vector<32x128xf32>
    %358 = arith.mulf %357, %357 : vector<32x128xf32>
    %cst_138 = arith.constant dense<0.000000e+00> : vector<32xf32>
    %359 = vector.multi_reduction <add>, %358, %cst_138 [1] : vector<32x128xf32> to vector<32xf32>
    %360 = vector.shape_cast %359 : vector<32xf32> to vector<32x1xf32>
    %cst_139 = arith.constant 1.280000e+02 : f32
    %361 = vector.broadcast %cst_139 : f32 to vector<32x1xf32>
    %362 = arith.divf %360, %361 : vector<32x1xf32>
    %cst_140 = arith.constant 9.99999974E-6 : f32
    %363 = vector.broadcast %cst_140 : f32 to vector<32x1xf32>
    %364 = arith.addf %362, %363 : vector<32x1xf32>
    %365 = math.rsqrt %364 : vector<32x1xf32>
    %366 = vector.broadcast %365 : vector<32x1xf32> to vector<32x128xf32>
    %367 = arith.mulf %357, %366 : vector<32x128xf32>
    %c1 = arith.constant 1 : index
    %c0_141 = arith.constant 0 : index
    %c0_142 = arith.constant 0 : index
    %368 = vector.load %arg19[%c1, %c0_141, %c0_142] : memref<3x1x128xf32, #tpu.memory_space<vmem>>, vector<1x1x128xf32>
    %369 = vector.shape_cast %368 : vector<1x1x128xf32> to vector<1x128xf32>
    %370 = vector.broadcast %369 : vector<1x128xf32> to vector<32x128xf32>
    %371 = arith.mulf %367, %370 : vector<32x128xf32>
    %c1_143 = arith.constant 1 : index
    %c0_144 = arith.constant 0 : index
    %c0_145 = arith.constant 0 : index
    %372 = vector.load %arg20[%c1_143, %c0_144, %c0_145] : memref<3x1x128xf32, #tpu.memory_space<vmem>>, vector<1x1x128xf32>
    %373 = vector.shape_cast %372 : vector<1x1x128xf32> to vector<1x128xf32>
    %374 = vector.broadcast %373 : vector<1x128xf32> to vector<32x128xf32>
    %375 = arith.addf %371, %374 : vector<32x128xf32>
    %c0_146 = arith.constant 0 : index
    %c0_147 = arith.constant 0 : index
    %376 = vector.load %arg21[%c0_146, %c0_147] : memref<128x256xf32, #tpu.memory_space<vmem>>, vector<128x256xf32>
    %cst_148 = arith.constant dense<0.000000e+00> : vector<32x256xf32>
    %377 = tpu.matmul %375, %376, %cst_148 {dimension_numbers = #tpu.dot_dimension_numbers<[1], [0], [0], [1], [0, 0, 1, 1], [], []>} : vector<32x128xf32>, vector<128x256xf32>, vector<32x256xf32> -> vector<32x256xf32>
    %c0_149 = arith.constant 0 : index
    %c0_150 = arith.constant 0 : index
    %378 = vector.load %arg22[%c0_149, %c0_150] : memref<1x256xf32, #tpu.memory_space<vmem>>, vector<1x256xf32>
    %379 = vector.broadcast %378 : vector<1x256xf32> to vector<32x256xf32>
    %380 = arith.addf %377, %379 : vector<32x256xf32>
    %cst_151 = arith.constant 0.000000e+00 : f32
    %381 = vector.broadcast %cst_151 : f32 to vector<32x256xf32>
    %382 = arith.maximumf %380, %381 : vector<32x256xf32>
    %c0_152 = arith.constant 0 : index
    %c0_153 = arith.constant 0 : index
    %383 = vector.load %arg23[%c0_152, %c0_153] : memref<256x128xf32, #tpu.memory_space<vmem>>, vector<256x128xf32>
    %cst_154 = arith.constant dense<0.000000e+00> : vector<32x128xf32>
    %384 = tpu.matmul %382, %383, %cst_154 {dimension_numbers = #tpu.dot_dimension_numbers<[1], [0], [0], [1], [0, 0, 1, 1], [], []>} : vector<32x256xf32>, vector<256x128xf32>, vector<32x128xf32> -> vector<32x128xf32>
    %c0_155 = arith.constant 0 : index
    %c0_156 = arith.constant 0 : index
    %385 = vector.load %arg24[%c0_155, %c0_156] : memref<1x128xf32, #tpu.memory_space<vmem>>, vector<1x128xf32>
    %386 = vector.broadcast %385 : vector<1x128xf32> to vector<32x128xf32>
    %387 = arith.addf %384, %386 : vector<32x128xf32>
    %388 = arith.addf %375, %387 : vector<32x128xf32>
    %cst_157 = arith.constant dense<0.000000e+00> : vector<32xf32>
    %389 = vector.multi_reduction <add>, %388, %cst_157 [1] : vector<32x128xf32> to vector<32xf32>
    %390 = vector.shape_cast %389 : vector<32xf32> to vector<32x1xf32>
    %cst_158 = arith.constant 1.280000e+02 : f32
    %391 = vector.broadcast %cst_158 : f32 to vector<32x1xf32>
    %392 = arith.divf %390, %391 : vector<32x1xf32>
    %393 = vector.broadcast %392 : vector<32x1xf32> to vector<32x128xf32>
    %394 = arith.subf %388, %393 : vector<32x128xf32>
    %395 = arith.mulf %394, %394 : vector<32x128xf32>
    %cst_159 = arith.constant dense<0.000000e+00> : vector<32xf32>
    %396 = vector.multi_reduction <add>, %395, %cst_159 [1] : vector<32x128xf32> to vector<32xf32>
    %397 = vector.shape_cast %396 : vector<32xf32> to vector<32x1xf32>
    %cst_160 = arith.constant 1.280000e+02 : f32
    %398 = vector.broadcast %cst_160 : f32 to vector<32x1xf32>
    %399 = arith.divf %397, %398 : vector<32x1xf32>
    %cst_161 = arith.constant 9.99999974E-6 : f32
    %400 = vector.broadcast %cst_161 : f32 to vector<32x1xf32>
    %401 = arith.addf %399, %400 : vector<32x1xf32>
    %402 = math.rsqrt %401 : vector<32x1xf32>
    %403 = vector.broadcast %402 : vector<32x1xf32> to vector<32x128xf32>
    %404 = arith.mulf %394, %403 : vector<32x128xf32>
    %c2 = arith.constant 2 : index
    %c0_162 = arith.constant 0 : index
    %c0_163 = arith.constant 0 : index
    %405 = vector.load %arg19[%c2, %c0_162, %c0_163] : memref<3x1x128xf32, #tpu.memory_space<vmem>>, vector<1x1x128xf32>
    %406 = vector.shape_cast %405 : vector<1x1x128xf32> to vector<1x128xf32>
    %407 = vector.broadcast %406 : vector<1x128xf32> to vector<32x128xf32>
    %408 = arith.mulf %404, %407 : vector<32x128xf32>
    %c2_164 = arith.constant 2 : index
    %c0_165 = arith.constant 0 : index
    %c0_166 = arith.constant 0 : index
    %409 = vector.load %arg20[%c2_164, %c0_165, %c0_166] : memref<3x1x128xf32, #tpu.memory_space<vmem>>, vector<1x1x128xf32>
    %410 = vector.shape_cast %409 : vector<1x1x128xf32> to vector<1x128xf32>
    %411 = vector.broadcast %410 : vector<1x128xf32> to vector<32x128xf32>
    %412 = arith.addf %408, %411 : vector<32x128xf32>
    %413 = vector.shape_cast %412 : vector<32x128xf32> to vector<2x16x128xf32>
    %c0_167 = arith.constant 0 : index
    %c0_168 = arith.constant 0 : index
    %c0_169 = arith.constant 0 : index
    %414 = vector.load %arg25[%c0_167, %c0_168, %c0_169] : memref<2x16x128xf32, #tpu.memory_space<vmem>>, vector<2x16x128xf32>
    tpu.vector_store %arg25[%c0_167, %c0_168, %c0_169], %413 {strides = array<i32>} : memref<2x16x128xf32, #tpu.memory_space<vmem>>, vector<2x16x128xf32>,
    return
  }
  func.func @transform_0(%arg0: i32) -> (i32, i32, i32) {
    %c0_i32 = arith.constant 0 : i32
    %c0_i32_0 = arith.constant 0 : i32
    %c0_i32_1 = arith.constant 0 : i32
    return %arg0, %c0_i32, %c0_i32_0 : i32, i32, i32
  }
  func.func @transform_1(%arg0: i32) -> (i32, i32, i32) {
    %c0_i32 = arith.constant 0 : i32
    %c0_i32_0 = arith.constant 0 : i32
    %c0_i32_1 = arith.constant 0 : i32
    return %arg0, %c0_i32, %c0_i32_0 : i32, i32, i32
  }
  func.func @transform_2(%arg0: i32) -> (i32, i32, i32) {
    %c0_i32 = arith.constant 0 : i32
    %c0_i32_0 = arith.constant 0 : i32
    %c0_i32_1 = arith.constant 0 : i32
    return %arg0, %c0_i32, %c0_i32_0 : i32, i32, i32
  }
  func.func @transform_3(%arg0: i32) -> (i32, i32, i32) {
    %c0_i32 = arith.constant 0 : i32
    %c0_i32_0 = arith.constant 0 : i32
    %c0_i32_1 = arith.constant 0 : i32
    return %arg0, %c0_i32, %c0_i32_0 : i32, i32, i32
  }
  func.func @transform_4(%arg0: i32) -> (i32, i32) {
    %c0_i32 = arith.constant 0 : i32
    %c0_i32_0 = arith.constant 0 : i32
    %c0_i32_1 = arith.constant 0 : i32
    return %c0_i32, %c0_i32_0 : i32, i32
  }
  func.func @transform_5(%arg0: i32) -> (i32, i32) {
    %c0_i32 = arith.constant 0 : i32
    %c0_i32_0 = arith.constant 0 : i32
    %c0_i32_1 = arith.constant 0 : i32
    return %c0_i32, %c0_i32_0 : i32, i32
  }
  func.func @transform_6(%arg0: i32) -> (i32, i32) {
    %c0_i32 = arith.constant 0 : i32
    %c0_i32_0 = arith.constant 0 : i32
    %c0_i32_1 = arith.constant 0 : i32
    return %c0_i32, %c0_i32_0 : i32, i32
  }
  func.func @transform_7(%arg0: i32) -> (i32, i32) {
    %c0_i32 = arith.constant 0 : i32
    %c0_i32_0 = arith.constant 0 : i32
    %c0_i32_1 = arith.constant 0 : i32
    return %c0_i32, %c0_i32_0 : i32, i32
  }
  func.func @transform_8(%arg0: i32) -> (i32, i32) {
    %c0_i32 = arith.constant 0 : i32
    %c0_i32_0 = arith.constant 0 : i32
    %c0_i32_1 = arith.constant 0 : i32
    return %c0_i32, %c0_i32_0 : i32, i32
  }
  func.func @transform_9(%arg0: i32) -> (i32, i32) {
    %c0_i32 = arith.constant 0 : i32
    %c0_i32_0 = arith.constant 0 : i32
    %c0_i32_1 = arith.constant 0 : i32
    return %c0_i32, %c0_i32_0 : i32, i32
  }
  func.func @transform_10(%arg0: i32) -> (i32, i32) {
    %c0_i32 = arith.constant 0 : i32
    %c0_i32_0 = arith.constant 0 : i32
    %c0_i32_1 = arith.constant 0 : i32
    return %c0_i32, %c0_i32_0 : i32, i32
  }
  func.func @transform_11(%arg0: i32) -> (i32, i32) {
    %c0_i32 = arith.constant 0 : i32
    %c0_i32_0 = arith.constant 0 : i32
    %c0_i32_1 = arith.constant 0 : i32
    return %c0_i32, %c0_i32_0 : i32, i32
  }
  func.func @transform_12(%arg0: i32) -> (i32, i32) {
    %c0_i32 = arith.constant 0 : i32
    %c0_i32_0 = arith.constant 0 : i32
    %c0_i32_1 = arith.constant 0 : i32
    return %c0_i32, %c0_i32_0 : i32, i32
  }
  func.func @transform_13(%arg0: i32) -> (i32, i32) {
    %c0_i32 = arith.constant 0 : i32
    %c0_i32_0 = arith.constant 0 : i32
    %c0_i32_1 = arith.constant 0 : i32
    return %c0_i32, %c0_i32_0 : i32, i32
  }
  func.func @transform_14(%arg0: i32) -> (i32, i32) {
    %c0_i32 = arith.constant 0 : i32
    %c0_i32_0 = arith.constant 0 : i32
    %c0_i32_1 = arith.constant 0 : i32
    return %c0_i32, %c0_i32_0 : i32, i32
  }
  func.func @transform_15(%arg0: i32) -> (i32, i32) {
    %c0_i32 = arith.constant 0 : i32
    %c0_i32_0 = arith.constant 0 : i32
    %c0_i32_1 = arith.constant 0 : i32
    return %c0_i32, %c0_i32_0 : i32, i32
  }
  func.func @transform_16(%arg0: i32) -> (i32, i32) {
    %c0_i32 = arith.constant 0 : i32
    %c0_i32_0 = arith.constant 0 : i32
    %c0_i32_1 = arith.constant 0 : i32
    return %c0_i32, %c0_i32_0 : i32, i32
  }
  func.func @transform_17(%arg0: i32) -> (i32, i32) {
    %c0_i32 = arith.constant 0 : i32
    %c0_i32_0 = arith.constant 0 : i32
    %c0_i32_1 = arith.constant 0 : i32
    return %c0_i32, %c0_i32_0 : i32, i32
  }
  func.func @transform_18(%arg0: i32) -> (i32, i32, i32) {
    %c0_i32 = arith.constant 0 : i32
    %c0_i32_0 = arith.constant 0 : i32
    %c0_i32_1 = arith.constant 0 : i32
    %c0_i32_2 = arith.constant 0 : i32
    return %c0_i32, %c0_i32_0, %c0_i32_1 : i32, i32, i32
  }
  func.func @transform_19(%arg0: i32) -> (i32, i32, i32) {
    %c0_i32 = arith.constant 0 : i32
    %c0_i32_0 = arith.constant 0 : i32
    %c0_i32_1 = arith.constant 0 : i32
    %c0_i32_2 = arith.constant 0 : i32
    return %c0_i32, %c0_i32_0, %c0_i32_1 : i32, i32, i32
  }
  func.func @transform_20(%arg0: i32) -> (i32, i32) {
    %c0_i32 = arith.constant 0 : i32
    %c0_i32_0 = arith.constant 0 : i32
    %c0_i32_1 = arith.constant 0 : i32
    return %c0_i32, %c0_i32_0 : i32, i32
  }
  func.func @transform_21(%arg0: i32) -> (i32, i32) {
    %c0_i32 = arith.constant 0 : i32
    %c0_i32_0 = arith.constant 0 : i32
    %c0_i32_1 = arith.constant 0 : i32
    return %c0_i32, %c0_i32_0 : i32, i32
  }
  func.func @transform_22(%arg0: i32) -> (i32, i32) {
    %c0_i32 = arith.constant 0 : i32
    %c0_i32_0 = arith.constant 0 : i32
    %c0_i32_1 = arith.constant 0 : i32
    return %c0_i32, %c0_i32_0 : i32, i32
  }
  func.func @transform_23(%arg0: i32) -> (i32, i32) {
    %c0_i32 = arith.constant 0 : i32
    %c0_i32_0 = arith.constant 0 : i32
    %c0_i32_1 = arith.constant 0 : i32
    return %c0_i32, %c0_i32_0 : i32, i32
  }
  func.func @transform_24(%arg0: i32) -> (i32, i32, i32) {
    %c0_i32 = arith.constant 0 : i32
    %c0_i32_0 = arith.constant 0 : i32
    %c0_i32_1 = arith.constant 0 : i32
    return %arg0, %c0_i32, %c0_i32_0 : i32, i32, i32
  }
}

</mosaic_0001>

<bundles_post_ra>
// kernel: tpu_custom_call.1
= control target key start
LH: loop header
LB: loop body
LE: loop exit
PB: predicated region body
PF: predicated region fallthrough
CT: control target
= control target key end

     0   :  { %s8514_s0 = inlined_call_operand.hbm [shape: f32[2,16,128], index: 0, kind: input, shape index: {}]   ;;  %s8515_s1 = inlined_call_operand.hbm [shape: f32[2,32,128], index: 1, kind: input, shape index: {}]   ;;  %s8516_s2 = inlined_call_operand.hbm [shape: f32[2,16,128], index: 2, kind: input, shape index: {}]   ;;  %s8517_s3 = inlined_call_operand.hbm [shape: f32[2,32,128], index: 3, kind: input, shape index: {}]   ;;  %s8518_s4 = inlined_call_operand.hbm [shape: f32[128,256], index: 4, kind: input, shape index: {}]   ;;  %s8519_s5 = inlined_call_operand.vmem [shape: f32[1,256], index: 5, kind: input, shape index: {}]   ;;  %s8520_s6 = inlined_call_operand.hbm [shape: f32[128,128], index: 6, kind: input, shape index: {}]   ;;  %s8521_s7 = inlined_call_operand.vmem [shape: f32[1,128], index: 7, kind: input, shape index: {}]   ;;  %s8522_s8 = inlined_call_operand.hbm [shape: f32[128,128], index: 8, kind: input, shape index: {}]   ;;  %s8523_s9 = inlined_call_operand.vmem [shape: f32[1,128], index: 9, kind: input, shape index: {}]   ;;  %s8524_s10 = inlined_call_operand.hbm [shape: f32[128,128], index: 10, kind: input, shape index: {}]   ;;  %s8525_s11 = inlined_call_operand.vmem [shape: f32[1,128], index: 11, kind: input, shape index: {}]   ;;  %s8526_s12 = inlined_call_operand.hbm [shape: f32[128,128], index: 12, kind: input, shape index: {}]   ;;  %s8527_s13 = inlined_call_operand.vmem [shape: f32[1,128], index: 13, kind: input, shape index: {}]   ;;  %s8528_s14 = inlined_call_operand.hbm [shape: f32[128,128], index: 14, kind: input, shape index: {}]   ;;  %s8529_s15 = inlined_call_operand.vmem [shape: f32[1,128], index: 15, kind: input, shape index: {}]   ;;  %s8530_s16 = inlined_call_operand.hbm [shape: f32[128,128], index: 16, kind: input, shape index: {}]   ;;  %s8531_s17 = inlined_call_operand.vmem [shape: f32[1,128], index: 17, kind: input, shape index: {}]   ;;  %s8532_s18 = inlined_call_operand.vmem [shape: f32[3,1,128], index: 18, kind: input, shape index: {}]   ;;  %s8533_s19 = inlined_call_operand.vmem [shape: f32[3,1,128], index: 19, kind: input, shape index: {}]   ;;  %s8534_s20 = inlined_call_operand.hbm [shape: f32[128,256], index: 20, kind: input, shape index: {}]   ;;  %s8535_s21 = inlined_call_operand.vmem [shape: f32[1,256], index: 21, kind: input, shape index: {}]   ;;  %s8536_s22 = inlined_call_operand.hbm [shape: f32[256,128], index: 22, kind: input, shape index: {}]   ;;  %s8537_s23 = inlined_call_operand.vmem [shape: f32[1,128], index: 23, kind: input, shape index: {}]   ;;  %s8538_s24 = inlined_call_operand.hbm [shape: f32[2,16,128], index: 24, kind: output, shape index: {}]  }
   0x1   :  { %8547 = sst [smem:[#allocation32_spill]] %s8514_s0 }
   0x2   :  { %8548 = sst [smem:[#allocation33_spill]] %s8515_s1 }
   0x3   :  { %8549 = sst [smem:[#allocation34_spill]] %s8516_s2 }
   0x4   :  { %8550 = sst [smem:[#allocation35_spill]] %s8517_s3 }
   0x5   :  { %8551 = sst [smem:[#allocation36_spill]] %s8518_s4 }
   0x6   :  { %8552 = sst [smem:[#allocation37_spill]] %s8519_s5 }
   0x7   :  { %8553 = sst [smem:[#allocation38_spill]] %s8520_s6 }
   0x8   :  { %8554 = sst [smem:[#allocation39_spill]] %s8521_s7 }
   0x9   :  { %8555 = sst [smem:[#allocation40_spill]] %s8522_s8 }
   0xa   :  { %8556 = sst [smem:[#allocation41_spill]] %s8535_s21 }
   0xb   :  { %8557 = sst [smem:[#allocation42_spill]] %s8537_s23 }
   0xc   :  { %8558 = sst [smem:[#allocation43_spill]] %s8538_s24 }
   0xd   :  { %29 = vsyncpa [#allocation3], 0 }
   0xe   :  { %30 = vsyncpa [#allocation6], 0 }
   0xf   :  { %31 = vsyncpa [#allocation9], 0 }
  0x10   :  { %32 = vsyncpa [#allocation12], 0 }
  0x11   :  { %33 = vsyncpa [#allocation15], 0 }
  0x12   :  { %34 = vsyncpa [#allocation18], 0 }
  0x13   :  { %35 = vsyncpa [#allocation21], 0 }
  0x14   :  { %36 = vsyncpa [#allocation4], 0  ;;  %s7309_s5 = smov [#allocation5]   ;;  %s7310_s27 = smov [#allocation8]  }
  0x15   :  { %s54_s26 = sshll.u32 %s7309_s5, 4  ;;  %s78_s28 = sshll.u32 %s7310_s27, 4  ;;  %s55_s26 = int_to_ptr.vmem [resolvable:$true] %s54_s26  ;;  %s7456_s28 = int_to_ptr.vmem [resolvable:$true] %s78_s28 }
  0x16   :  { %s8559_s29 = sld [smem:[#allocation33_spill]] }
  0x1c   :  { %s6985_s0 = scalar_lea.hbm %s8559_s29, 1024 }
  0x1d   :  { %p6986_p0 = scmp.ne.s32.totalorder %s8559_s29, %s6985_s0  ;;  %p6989_p1 = scmp.lt.u32.totalorder %s6985_s0, %s8559_s29 }
  0x1f   :  { %p6991_p2 = pnand %p6989_p1, %p6986_p0 }
  0x21   :  { %6994 = shalt.err (!%p6991_p2)
}
  0x22   :  { %s6995_s8 = scalar_lea.vmem %s55_s26, 1024  ;;  %p7000_p4 = scmp.lt.s32.totalorder %s55_s26, %s55_s26 }
  0x23   :  { %p6996_p3 = scmp.ne.s32.totalorder %s55_s26, %s6995_s8  ;;  %p7001_p5 = scmp.lt.s32.totalorder %s6995_s8, %s6995_s8 }
  0x25   :  { %p7002_p6 = por %p7001_p5, %p7000_p4 }
  0x27   :  { %p7003_p7 = pnand %p7002_p6, %p6996_p3 }
  0x29   :  { %7006 = shalt.err (!%p7003_p7)
}
  0x2a   :  { %s7311_s4 = smov 128   ;;  %s7312_s1 = smov 8  }
  0x2b   :  { %60 = dma.hbm_to_vmem [thread:$0]  %s8559_s29, 1024, %s55_s26, [#allocation6], %s7311_s4, %s7311_s4, %s7312_s1  }
  0x2c   :  { %s8560_s0 = sld [smem:[#allocation35_spill]] }
  0x32   :  { %s7007_s7 = scalar_lea.hbm %s8560_s0, 1024 }
  0x33   :  { %p7008_p8 = scmp.ne.s32.totalorder %s8560_s0, %s7007_s7  ;;  %p7011_p9 = scmp.lt.u32.totalorder %s7007_s7, %s8560_s0 }
  0x35   :  { %p7013_p10 = pnand %p7011_p9, %p7008_p8 }
  0x37   :  { %7016 = shalt.err (!%p7013_p10)
}
  0x38   :  { %s7017_s24 = scalar_lea.vmem %s7456_s28, 1024  ;;  %p7022_p12 = scmp.lt.s32.totalorder %s7456_s28, %s7456_s28 }
  0x39   :  { %p7018_p11 = scmp.ne.s32.totalorder %s7456_s28, %s7017_s24  ;;  %p7023_p13 = scmp.lt.s32.totalorder %s7017_s24, %s7017_s24 }
  0x3b   :  { %p7024_p0 = por %p7023_p13, %p7022_p12 }
  0x3d   :  { %p7025_p1 = pnand %p7024_p0, %p7018_p11 }
  0x3f   :  { %7028 = shalt.err (!%p7025_p1)
}
  0x40   :  { %84 = dma.hbm_to_vmem [thread:$0]  %s8560_s0, 1024, %s7456_s28, [#allocation9], %s7311_s4, %s7311_s4, %s7312_s1  }
  0x41   :  { %s7313_s5 = smov [#allocation11]   ;;  %s7314_s6 = smov [#allocation14]  }
  0x42   :  { %s104_s27 = sshll.u32 %s7313_s5, 4  ;;  %s132_s2 = sshll.u32 %s7314_s6, 4  ;;  %s105_s27 = int_to_ptr.vmem [resolvable:$true] %s104_s27  ;;  %s7493_s2 = int_to_ptr.vmem [resolvable:$true] %s132_s2 }
  0x43   :  { %s8561_s30 = sld [smem:[#allocation38_spill]] }
  0x49   :  { %s7029_s3 = scalar_lea.hbm %s8561_s30, 2048 }
  0x4a   :  { %p7030_p2 = scmp.ne.s32.totalorder %s8561_s30, %s7029_s3  ;;  %p7033_p3 = scmp.lt.u32.totalorder %s7029_s3, %s8561_s30 }
  0x4c   :  { %p7035_p4 = pnand %p7033_p3, %p7030_p2 }
  0x4e   :  { %7038 = shalt.err (!%p7035_p4)
}
  0x4f   :  { %s7039_s28 = scalar_lea.vmem %s105_s27, 2048  ;;  %p7044_p6 = scmp.lt.s32.totalorder %s105_s27, %s105_s27 }
  0x50   :  { %p7040_p5 = scmp.ne.s32.totalorder %s105_s27, %s7039_s28  ;;  %p7045_p7 = scmp.lt.s32.totalorder %s7039_s28, %s7039_s28 }
  0x52   :  { %p7046_p8 = por %p7045_p7, %p7044_p6 }
  0x54   :  { %p7047_p9 = pnand %p7046_p8, %p7040_p5 }
  0x56   :  { %7050 = shalt.err (!%p7047_p9)
}
  0x57   :  { %110 = dma.hbm_to_vmem [thread:$0]  %s8561_s30, 2048, %s105_s27, [#allocation12], %s7311_s4, %s7311_s4, %s7312_s1  }
  0x58   :  { %s7051_s21 = scalar_lea.hbm %s8524_s10, 2048 }
  0x59   :  { %p7052_p10 = scmp.ne.s32.totalorder %s8524_s10, %s7051_s21  ;;  %p7055_p11 = scmp.lt.u32.totalorder %s7051_s21, %s8524_s10 }
  0x5b   :  { %p7057_p12 = pnand %p7055_p11, %p7052_p10 }
  0x5d   :  { %7060 = shalt.err (!%p7057_p12)
}
  0x5e   :  { %s7061_s3 = scalar_lea.vmem %s7493_s2, 2048  ;;  %p7066_p0 = scmp.lt.s32.totalorder %s7493_s2, %s7493_s2 }
  0x5f   :  { %p7062_p13 = scmp.ne.s32.totalorder %s7493_s2, %s7061_s3  ;;  %p7067_p1 = scmp.lt.s32.totalorder %s7061_s3, %s7061_s3 }
  0x61   :  { %p7068_p2 = por %p7067_p1, %p7066_p0 }
  0x63   :  { %p7069_p3 = pnand %p7068_p2, %p7062_p13 }
  0x65   :  { %7072 = shalt.err (!%p7069_p3)
}
  0x66   :  { %138 = dma.hbm_to_vmem [thread:$0]  %s8524_s10, 2048, %s7493_s2, [#allocation15], %s7311_s4, %s7311_s4, %s7312_s1  }
  0x67   :  { %s7315_s25 = smov [#allocation17]   ;;  %s7073_s26 = scalar_lea.hbm %s8528_s14, 2048 }
  0x68   :  { %s160_s8 = sshll.u32 %s7315_s25, 4  ;;  %p7074_p4 = scmp.ne.s32.totalorder %s8528_s14, %s7073_s26  ;;  %s161_s8 = int_to_ptr.vmem [resolvable:$true] %s160_s8 }
  0x69   :  { %p7077_p5 = scmp.lt.u32.totalorder %s7073_s26, %s8528_s14 }
  0x6b   :  { %p7079_p6 = pnand %p7077_p5, %p7074_p4 }
  0x6d   :  { %7082 = shalt.err (!%p7079_p6)
}
  0x6e   :  { %s7083_s6 = scalar_lea.vmem %s161_s8, 2048  ;;  %p7088_p8 = scmp.lt.s32.totalorder %s161_s8, %s161_s8 }
  0x6f   :  { %p7084_p7 = scmp.ne.s32.totalorder %s161_s8, %s7083_s6  ;;  %p7089_p9 = scmp.lt.s32.totalorder %s7083_s6, %s7083_s6 }
  0x71   :  { %p7090_p10 = por %p7089_p9, %p7088_p8 }
  0x73   :  { %p7091_p11 = pnand %p7090_p10, %p7084_p7 }
  0x75   :  { %7094 = shalt.err (!%p7091_p11)
}
  0x76   :  { %166 = dma.hbm_to_vmem [thread:$0]  %s8528_s14, 2048, %s161_s8, [#allocation18], %s7311_s4, %s7311_s4, %s7312_s1  }
  0x77   :  { %s7316_s7 = smov [#allocation20]   ;;  %s7317_s3 = smov [#allocation2]  }
  0x78   :  { %s192_s24 = sshll.u32 %s7316_s7, 4  ;;  %s42_s27 = sshll.u32 %s7317_s3, 4  ;;  %s193_s24 = int_to_ptr.vmem [resolvable:$true] %s192_s24  ;;  %s43_s27 = int_to_ptr.vmem [resolvable:$true] %s42_s27 }
  0x79   :  { %s7095_s28 = scalar_lea.hbm %s8534_s20, 4096 }
  0x7a   :  { %p7096_p12 = scmp.ne.s32.totalorder %s8534_s20, %s7095_s28  ;;  %p7099_p13 = scmp.lt.u32.totalorder %s7095_s28, %s8534_s20 }
  0x7c   :  { %p7101_p0 = pnand %p7099_p13, %p7096_p12 }
  0x7e   :  { %7104 = shalt.err (!%p7101_p0)
}
  0x7f   :  { %s7105_s14 = scalar_lea.vmem %s193_s24, 4096  ;;  %p7110_p2 = scmp.lt.s32.totalorder %s193_s24, %s193_s24 }
  0x80   :  { %p7106_p1 = scmp.ne.s32.totalorder %s193_s24, %s7105_s14  ;;  %p7111_p3 = scmp.lt.s32.totalorder %s7105_s14, %s7105_s14 }
  0x82   :  { %p7112_p4 = por %p7111_p3, %p7110_p2 }
  0x84   :  { %p7113_p5 = pnand %p7112_p4, %p7106_p1 }
  0x86   :  { %7116 = shalt.err (!%p7113_p5)
}
  0x87   :  { %s7318_s8 = smov 256   ;;  %s7319_s21 = smov 16  }
  0x88   :  { %198 = dma.hbm_to_vmem [thread:$0]  %s8534_s20, 4096, %s193_s24, [#allocation21], %s7318_s8, %s7318_s8, %s7319_s21  }
  0x89   :  { %s8562_s7 = sld [smem:[#allocation32_spill]] }
  0x8f   :  { %s7117_s3 = scalar_lea.hbm %s8562_s7, 512 }
  0x90   :  { %p7118_p6 = scmp.ne.s32.totalorder %s8562_s7, %s7117_s3  ;;  %p7121_p7 = scmp.lt.u32.totalorder %s7117_s3, %s8562_s7 }
  0x92   :  { %p7123_p8 = pnand %p7121_p7, %p7118_p6 }
  0x94   :  { %7126 = shalt.err (!%p7123_p8)
}
  0x95   :  { %s7127_s26 = scalar_lea.vmem %s43_s27, 512  ;;  %p7132_p10 = scmp.lt.s32.totalorder %s43_s27, %s43_s27 }
  0x96   :  { %p7128_p9 = scmp.ne.s32.totalorder %s43_s27, %s7127_s26  ;;  %p7133_p11 = scmp.lt.s32.totalorder %s7127_s26, %s7127_s26 }
  0x98   :  { %p7134_p12 = por %p7133_p11, %p7132_p10 }
  0x9a   :  { %p7135_p13 = pnand %p7134_p12, %p7128_p9 }
  0x9c   :  { %7138 = shalt.err (!%p7135_p13)
}
  0x9d   :  { %48 = dma.hbm_to_vmem [thread:$0]  %s8562_s7, 512, %s43_s27, [#allocation3], %s7311_s4, %s7311_s4, %s7312_s1  }
  0x9e   :  { %s7320_s29 = smov [#allocation7]   ;;  %s7321_s14 = smov [#allocation10]  }
  0x9f   :  { %s66_s5 = sshll.u32 %s7320_s29, 4  ;;  %s90_s23 = sshll.u32 %s7321_s14, 4  ;;  %s67_s5 = int_to_ptr.vmem [resolvable:$true] %s66_s5  ;;  %s91_s23 = int_to_ptr.vmem [resolvable:$true] %s90_s23 }
  0xa0   :  { %s8563_s2 = sld [smem:[#allocation34_spill]] }
  0xa6   :  { %s7139_s3 = scalar_lea.hbm %s8563_s2, 512 }
  0xa7   :  { %p7140_p0 = scmp.ne.s32.totalorder %s8563_s2, %s7139_s3  ;;  %p7143_p1 = scmp.lt.u32.totalorder %s7139_s3, %s8563_s2 }
  0xa9   :  { %p7145_p2 = pnand %p7143_p1, %p7140_p0 }
  0xab   :  { %7148 = shalt.err (!%p7145_p2)
}
  0xac   :  { %s7149_s27 = scalar_lea.vmem %s67_s5, 512  ;;  %p7154_p4 = scmp.lt.s32.totalorder %s67_s5, %s67_s5 }
  0xad   :  { %p7150_p3 = scmp.ne.s32.totalorder %s67_s5, %s7149_s27  ;;  %p7155_p5 = scmp.lt.s32.totalorder %s7149_s27, %s7149_s27 }
  0xaf   :  { %p7156_p6 = por %p7155_p5, %p7154_p4 }
  0xb1   :  { %p7157_p7 = pnand %p7156_p6, %p7150_p3 }
  0xb3   :  { %7160 = shalt.err (!%p7157_p7)
}
  0xb4   :  { %72 = dma.hbm_to_vmem [thread:$0]  %s8563_s2, 512, %s67_s5, [#allocation6], %s7311_s4, %s7311_s4, %s7312_s1  }
  0xb5   :  { %s8564_s29 = sld [smem:[#allocation36_spill]] }
  0xbb   :  { %s7161_s14 = scalar_lea.hbm %s8564_s29, 4096 }
  0xbc   :  { %p7162_p8 = scmp.ne.s32.totalorder %s8564_s29, %s7161_s14  ;;  %p7165_p9 = scmp.lt.u32.totalorder %s7161_s14, %s8564_s29 }
  0xbe   :  { %p7167_p10 = pnand %p7165_p9, %p7162_p8 }
  0xc0   :  { %7170 = shalt.err (!%p7167_p10)
}
  0xc1   :  { %s7171_s25 = scalar_lea.vmem %s91_s23, 4096  ;;  %p7176_p12 = scmp.lt.s32.totalorder %s91_s23, %s91_s23 }
  0xc2   :  { %p7172_p11 = scmp.ne.s32.totalorder %s91_s23, %s7171_s25  ;;  %p7177_p13 = scmp.lt.s32.totalorder %s7171_s25, %s7171_s25 }
  0xc4   :  { %p7178_p0 = por %p7177_p13, %p7176_p12 }
  0xc6   :  { %p7179_p1 = pnand %p7178_p0, %p7172_p11 }
  0xc8   :  { %7182 = shalt.err (!%p7179_p1)
}
  0xc9   :  { %96 = dma.hbm_to_vmem [thread:$0]  %s8564_s29, 4096, %s91_s23, [#allocation9], %s7318_s8, %s7318_s8, %s7319_s21  }
  0xca   :  { %s7322_s28 = smov [#allocation13]   ;;  %s7323_s27 = smov [#allocation16]  }
  0xcb   :  { %s118_s0 = sshll.u32 %s7322_s28, 4  ;;  %s146_s7 = sshll.u32 %s7323_s27, 4  ;;  %s119_s0 = int_to_ptr.vmem [resolvable:$true] %s118_s0  ;;  %s147_s7 = int_to_ptr.vmem [resolvable:$true] %s146_s7 }
  0xcc   :  { %s8565_s24 = sld [smem:[#allocation40_spill]] }
  0xd2   :  { %s7183_s14 = scalar_lea.hbm %s8565_s24, 2048 }
  0xd3   :  { %p7184_p2 = scmp.ne.s32.totalorder %s8565_s24, %s7183_s14  ;;  %p7187_p3 = scmp.lt.u32.totalorder %s7183_s14, %s8565_s24 }
  0xd5   :  { %p7189_p4 = pnand %p7187_p3, %p7184_p2 }
  0xd7   :  { %7192 = shalt.err (!%p7189_p4)
}
  0xd8   :  { %s7193_s8 = scalar_lea.vmem %s119_s0, 2048  ;;  %p7198_p6 = scmp.lt.s32.totalorder %s119_s0, %s119_s0 }
  0xd9   :  { %p7194_p5 = scmp.ne.s32.totalorder %s119_s0, %s7193_s8  ;;  %p7199_p7 = scmp.lt.s32.totalorder %s7193_s8, %s7193_s8 }
  0xdb   :  { %p7200_p8 = por %p7199_p7, %p7198_p6 }
  0xdd   :  { %p7201_p9 = pnand %p7200_p8, %p7194_p5 }
  0xdf   :  { %7204 = shalt.err (!%p7201_p9)
}
  0xe0   :  { %124 = dma.hbm_to_vmem [thread:$0]  %s8565_s24, 2048, %s119_s0, [#allocation12], %s7311_s4, %s7311_s4, %s7312_s1  }
  0xe1   :  { %s7205_s5 = scalar_lea.hbm %s8526_s12, 2048 }
  0xe2   :  { %p7206_p10 = scmp.ne.s32.totalorder %s8526_s12, %s7205_s5  ;;  %p7209_p11 = scmp.lt.u32.totalorder %s7205_s5, %s8526_s12 }
  0xe4   :  { %p7211_p12 = pnand %p7209_p11, %p7206_p10 }
  0xe6   :  { %7214 = shalt.err (!%p7211_p12)
}
  0xe7   :  { %s7215_s20 = scalar_lea.vmem %s147_s7, 2048  ;;  %p7220_p0 = scmp.lt.s32.totalorder %s147_s7, %s147_s7 }
  0xe8   :  { %p7216_p13 = scmp.ne.s32.totalorder %s147_s7, %s7215_s20  ;;  %p7221_p1 = scmp.lt.s32.totalorder %s7215_s20, %s7215_s20 }
  0xea   :  { %p7222_p2 = por %p7221_p1, %p7220_p0 }
  0xec   :  { %p7223_p3 = pnand %p7222_p2, %p7216_p13 }
  0xee   :  { %7226 = shalt.err (!%p7223_p3)
}
  0xef   :  { %152 = dma.hbm_to_vmem [thread:$0]  %s8526_s12, 2048, %s147_s7, [#allocation15], %s7311_s4, %s7311_s4, %s7312_s1  }
  0xf0   :  { %s7324_s14 = smov [#allocation19]   ;;  %s7325_s10 = smov [#allocation22]  }
  0xf1   :  { %s174_s6 = sshll.u32 %s7324_s14, 4  ;;  %s206_s3 = sshll.u32 %s7325_s10, 4  ;;  %s175_s6 = int_to_ptr.vmem [resolvable:$true] %s174_s6  ;;  %s207_s3 = int_to_ptr.vmem [resolvable:$true] %s206_s3 }
  0xf2   :  { %s7227_s21 = scalar_lea.hbm %s8530_s16, 2048 }
  0xf3   :  { %p7228_p4 = scmp.ne.s32.totalorder %s8530_s16, %s7227_s21  ;;  %p7231_p5 = scmp.lt.u32.totalorder %s7227_s21, %s8530_s16 }
  0xf5   :  { %p7233_p6 = pnand %p7231_p5, %p7228_p4 }
  0xf7   :  { %7236 = shalt.err (!%p7233_p6)
}
  0xf8   :  { %s7237_s12 = scalar_lea.vmem %s175_s6, 2048  ;;  %p7242_p8 = scmp.lt.s32.totalorder %s175_s6, %s175_s6 }
  0xf9   :  { %p7238_p7 = scmp.ne.s32.totalorder %s175_s6, %s7237_s12  ;;  %p7243_p9 = scmp.lt.s32.totalorder %s7237_s12, %s7237_s12 }
  0xfb   :  { %p7244_p10 = por %p7243_p9, %p7242_p8 }
  0xfd   :  { %p7245_p11 = pnand %p7244_p10, %p7238_p7 }
  0xff   :  { %7248 = shalt.err (!%p7245_p11)
}
 0x100   :  { %180 = dma.hbm_to_vmem [thread:$0]  %s8530_s16, 2048, %s175_s6, [#allocation18], %s7311_s4, %s7311_s4, %s7312_s1  }
 0x101   :  { %s7249_s26 = scalar_lea.hbm %s8536_s22, 4096 }
 0x102   :  { %p7250_p12 = scmp.ne.s32.totalorder %s8536_s22, %s7249_s26  ;;  %p7253_p13 = scmp.lt.u32.totalorder %s7249_s26, %s8536_s22 }
 0x104   :  { %p7255_p0 = pnand %p7253_p13, %p7250_p12 }
 0x106   :  { %7258 = shalt.err (!%p7255_p0)
}
 0x107   :  { %s7259_s10 = scalar_lea.vmem %s207_s3, 4096  ;;  %p7264_p2 = scmp.lt.s32.totalorder %s207_s3, %s207_s3 }
 0x108   :  { %p7260_p1 = scmp.ne.s32.totalorder %s207_s3, %s7259_s10  ;;  %p7265_p3 = scmp.lt.s32.totalorder %s7259_s10, %s7259_s10 }
 0x10a   :  { %p7266_p4 = por %p7265_p3, %p7264_p2 }
 0x10c   :  { %p7267_p5 = pnand %p7266_p4, %p7260_p1 }
 0x10e   :  { %7270 = shalt.err (!%p7267_p5)
}
 0x10f   :  { %212 = dma.hbm_to_vmem [thread:$0]  %s8536_s22, 4096, %s207_s3, [#allocation21], %s7311_s4, %s7311_s4, %s7312_s1  }
 0x110   :  { %7293 = dma.done.wait [#allocation3], 512  }
 0x111   :  { %7294 = vsyncadd [#allocation3], 4294966784 }
 0x112   :  { %7295 = dma.done.wait [#allocation6], 1536  }
 0x113   :  { %7296 = vsyncadd [#allocation6], 4294965760 }
 0x114   :  { %7297 = dma.done.wait [#allocation9], 5120  }
 0x115   :  { %7298 = vsyncadd [#allocation9], 4294962176 }
 0x116   :  { %7299 = dma.done.wait [#allocation12], 4096  }
 0x117   :  { %7300 = vsyncadd [#allocation12], 4294963200 }
 0x118   :  { %7301 = dma.done.wait [#allocation15], 4096  }
 0x119   :  { %7302 = vsyncadd [#allocation15], 4294963200 }
 0x11a   :  { %7303 = dma.done.wait [#allocation18], 4096  }
 0x11b   :  { %7304 = vsyncadd [#allocation18], 4294963200 }
 0x11c   :  { %7305 = dma.done.wait [#allocation21], 8192  }
 0x11d   :  { %7306 = vsyncadd [#allocation21], 4294959104  ;;  %v7326_v0 = vmov 0.0   ;;  %v283_v1 = vld [vmem:[#allocation10 + $0x8] sm:$0xff]  ;;  %v285_v2 = vld [vmem:[#allocation10 + $0x18] sm:$0xff]  ;;  %s8566_s30 = sld [smem:[#allocation37_spill]] }
 0x11e   :  { %390 = vmatprep.mubr.f32.mxu0 %v7326_v0  ;;  %v282_v3 = vld [vmem:[#allocation10] sm:$0xff]  ;;  %v6035_v4 = vpack.c.bf16 %v285_v2, %v283_v1  ;;  %v284_v5 = vld [vmem:[#allocation10 + $0x10] sm:$0xff]  ;;  %v287_v6 = vld [vmem:[#allocation10 + $0x28] sm:$0xff]  ;;  %vm523_vm0 = vcmask 261120   ;;  %s7327_s8 = smov 96   ;;  %vm613_vm2 = vcmask 130048  }
 0x11f   :  { %v289_v7 = vld [vmem:[#allocation10 + $0x38] sm:$0xff]  ;;  %v6037_v8 = vpack.c.bf16 %v284_v5, %v282_v3  ;;  %v286_v10 = vld [vmem:[#allocation10 + $0x20] sm:$0xff]  ;;  %v288_v11 = vld [vmem:[#allocation10 + $0x30] sm:$0xff]  ;;  %s8569_s29 = sld [smem:[#allocation39_spill]]  ;;  %s7328_s25 = smov 64   ;;  %vm1351_vm3 = vcmask 523264  }
 0x120   :  { %v6039_v9 = vpack.c.bf16 %v289_v7, %v287_v6  ;;  %v291_v12 = vld [vmem:[#allocation10 + $0x48] sm:$0xff]  ;;  %6036 = vmatprep.subr.bf16.mxu0 %v6035_v4  ;;  %v293_v13 = vld [vmem:[#allocation10 + $0x58] sm:$0xff]  ;;  %v6041_v14 = vpack.c.bf16 %v288_v11, %v286_v10  ;;  %v290_v16 = vld [vmem:[#allocation10 + $0x40] sm:$0xff]  ;;  %s7329_s5 = smov 32   ;;  %vm1354_vm4 = vcmask 785408   ;;  %s8571_s23 = sld [smem:[#allocation42_spill]] }
 0x121   :  { %6038 = vmatpush1.bf16.msra.mxu0 %v6037_v8  ;;  %v6043_v15 = vpack.c.bf16 %v293_v13, %v291_v12  ;;  %v292_v17 = vld [vmem:[#allocation10 + $0x50] sm:$0xff]  ;;  %v295_v18 = vld [vmem:[#allocation10 + $0x68] sm:$0xff]  ;;  %v297_v19 = vld [vmem:[#allocation10 + $0x78] sm:$0xff] }
 0x122   :  { %6040 = vmatprep.subr.bf16.mxu0 %v6039_v9  ;;  %v6045_v20 = vpack.c.bf16 %v292_v17, %v290_v16  ;;  %v6047_v21 = vpack.c.bf16 %v297_v19, %v295_v18  ;;  %v294_v22 = vld [vmem:[#allocation10 + $0x60] sm:$0xff]  ;;  %v296_v23 = vld [vmem:[#allocation10 + $0x70] sm:$0xff]  ;;  %v299_v24 = vld [vmem:[#allocation10 + $0x88] sm:$0xff]  ;;  %v316_v18 = vlaneseq }
 0x123   :  { %v301_v25 = vld [vmem:[#allocation10 + $0x98] sm:$0xff]  ;;  %v7666_v26 = vld [vmem:[#allocation2] sm:$0xff]  ;;  %v6049_v28 = vpack.c.bf16 %v296_v23, %v294_v22  ;;  %v416_v30 = vld [vmem:[#allocation11 + $0x8] sm:$0xff] }
 0x124   :  { %v298_v27 = vld [vmem:[#allocation10 + $0x80] sm:$0xff]  ;;  %5539 = vmatprep.mubr.f32.mxu1 %v7666_v26  ;;  %v417_v31 = vld [vmem:[#allocation11 + $0x10] sm:$0xff]  ;;  %v6051_v32 = vpack.c.bf16 %v301_v25, %v299_v24  ;;  %v303_v34 = vld [vmem:[#allocation10 + $0xa8] sm:$0xff]  ;;  %v7672_v19 = vshrl.u32 %v316_v18, 7 }
 0x125   :  { %6042 = vmatpush1.bf16.msra.mxu0 %v6041_v14  ;;  %v415_v29 = vld [vmem:[#allocation11] sm:$0xff]  ;;  %v300_v33 = vld [vmem:[#allocation10 + $0x90] sm:$0xff]  ;;  %v418_v36 = vld [vmem:[#allocation11 + $0x18] sm:$0xff] }
 0x126   :  { %6044 = vmatprep.subr.bf16.mxu0 %v6043_v15  ;;  %v6067_v35 = vpack.c.bf16 %v416_v30, %v415_v29  ;;  %v305_v37 = vld [vmem:[#allocation10 + $0xb8] sm:$0xff]  ;;  %v6071_v38 = vpack.c.bf16 %v418_v36, %v417_v31  ;;  %v419_v39 = vld [vmem:[#allocation11 + $0x20] sm:$0xff]  ;;  %v420_v40 = vld [vmem:[#allocation11 + $0x28] sm:$0xff]  ;;  %v6053_v41 = vpack.c.bf16 %v300_v33, %v298_v27 }
 0x127   :  { %v6055_v42 = vpack.c.bf16 %v305_v37, %v303_v34  ;;  %v302_v43 = vld [vmem:[#allocation10 + $0xa0] sm:$0xff]  ;;  %v304_v44 = vld [vmem:[#allocation10 + $0xb0] sm:$0xff]  ;;  %v307_v45 = vld [vmem:[#allocation10 + $0xc8] sm:$0xff]  ;;  %v6075_v46 = vpack.c.bf16 %v420_v40, %v419_v39 }
 0x128   :  { %6068 = vmatprep.subr.bf16.mxu1 %v6067_v35  ;;  %v309_v47 = vld [vmem:[#allocation10 + $0xd8] sm:$0xff]  ;;  %v421_v48 = vld [vmem:[#allocation11 + $0x30] sm:$0xff]  ;;  %v6057_v50 = vpack.c.bf16 %v304_v44, %v302_v43  ;;  %v306_v52 = vld [vmem:[#allocation10 + $0xc0] sm:$0xff] }
 0x129   :  { %6046 = vmatpush1.bf16.msra.mxu0 %v6045_v20  ;;  %6070 = vmatpush3.bf16.msra.mxu1 %v6067_v35  ;;  %v422_v49 = vld [vmem:[#allocation11 + $0x38] sm:$0xff]  ;;  %v6059_v51 = vpack.c.bf16 %v309_v47, %v307_v45  ;;  %v308_v53 = vld [vmem:[#allocation10 + $0xd0] sm:$0xff]  ;;  %v311_v54 = vld [vmem:[#allocation10 + $0xe8] sm:$0xff]  ;;  %v318_v20 = vsub.s32 0, %v7672_v19 }
 0x12a   :  { %6048 = vmatprep.subr.bf16.mxu0 %v6047_v21  ;;  %6072 = vmatprep.subr.bf16.mxu1 %v6071_v38  ;;  %v6079_v55 = vpack.c.bf16 %v422_v49, %v421_v48  ;;  %v313_v56 = vld [vmem:[#allocation10 + $0xf8] sm:$0xff]  ;;  %v423_v57 = vld [vmem:[#allocation11 + $0x40] sm:$0xff]  ;;  %v424_v58 = vld [vmem:[#allocation11 + $0x48] sm:$0xff]  ;;  %v6061_v59 = vpack.c.bf16 %v308_v53, %v306_v52 }
 0x12b   :  { %v6063_v60 = vpack.c.bf16 %v313_v56, %v311_v54  ;;  %v310_v61 = vld [vmem:[#allocation10 + $0xe0] sm:$0xff]  ;;  %v312_v62 = vld [vmem:[#allocation10 + $0xf0] sm:$0xff]  ;;  %v6083_v63 = vpack.c.bf16 %v424_v58, %v423_v57  ;;  %v426_v2 = vld [vmem:[#allocation11 + $0x58] sm:$0xff] }
 0x12c   :  { %v425_v1 = vld [vmem:[#allocation11 + $0x50] sm:$0xff]  ;;  %v6065_v3 = vpack.c.bf16 %v312_v62, %v310_v61  ;;  %v266_v4 = vld [vmem:[#allocation7] sm:$0xff]  ;;  %v428_v7 = vld [vmem:[#allocation11 + $0x68] sm:$0xff] }
 0x12d   :  { %6050 = vmatpush1.bf16.msra.mxu0 %v6049_v28  ;;  %6074 = vmatpush3.bf16.msra.mxu1 %v6071_v38  ;;  %v6087_v5 = vpack.c.bf16 %v426_v2, %v425_v1  ;;  %v427_v6 = vld [vmem:[#allocation11 + $0x60] sm:$0xff]  ;;  %v278_v8 = vadd.f32 %v266_v4, %v7666_v26  ;;  %v255_v9 = vld [vmem:[#allocation2 + $0x8] sm:$0xff]  ;;  %v429_v12 = vld [vmem:[#allocation11 + $0x70] sm:$0xff]  ;;  %v322_v26 = vsub.s32 1, %v7672_v19 }
 0x12e   :  { %6052 = vmatprep.subr.bf16.mxu0 %v6051_v32  ;;  %6076 = vmatprep.subr.bf16.mxu1 %v6075_v46  ;;  %v267_v10 = vld [vmem:[#allocation7 + $0x8] sm:$0xff]  ;;  %v6091_v11 = vpack.c.bf16 %v428_v7, %v427_v6  ;;  %v430_v13 = vld [vmem:[#allocation11 + $0x78] sm:$0xff]  ;;  %v256_v16 = vld [vmem:[#allocation2 + $0x10] sm:$0xff] }
 0x12f   :  { %v279_v14 = vadd.f32 %v267_v10, %v255_v9  ;;  %v6095_v15 = vpack.c.bf16 %v430_v13, %v429_v12  ;;  %v257_v17 = vld [vmem:[#allocation2 + $0x18] sm:$0xff]  ;;  %v268_v21 = vld [vmem:[#allocation7 + $0x10] sm:$0xff]  ;;  %v314_v22 = vld [vmem:[%s8566_s30] sm:$0x3]  ;;  %s8570_s30 = sld [smem:[#allocation41_spill]] }
 0x130   :  { %v280_v23 = vadd.f32 %v268_v21, %v256_v16  ;;  %v7680_v24 = vrot.slane %v314_v22, %v318_v20  ;;  %v269_v25 = vld [vmem:[#allocation7 + $0x18] sm:$0xff]  ;;  %v323_v31 = vrot.slane %v314_v22, %v322_v26  ;;  %vm7698_vm1 = vmpackc.low %vm523_vm0, %vm523_vm0 }
 0x131   :  { %6054 = vmatpush1.bf16.msra.mxu0 %v6053_v41  ;;  %6078 = vmatpush3.bf16.msra.mxu1 %v6075_v46  ;;  %v281_v27 = vadd.f32 %v269_v25, %v257_v17 }
 0x132   :  { %6056 = vmatprep.subr.bf16.mxu0 %v6055_v42  ;;  %6080 = vmatprep.subr.bf16.mxu1 %v6079_v55 }
 0x135   :  { %6058 = vmatpush1.bf16.msra.mxu0 %v6057_v50  ;;  %6082 = vmatpush3.bf16.msra.mxu1 %v6079_v55 }
 0x136   :  { %6060 = vmatprep.subr.bf16.mxu0 %v6059_v51  ;;  %6084 = vmatprep.subr.bf16.mxu1 %v6083_v63 }
 0x139   :  { %6062 = vmatpush1.bf16.msra.mxu0 %v6061_v59  ;;  %6086 = vmatpush3.bf16.msra.mxu1 %v6083_v63 }
 0x13a   :  { %6064 = vmatprep.subr.bf16.mxu0 %v6063_v60  ;;  %6088 = vmatprep.subr.bf16.mxu1 %v6087_v5 }
 0x13d   :  { %6066 = vmatpush1.bf16.msra.mxu0 %v6065_v3  ;;  %6090 = vmatpush3.bf16.msra.mxu1 %v6087_v5  ;;  %v7741_v3 = vld [vmem:[%s8569_s29] ss:$0 sm:$0xff] }
 0x13e   :  { %6092 = vmatprep.subr.bf16.mxu1 %v6091_v11 }
 0x140   :  { %391 = vmatmul.mubr.f32.vlgmr.msra.gmra.mrb[0].mxu0 %v278_v8 }
 0x141   :  { %396 = vmatprep.mubr.f32.mxu0 %v7326_v0  ;;  %6094 = vmatpush3.bf16.msra.mxu1 %v6091_v11 }
 0x142   :  { %6096 = vmatprep.subr.bf16.mxu1 %v6095_v15 }
 0x144   :  { %397 = vmatmul.mubr.f32.gmra.mrb[2].mxu0 %v279_v14 }
 0x145   :  { %402 = vmatprep.mubr.f32.mxu0 %v7326_v0  ;;  %6098 = vmatpush3.bf16.msra.mxu1 %v6095_v15 }
 0x148   :  { %5540 = vmatmul.mubr.f32.vlgmr.msra.gmra.mrb[0].mxu1 %v255_v9  ;;  %403 = vmatmul.mubr.f32.gmra.mrb[4].mxu0 %v280_v23 }
 0x149   :  { %5542 = vmatprep.mubr.f32.mxu1 %v256_v16  ;;  %408 = vmatprep.mubr.f32.mxu0 %v7326_v0 }
 0x14c   :  { %5543 = vmatmul.mubr.f32.gmra.mrb[2].mxu1 %v257_v17  ;;  %409 = vmatmul.mubr.f32.gmra.mrb[6].mxu0 %v281_v27 }
 0x213   :  { %v392_v28 = vpop.f32.mrb[0].mxu0 }
 0x214   :  { %v7685_v29 = vadd.f32 %v392_v28, %v7680_v24  ;;  %v394_v30 = vpop.f32.mrb[1].mxu0 }
 0x215   :  { %v395_v35 = vadd.f32 %v394_v30, %v323_v31 }
 0x216   :  { %5549 = vmatprep.mubr.msk.f32.mxu1 %vm523_vm0, %v7685_v29 }
 0x217   :  { %v398_v32 = vpop.f32.mrb[2].mxu0 }
 0x218   :  { %v7692_v33 = vadd.f32 %v398_v32, %v7680_v24  ;;  %v400_v34 = vpop.f32.mrb[3].mxu0 }
 0x219   :  { %v401_v36 = vadd.f32 %v400_v34, %v323_v31 }
 0x21a   :  { %719 = vrot.lane.b32.xlu1 %v7692_v33, %s7327_s8 }
 0x21b   :  { %v7702_v38 = vpack.i.bf16 %v401_v36, %v395_v35  ;;  %v6099_v39 = vpack.c.bf16 %v401_v36, %v395_v35  ;;  %v5541_v40 = vpop.f32.mrb[0].mxu1  ;;  %v7724_v50 = vpop.f32.mrb[4].mxu0 }
 0x21c   :  { %v504_v41 = vpop.f32.mrb[1].mxu1  ;;  %v406_v51 = vpop.f32.mrb[5].mxu0  ;;  %v510_v4 = vadd.f32 %v5541_v40, %v7741_v3 }
 0x21d   :  { %6586 = vrot.lane.b32.xlu0 %v7702_v38, %s7327_s8  ;;  %6101 = vmatprep.subr.msk.bf16.mxu1 %vm7698_vm1, %v6099_v39  ;;  %v407_v52 = vadd.f32 %v406_v51, %v323_v31  ;;  %v505_v5 = vadd.f32 %v7741_v3, %v504_v41 }
 0x21e   :  { %6104 = vmatpush3.bf16.xpose.msk.msra.mxu1 %vm7698_vm1, %v6099_v39 }
 0x21f   :  { %v7714_v42 = vpop.f32.mrb[2].mxu1  ;;  %v7726_v53 = vpop.f32.mrb[6].mxu0  ;;  %v7745_v6 = vpack.i.bf16 %v510_v4, %v505_v5  ;;  %v6105_v7 = vpack.c.bf16 %v510_v4, %v505_v5 }
 0x220   :  { %v7716_v43 = vpop.f32.mrb[3].mxu1  ;;  %v412_v54 = vpop.f32.mrb[7].mxu0 }
 0x221   :  { %717 = vrot.lane.b32.xlu0 %v7685_v29, %s7327_s8  ;;  %v413_v55 = vadd.f32 %v412_v54, %v323_v31  ;;  %6106 = vmatprep.subr.bf16.mxu1 %v6105_v7 }
 0x223   :  { %v7728_v56 = vpack.c.bf16 %v413_v55, %v407_v52  ;;  %v7730_v57 = vpack.i.bf16 %v413_v55, %v407_v52 }
 0x225   :  { %5550 = vmatmul.mubr.msk.f32.vlgmr.msra.gmra.mrb[4].mxu1 %vm523_vm0, %v7692_v33 }
 0x226   :  { %6108 = vmatpush3.bf16.msra.mxu1 %v6105_v7 }
 0x28c   :  { %v720_v49 = vpop.permute.xlu1 %719 }
 0x28f   :  { %v6587_v44 = vpop.permute.xlu0 %6586 }
 0x290   :  { %v6589_v45 = vunpack.i.h.bf16 %v6587_v44  ;;  %v6588_v46 = vunpack.i.l.bf16 %v6587_v44 }
 0x292   :  { %v6109_v47 = vpack.c.bf16 %v6589_v45, %v6588_v46 }
 0x293   :  { %v718_v48 = vpop.permute.xlu0 %717 }
 0x294   :  { %6111 = vmatprep.subr.msk.bf16.mxu0 %vm7698_vm1, %v6109_v47  ;;  %5563 = vmatprep.mubr.msk.f32.mxu0 %vm523_vm0, %v718_v48 }
 0x295   :  { %6114 = vmatpush3.bf16.xpose.msk.msra.mxu0 %vm7698_vm1, %v6109_v47 }
 0x29c   :  { %5564 = vmatmul.mubr.msk.f32.vlgmr.msra.gmra.mrb[8].mxu0 %vm523_vm0, %v720_v49 }
 0x2f8   :  { %v7732_v58 = vpop.f32.mrb[4].mxu1 }
 0x2f9   :  { %v7734_v59 = vpop.f32.mrb[5].mxu1 }
 0x36f   :  { %v5565_v60 = vpop.f32.mrb[8].mxu0 }
 0x370   :  { %v809_v61 = vmul.f32 0.17677669, %v5565_v60  ;;  %v799_v62 = vpop.f32.mrb[9].mxu0 }
 0x371   :  { %v808_v63 = vmul.f32 0.17677669, %v799_v62 }
 0x372   :  { %v813_v1 = vsel %vm613_vm2, %v809_v61, -inf }
 0x373   :  { %814 = vmax.xlane.f32.xlu0 %v813_v1  ;;  %v810_v2 = vsel %vm613_vm2, %v808_v63, -inf }
 0x374   :  { %811 = vmax.xlane.f32.xlu1 %v810_v2 }
 0x400   :  { %v815_v8 = vpop.xlane.xlu0 %814 }
 0x401   :  { %v817_v9 = vsub.f32 %v809_v61, %v815_v8  ;;  %v812_v10 = vpop.xlane.xlu1 %811 }
 0x402   :  { %v816_v11 = vsub.f32 %v808_v63, %v812_v10 }
 0x403   :  { %v820_v12 = vmul.f32 1.442695, %v817_v9 }
 0x404   :  { %v818_v13 = vmul.f32 1.442695, %v816_v11 }
 0x405   :  { %6825 = vpow2.f32 %v820_v12 }
 0x406   :  { %6827 = vpow2.f32 %v818_v13 }
 0x40f   :  { %v6826_v14 = vpop.eup %6825 }
 0x410   :  { %v6828_v15 = vpop.eup %6827  ;;  %v825_v16 = vsel %vm613_vm2, %v6826_v14, 0.0 }
 0x411   :  { %826 = vadd.xlane.f32.xlu1 %v825_v16  ;;  %v822_v17 = vsel %vm613_vm2, %v6828_v15, 0.0  ;;  %v611_v16 = vmul.f32 0.17677669, %v7734_v59 }
 0x412   :  { %823 = vadd.xlane.f32.xlu0 %v822_v17 }
 0x422   :  { %6596 = vrot.lane.b32.xlu1 %v7702_v38, %s7328_s25 }
 0x426   :  { %6601 = vrot.lane.b32.xlu1 %v7702_v38, %s7329_s5 }
 0x428   :  { %6591 = vrot.lane.b32.xlu0 %v7745_v6, %s7327_s8 }
 0x42a   :  { %923 = vrot.lane.b32.xlu1 %v7692_v33, %s7328_s25 }
 0x42c   :  { %921 = vrot.lane.b32.xlu0 %v7685_v29, %s7328_s25 }
 0x42e   :  { %1125 = vrot.lane.b32.xlu1 %v7692_v33, %s7329_s5 }
 0x430   :  { %1123 = vrot.lane.b32.xlu0 %v7685_v29, %s7329_s5 }
 0x49e   :  { %v827_v18 = vpop.xlane.xlu1 %826 }
 0x49f   :  { %6829 = vrcp.f32 %v827_v18  ;;  %v824_v21 = vpop.xlane.xlu0 %823  ;;  %v612_v18 = vmul.f32 0.17677669, %v7732_v58 }
 0x4a0   :  { %6831 = vrcp.f32 %v824_v21  ;;  %v614_v21 = vsel %vm613_vm2, %v611_v16, -inf }
 0x4a2   :  { %v6597_v22 = vpop.permute.xlu1 %6596 }
 0x4a3   :  { %v6592_v23 = vpop.permute.xlu0 %6591  ;;  %v6599_v25 = vunpack.i.h.bf16 %v6597_v22  ;;  %v6598_v27 = vunpack.i.l.bf16 %v6597_v22 }
 0x4a4   :  { %v6594_v28 = vunpack.i.h.bf16 %v6592_v23  ;;  %v6593_v30 = vunpack.i.l.bf16 %v6592_v23  ;;  %v617_v23 = vsel %vm613_vm2, %v612_v18, -inf }
 0x4a5   :  { %v6119_v32 = vpack.c.bf16 %v6599_v25, %v6598_v27 }
 0x4a6   :  { %v6115_v31 = vpack.c.bf16 %v6594_v28, %v6593_v30  ;;  %v6602_v33 = vpop.permute.xlu1 %6601 }
 0x4a7   :  { %v6604_v38 = vunpack.i.h.bf16 %v6602_v33  ;;  %v6603_v39 = vunpack.i.l.bf16 %v6602_v33  ;;  %v922_v40 = vpop.permute.xlu0 %921  ;;  %v7811_v33 = vadd.f32 %v7726_v53, %v7680_v24 }
 0x4a8   :  { %6116 = vmatprep.subr.bf16.mxu0 %v6115_v31 }
 0x4a9   :  { %v6830_v34 = vpop.eup %6829  ;;  %6118 = vmatpush3.bf16.msra.mxu0 %v6115_v31  ;;  %v6129_v41 = vpack.c.bf16 %v6604_v38, %v6603_v39 }
 0x4aa   :  { %v6832_v35 = vpop.eup %6831  ;;  %6121 = vmatprep.subr.msk.bf16.mxu0 %vm7698_vm1, %v6119_v32  ;;  %v831_v36 = vmul.f32 %v6830_v34, %v6826_v14  ;;  %v924_v44 = vpop.permute.xlu1 %923 }
 0x4ab   :  { %v830_v29 = vmul.f32 %v6832_v35, %v6828_v15  ;;  %v1124_v45 = vpop.permute.xlu0 %1123  ;;  %v7801_v35 = vadd.f32 %v7724_v50, %v7680_v24  ;;  %v520_v50 = vadd.f32 %v7714_v42, %v7741_v3 }
 0x4ad   :  { %5570 = vmatprep.mubr.msk.f32.mxu0 %vm613_vm2, %v830_v29  ;;  %v515_v29 = vadd.f32 %v7741_v3, %v7716_v43 }
 0x4ae   :  { %5571 = vmatmul.mubr.msk.f32.vlgmr.msra.gmra.mrb[10].mxu0 %vm613_vm2, %v831_v36  ;;  %v1126_v46 = vpop.permute.xlu1 %1125 }
 0x4af   :  { %5577 = vmatprep.mubr.msk.f32.mxu0 %vm523_vm0, %v922_v40  ;;  %v7819_v36 = vpack.c.bf16 %v520_v50, %v515_v29  ;;  %v7821_v38 = vpack.i.bf16 %v520_v50, %v515_v29 }
 0x4b2   :  { %6124 = vmatpush3.bf16.xpose.msk.msra.mxu0 %vm7698_vm1, %v6119_v32 }
 0x4b3   :  { %6131 = vmatprep.subr.msk.bf16.mxu0 %vm7698_vm1, %v6129_v41 }
 0x4b9   :  { %5578 = vmatmul.mubr.msk.f32.vlgmr.msra.gmra.mrb[12].mxu0 %vm523_vm0, %v924_v44 }
 0x4ba   :  { %6134 = vmatpush3.bf16.xpose.msk.msra.mxu0 %vm7698_vm1, %v6129_v41  ;;  %5591 = vmatprep.mubr.msk.f32.mxu0 %vm523_vm0, %v1124_v45 }
 0x4c1   :  { %5592 = vmatmul.mubr.msk.f32.vlgmr.msra.gmra.mrb[14].mxu0 %vm523_vm0, %v1126_v46 }
 0x581   :  { %v7777_v47 = vpop.f32.mrb[10].mxu0 }
 0x582   :  { %v7779_v48 = vpop.f32.mrb[11].mxu0 }
 0x583   :  { %v6645_v49 = vpack.i.bf16 %v7777_v47, %v7779_v48  ;;  %v2189_v48 = vld [vmem:[#allocation13 + $0x10] sm:$0xff] }
 0x58c   :  { %v5579_v51 = vpop.f32.mrb[12].mxu0 }
 0x58d   :  { %v1003_v52 = vpop.f32.mrb[13].mxu0  ;;  %v1013_v25 = vmul.f32 0.17677669, %v5579_v51 }
 0x58e   :  { %v1012_v22 = vmul.f32 0.17677669, %v1003_v52 }
 0x58f   :  { %v1017_v28 = vsel %vm613_vm2, %v1013_v25, -inf }
 0x590   :  { %v1014_v27 = vsel %vm613_vm2, %v1012_v22, -inf }
 0x594   :  { %v5593_v54 = vpop.f32.mrb[14].mxu0 }
 0x595   :  { %v1215_v55 = vmul.f32 0.17677669, %v5593_v54  ;;  %v1205_v60 = vpop.f32.mrb[15].mxu0 }
 0x596   :  { %v1214_v61 = vmul.f32 0.17677669, %v1205_v60 }
 0x597   :  { %v1219_v62 = vsel %vm613_vm2, %v1215_v55, -inf }
 0x598   :  { %1220 = vmax.xlane.f32.xlu1 %v1219_v62  ;;  %v1216_v63 = vsel %vm613_vm2, %v1214_v61, -inf }
 0x599   :  { %1217 = vmax.xlane.f32.xlu0 %v1216_v63 }
 0x5a9   :  { %6606 = vrot.lane.b32.xlu1 %v7745_v6, %s7329_s5 }
 0x625   :  { %v1221_v1 = vpop.xlane.xlu1 %1220 }
 0x626   :  { %v1223_v2 = vsub.f32 %v1215_v55, %v1221_v1  ;;  %v1218_v4 = vpop.xlane.xlu0 %1217 }
 0x627   :  { %v1222_v5 = vsub.f32 %v1214_v61, %v1218_v4 }
 0x628   :  { %v1226_v7 = vmul.f32 1.442695, %v1223_v2 }
 0x629   :  { %v1224_v8 = vmul.f32 1.442695, %v1222_v5  ;;  %v6607_v9 = vpop.permute.xlu1 %6606 }
 0x62a   :  { %v6609_v10 = vunpack.i.h.bf16 %v6607_v9  ;;  %v6608_v11 = vunpack.i.l.bf16 %v6607_v9 }
 0x62b   :  { %6833 = vpow2.f32 %v1224_v8 }
 0x62c   :  { %v6135_v12 = vpack.c.bf16 %v6609_v10, %v6608_v11  ;;  %6835 = vpow2.f32 %v1226_v7 }
 0x62e   :  { %6136 = vmatprep.subr.bf16.mxu0 %v6135_v12 }
 0x62f   :  { %6138 = vmatpush3.bf16.msra.mxu0 %v6135_v12 }
 0x630   :  { %6141 = vmatprep.subr.msk.bf16.mxu0 %vm7698_vm1, %v7728_v56 }
 0x635   :  { %v6834_v13 = vpop.eup %6833 }
 0x636   :  { %v1228_v14 = vsel %vm613_vm2, %v6834_v13, 0.0  ;;  %v6836_v15 = vpop.eup %6835 }
 0x637   :  { %1229 = vadd.xlane.f32.xlu0 %v1228_v14  ;;  %v1231_v17 = vsel %vm613_vm2, %v6836_v15, 0.0 }
 0x63b   :  { %1232 = vadd.xlane.f32.xlu0 %v1231_v17 }
 0x63f   :  { %615 = vmax.xlane.f32.xlu0 %v614_v21 }
 0x643   :  { %618 = vmax.xlane.f32.xlu0 %v617_v23 }
 0x647   :  { %1015 = vmax.xlane.f32.xlu0 %v1014_v27 }
 0x64b   :  { %1018 = vmax.xlane.f32.xlu0 %v1017_v28 }
 0x6c4   :  { %v1230_v59 = vpop.xlane.xlu0 %1229 }
 0x6c5   :  { %6837 = vrcp.f32 %v1230_v59 }
 0x6c8   :  { %v1233_v30 = vpop.xlane.xlu0 %1232 }
 0x6c9   :  { %6839 = vrcp.f32 %v1233_v30 }
 0x6cf   :  { %v6838_v31 = vpop.eup %6837 }
 0x6d0   :  { %v1236_v58 = vmul.f32 %v6838_v31, %v6834_v13 }
 0x6d2   :  { %5598 = vmatprep.mubr.msk.f32.mxu0 %vm613_vm2, %v1236_v58 }
 0x6d3   :  { %v6840_v32 = vpop.eup %6839 }
 0x6d4   :  { %v1237_v34 = vmul.f32 %v6840_v32, %v6836_v15 }
 0x6d6   :  { %5599 = vmatmul.mubr.msk.f32.vlgmr.msra.gmra.mrb[16].mxu0 %vm613_vm2, %v1237_v34 }
 0x6d7   :  { %6144 = vmatpush3.bf16.xpose.msk.msra.mxu0 %vm7698_vm1, %v7728_v56  ;;  %5605 = vmatprep.mubr.msk.f32.mxu0 %vm523_vm0, %v7801_v35  ;;  %v616_v56 = vpop.xlane.xlu0 %615 }
 0x6d8   :  { %v620_v40 = vsub.f32 %v611_v16, %v616_v56 }
 0x6da   :  { %v622_v44 = vmul.f32 1.442695, %v620_v40 }
 0x6db   :  { %v619_v39 = vpop.xlane.xlu0 %618 }
 0x6dc   :  { %v621_v24 = vsub.f32 %v612_v18, %v619_v39  ;;  %6841 = vpow2.f32 %v622_v44 }
 0x6de   :  { %5606 = vmatmul.mubr.msk.f32.vlgmr.msra.gmra.mrb[18].mxu0 %vm523_vm0, %v7811_v33  ;;  %v624_v46 = vmul.f32 1.442695, %v621_v24 }
 0x6df   :  { %v1016_v41 = vpop.xlane.xlu0 %1015 }
 0x6e0   :  { %v1020_v42 = vsub.f32 %v1012_v22, %v1016_v41  ;;  %6843 = vpow2.f32 %v624_v46 }
 0x6e2   :  { %v1022_v51 = vmul.f32 1.442695, %v1020_v42 }
 0x6e3   :  { %v1019_v3 = vpop.xlane.xlu0 %1018 }
 0x6e4   :  { %v1021_v52 = vsub.f32 %v1013_v25, %v1019_v3  ;;  %6845 = vpow2.f32 %v1022_v51 }
 0x6e6   :  { %v1024_v61 = vmul.f32 1.442695, %v1021_v52  ;;  %v6842_v1 = vpop.eup %6841 }
 0x6e7   :  { %v626_v4 = vsel %vm613_vm2, %v6842_v1, 0.0 }
 0x6e8   :  { %6847 = vpow2.f32 %v1024_v61 }
 0x6ea   :  { %v6844_v5 = vpop.eup %6843 }
 0x6eb   :  { %v629_v7 = vsel %vm613_vm2, %v6844_v5, 0.0 }
 0x6ee   :  { %v6846_v8 = vpop.eup %6845 }
 0x6ef   :  { %v1026_v9 = vsel %vm613_vm2, %v6846_v8, 0.0 }
 0x6f2   :  { %v6848_v10 = vpop.eup %6847 }
 0x6f3   :  { %v1029_v11 = vsel %vm613_vm2, %v6848_v10, 0.0 }
 0x7a9   :  { %v7823_v53 = vpop.f32.mrb[16].mxu0 }
 0x7aa   :  { %v7825_v45 = vpop.f32.mrb[17].mxu0 }
 0x7ab   :  { %v6655_v43 = vpack.i.bf16 %v7823_v53, %v7825_v45  ;;  %v2187_v45 = vld [vmem:[#allocation13] sm:$0xff] }
 0x7b1   :  { %v5607_v54 = vpop.f32.mrb[18].mxu0 }
 0x7b2   :  { %v1445_v55 = vmul.f32 0.17677669, %v5607_v54  ;;  %v1435_v60 = vpop.f32.mrb[19].mxu0 }
 0x7b3   :  { %v1444_v62 = vmul.f32 0.17677669, %v1435_v60 }
 0x7b4   :  { %v1449_v63 = vsel %vm613_vm2, %v1445_v55, -inf }
 0x7b5   :  { %1450 = vmax.xlane.f32.xlu0 %v1449_v63  ;;  %v1446_v2 = vsel %vm613_vm2, %v1444_v62, -inf }
 0x7b6   :  { %1447 = vmax.xlane.f32.xlu1 %v1446_v2 }
 0x7b9   :  { %627 = vadd.xlane.f32.xlu0 %v626_v4 }
 0x7bd   :  { %630 = vadd.xlane.f32.xlu0 %v629_v7 }
 0x7c1   :  { %1027 = vadd.xlane.f32.xlu0 %v1026_v9 }
 0x7c5   :  { %1030 = vadd.xlane.f32.xlu0 %v1029_v11 }
 0x7c7   :  { %6616 = vrot.lane.b32.xlu1 %v7730_v57, %s7327_s8 }
 0x7cb   :  { %1551 = vrot.lane.b32.xlu1 %v7811_v33, %s7327_s8 }
 0x842   :  { %v1451_v12 = vpop.xlane.xlu0 %1450 }
 0x843   :  { %v1453_v13 = vsub.f32 %v1445_v55, %v1451_v12  ;;  %v1448_v14 = vpop.xlane.xlu1 %1447 }
 0x844   :  { %v1452_v15 = vsub.f32 %v1444_v62, %v1448_v14 }
 0x845   :  { %v1456_v16 = vmul.f32 1.442695, %v1453_v13 }
 0x846   :  { %v1454_v17 = vmul.f32 1.442695, %v1452_v15  ;;  %v628_v18 = vpop.xlane.xlu0 %627 }
 0x847   :  { %6849 = vpow2.f32 %v1456_v16  ;;  %v6617_v44 = vpop.permute.xlu1 %6616 }
 0x848   :  { %6851 = vpow2.f32 %v1454_v17  ;;  %v6619_v42 = vunpack.i.h.bf16 %v6617_v44  ;;  %v6618_v3 = vunpack.i.l.bf16 %v6617_v44 }
 0x849   :  { %6853 = vrcp.f32 %v628_v18 }
 0x84a   :  { %v631_v21 = vpop.xlane.xlu0 %630  ;;  %v6149_v55 = vpack.c.bf16 %v6619_v42, %v6618_v3 }
 0x84b   :  { %6855 = vrcp.f32 %v631_v21  ;;  %v1552_v62 = vpop.permute.xlu1 %1551 }
 0x84e   :  { %v1028_v22 = vpop.xlane.xlu0 %1027 }
 0x84f   :  { %6857 = vrcp.f32 %v1028_v22 }
 0x851   :  { %v6850_v23 = vpop.eup %6849 }
 0x852   :  { %v6852_v25 = vpop.eup %6851  ;;  %v1461_v27 = vsel %vm613_vm2, %v6850_v23, 0.0  ;;  %v1031_v50 = vpop.xlane.xlu0 %1030 }
 0x853   :  { %v6854_v28 = vpop.eup %6853  ;;  %1462 = vadd.xlane.f32.xlu0 %v1461_v27  ;;  %v1458_v31 = vsel %vm613_vm2, %v6852_v25, 0.0  ;;  %6859 = vrcp.f32 %v1031_v50 }
 0x854   :  { %v634_v59 = vmul.f32 %v6854_v28, %v6842_v1 }
 0x855   :  { %v6856_v30 = vpop.eup %6855 }
 0x856   :  { %5556 = vmatprep.mubr.msk.f32.mxu1 %vm613_vm2, %v634_v59  ;;  %v635_v58 = vmul.f32 %v6856_v30, %v6844_v5 }
 0x857   :  { %1459 = vadd.xlane.f32.xlu0 %v1458_v31 }
 0x858   :  { %5557 = vmatmul.mubr.msk.f32.vlgmr.msra.gmra.mrb[6].mxu1 %vm613_vm2, %v635_v58 }
 0x859   :  { %v6858_v32 = vpop.eup %6857 }
 0x85a   :  { %v1034_v34 = vmul.f32 %v6858_v32, %v6846_v8 }
 0x85c   :  { %5584 = vmatprep.mubr.msk.f32.mxu1 %vm613_vm2, %v1034_v34 }
 0x85d   :  { %v6860_v46 = vpop.eup %6859 }
 0x85e   :  { %v1035_v51 = vmul.f32 %v6860_v46, %v6848_v10 }
 0x86d   :  { %6611 = vrot.lane.b32.xlu0 %v7745_v6, %s7328_s25 }
 0x871   :  { %1549 = vrot.lane.b32.xlu0 %v7801_v35, %s7327_s8 }
 0x8e0   :  { %v1463_v29 = vpop.xlane.xlu0 %1462 }
 0x8e4   :  { %v1460_v56 = vpop.xlane.xlu0 %1459 }
 0x8e5   :  { %6861 = vrcp.f32 %v1460_v56 }
 0x8e6   :  { %6863 = vrcp.f32 %v1463_v29 }
 0x8e8   :  { %v6612_v39 = vpop.permute.xlu0 %6611 }
 0x8e9   :  { %v6614_v40 = vunpack.i.h.bf16 %v6612_v39  ;;  %v6613_v41 = vunpack.i.l.bf16 %v6612_v39 }
 0x8eb   :  { %v6125_v24 = vpack.c.bf16 %v6614_v40, %v6613_v41 }
 0x8ec   :  { %v1550_v61 = vpop.permute.xlu0 %1549 }
 0x8ed   :  { %6126 = vmatprep.subr.bf16.mxu1 %v6125_v24 }
 0x8ee   :  { %6128 = vmatpush3.bf16.msra.mxu1 %v6125_v24 }
 0x8ef   :  { %v6862_v6 = vpop.eup %6861  ;;  %6146 = vmatprep.subr.bf16.mxu1 %v7819_v36 }
 0x8f0   :  { %v6864_v52 = vpop.eup %6863  ;;  %v1466_v54 = vmul.f32 %v6862_v6, %v6852_v25 }
 0x8f1   :  { %5585 = vmatmul.mubr.msk.f32.vlgmr.msra.gmra.mrb[8].mxu1 %vm613_vm2, %v1035_v51  ;;  %v1467_v60 = vmul.f32 %v6864_v52, %v6850_v23 }
 0x8f2   :  { %6148 = vmatpush3.bf16.msra.mxu1 %v7819_v36  ;;  %5612 = vmatprep.mubr.msk.f32.mxu1 %vm613_vm2, %v1466_v54 }
 0x8f3   :  { %6151 = vmatprep.subr.msk.bf16.mxu1 %vm7698_vm1, %v6149_v55 }
 0x8f5   :  { %5613 = vmatmul.mubr.msk.f32.vlgmr.msra.gmra.mrb[10].mxu1 %vm613_vm2, %v1467_v60 }
 0x8f6   :  { %5619 = vmatprep.mubr.msk.f32.mxu1 %vm523_vm0, %v1550_v61 }
 0x8fb   :  { %6154 = vmatpush3.bf16.xpose.msk.msra.mxu1 %vm7698_vm1, %v6149_v55 }
 0x902   :  { %5620 = vmatmul.mubr.msk.f32.vlgmr.msra.gmra.mrb[12].mxu1 %vm523_vm0, %v1552_v62 }
 0x92b   :  { %v7859_v63 = vpop.f32.mrb[6].mxu1 }
 0x92c   :  { %v7861_v36 = vpop.f32.mrb[7].mxu1 }
 0x9c4   :  { %v7863_v1 = vpop.f32.mrb[8].mxu1 }
 0x9c5   :  { %v7865_v2 = vpop.f32.mrb[9].mxu1 }
 0x9c6   :  { %v6650_v4 = vpack.i.bf16 %v7863_v1, %v7865_v2 }
 0x9c8   :  { %v7869_v5 = vpop.f32.mrb[10].mxu1 }
 0x9c9   :  { %v7871_v7 = vpop.f32.mrb[11].mxu1 }
 0x9d5   :  { %v5621_v8 = vpop.f32.mrb[12].mxu1 }
 0x9d6   :  { %v1641_v9 = vmul.f32 0.17677669, %v5621_v8  ;;  %v1631_v10 = vpop.f32.mrb[13].mxu1 }
 0x9d7   :  { %v1640_v11 = vmul.f32 0.17677669, %v1631_v10 }
 0x9d8   :  { %v1645_v12 = vsel %vm613_vm2, %v1641_v9, -inf }
 0x9d9   :  { %1646 = vmax.xlane.f32.xlu1 %v1645_v12  ;;  %v1642_v13 = vsel %vm613_vm2, %v1640_v11, -inf }
 0x9da   :  { %1643 = vmax.xlane.f32.xlu0 %v1642_v13 }
 0x9ea   :  { %6621 = vrot.lane.b32.xlu1 %v7821_v38, %s7327_s8 }
 0x9ee   :  { %1753 = vrot.lane.b32.xlu1 %v7801_v35, %s7328_s25 }
 0x9f2   :  { %1755 = vrot.lane.b32.xlu1 %v7811_v33, %s7328_s25 }
 0xa66   :  { %v1647_v14 = vpop.xlane.xlu1 %1646 }
 0xa67   :  { %v1649_v15 = vsub.f32 %v1641_v9, %v1647_v14  ;;  %v1644_v16 = vpop.xlane.xlu0 %1643 }
 0xa68   :  { %v1648_v17 = vsub.f32 %v1640_v11, %v1644_v16 }
 0xa69   :  { %v1652_v18 = vmul.f32 1.442695, %v1649_v15 }
 0xa6a   :  { %v1650_v21 = vmul.f32 1.442695, %v1648_v17  ;;  %v6622_v22 = vpop.permute.xlu1 %6621 }
 0xa6b   :  { %6865 = vpow2.f32 %v1652_v18  ;;  %v6624_v23 = vunpack.i.h.bf16 %v6622_v22  ;;  %v6623_v25 = vunpack.i.l.bf16 %v6622_v22 }
 0xa6c   :  { %6867 = vpow2.f32 %v1650_v21 }
 0xa6d   :  { %v6155_v27 = vpack.c.bf16 %v6624_v23, %v6623_v25 }
 0xa6e   :  { %v1754_v24 = vpop.permute.xlu1 %1753 }
 0xa6f   :  { %6156 = vmatprep.subr.bf16.mxu0 %v6155_v27 }
 0xa70   :  { %6158 = vmatpush3.bf16.msra.mxu0 %v6155_v27 }
 0xa72   :  { %v1756_v46 = vpop.permute.xlu1 %1755 }
 0xa75   :  { %v6866_v28 = vpop.eup %6865 }
 0xa76   :  { %v1657_v59 = vsel %vm613_vm2, %v6866_v28, 0.0  ;;  %v6868_v30 = vpop.eup %6867 }
 0xa77   :  { %1658 = vadd.xlane.f32.xlu0 %v1657_v59  ;;  %v1654_v31 = vsel %vm613_vm2, %v6868_v30, 0.0 }
 0xa7b   :  { %1655 = vadd.xlane.f32.xlu0 %v1654_v31 }
 0xa91   :  { %6626 = vrot.lane.b32.xlu0 %v7730_v57, %s7328_s25 }
 0xb04   :  { %v1659_v58 = vpop.xlane.xlu0 %1658 }
 0xb05   :  { %6869 = vrcp.f32 %v1659_v58 }
 0xb08   :  { %v1656_v32 = vpop.xlane.xlu0 %1655 }
 0xb09   :  { %6871 = vrcp.f32 %v1656_v32 }
 0xb0c   :  { %v6627_v34 = vpop.permute.xlu0 %6626 }
 0xb0d   :  { %v6629_v50 = vunpack.i.h.bf16 %v6627_v34  ;;  %v6628_v29 = vunpack.i.l.bf16 %v6627_v34 }
 0xb0f   :  { %v6159_v56 = vpack.c.bf16 %v6629_v50, %v6628_v29  ;;  %v6870_v39 = vpop.eup %6869 }
 0xb10   :  { %v1663_v44 = vmul.f32 %v6870_v39, %v6866_v28 }
 0xb11   :  { %6161 = vmatprep.subr.msk.bf16.mxu0 %vm7698_vm1, %v6159_v56 }
 0xb13   :  { %v6872_v40 = vpop.eup %6871 }
 0xb14   :  { %v1662_v41 = vmul.f32 %v6872_v40, %v6868_v30 }
 0xb16   :  { %5626 = vmatprep.mubr.msk.f32.mxu0 %vm613_vm2, %v1662_v41 }
 0xb17   :  { %5627 = vmatmul.mubr.msk.f32.vlgmr.msra.gmra.mrb[20].mxu0 %vm613_vm2, %v1663_v44 }
 0xb18   :  { %6164 = vmatpush3.bf16.xpose.msk.msra.mxu0 %vm7698_vm1, %v6159_v56  ;;  %5633 = vmatprep.mubr.msk.f32.mxu0 %vm523_vm0, %v1754_v24 }
 0xb1f   :  { %5634 = vmatmul.mubr.msk.f32.vlgmr.msra.gmra.mrb[22].mxu0 %vm523_vm0, %v1756_v46 }
 0xbea   :  { %v7893_v42 = vpop.f32.mrb[20].mxu0 }
 0xbeb   :  { %v7895_v3 = vpop.f32.mrb[21].mxu0 }
 0xbec   :  { %v6660_v6 = vpack.i.bf16 %v7893_v42, %v7895_v3  ;;  %v2492_v42 = vld [vmem:[#allocation16 + $0x30] sm:$0xff]  ;;  %v2493_v3 = vld [vmem:[#allocation16 + $0x38] sm:$0xff] }
 0xbf2   :  { %v5635_v51 = vpop.f32.mrb[22].mxu0 }
 0xbf3   :  { %v1845_v52 = vmul.f32 0.17677669, %v5635_v51  ;;  %v1835_v54 = vpop.f32.mrb[23].mxu0 }
 0xbf4   :  { %v1844_v55 = vmul.f32 0.17677669, %v1835_v54 }
 0xbf5   :  { %v1849_v60 = vsel %vm613_vm2, %v1845_v52, -inf }
 0xbf6   :  { %1850 = vmax.xlane.f32.xlu1 %v1849_v60  ;;  %v1846_v61 = vsel %vm613_vm2, %v1844_v55, -inf }
 0xbf7   :  { %1847 = vmax.xlane.f32.xlu0 %v1846_v61 }
 0xc07   :  { %6631 = vrot.lane.b32.xlu1 %v7821_v38, %s7328_s25 }
 0xc0b   :  { %1955 = vrot.lane.b32.xlu1 %v7801_v35, %s7329_s5 }
 0xc0f   :  { %1957 = vrot.lane.b32.xlu1 %v7811_v33, %s7329_s5 }
 0xc83   :  { %v1851_v62 = vpop.xlane.xlu1 %1850 }
 0xc84   :  { %v1853_v8 = vsub.f32 %v1845_v52, %v1851_v62  ;;  %v1848_v9 = vpop.xlane.xlu0 %1847 }
 0xc85   :  { %v1852_v10 = vsub.f32 %v1844_v55, %v1848_v9 }
 0xc86   :  { %v1856_v11 = vmul.f32 1.442695, %v1853_v8 }
 0xc87   :  { %v1854_v12 = vmul.f32 1.442695, %v1852_v10  ;;  %v6632_v13 = vpop.permute.xlu1 %6631 }
 0xc88   :  { %6873 = vpow2.f32 %v1856_v11  ;;  %v6634_v14 = vunpack.i.h.bf16 %v6632_v13  ;;  %v6633_v15 = vunpack.i.l.bf16 %v6632_v13 }
 0xc89   :  { %6875 = vpow2.f32 %v1854_v12 }
 0xc8a   :  { %v6165_v16 = vpack.c.bf16 %v6634_v14, %v6633_v15 }
 0xc8b   :  { %v1956_v32 = vpop.permute.xlu1 %1955 }
 0xc8c   :  { %6166 = vmatprep.subr.bf16.mxu1 %v6165_v16 }
 0xc8d   :  { %6168 = vmatpush3.bf16.msra.mxu1 %v6165_v16 }
 0xc92   :  { %v6874_v17 = vpop.eup %6873 }
 0xc93   :  { %v1861_v35 = vsel %vm613_vm2, %v6874_v17, 0.0  ;;  %v6876_v18 = vpop.eup %6875 }
 0xc94   :  { %1862 = vadd.xlane.f32.xlu0 %v1861_v35  ;;  %v1858_v33 = vsel %vm613_vm2, %v6876_v18, 0.0 }
 0xc98   :  { %1859 = vadd.xlane.f32.xlu0 %v1858_v33 }
 0xcae   :  { %6636 = vrot.lane.b32.xlu0 %v7730_v57, %s7329_s5  ;;  %v1958_v57 = vpop.permute.xlu1 %1957 }
 0xd21   :  { %v1863_v21 = vpop.xlane.xlu0 %1862 }
 0xd22   :  { %6877 = vrcp.f32 %v1863_v21 }
 0xd25   :  { %v1860_v22 = vpop.xlane.xlu0 %1859 }
 0xd26   :  { %6879 = vrcp.f32 %v1860_v22 }
 0xd29   :  { %v6637_v23 = vpop.permute.xlu0 %6636 }
 0xd2a   :  { %v6639_v25 = vunpack.i.h.bf16 %v6637_v23  ;;  %v6638_v27 = vunpack.i.l.bf16 %v6637_v23 }
 0xd2c   :  { %v6169_v28 = vpack.c.bf16 %v6639_v25, %v6638_v27  ;;  %v6878_v59 = vpop.eup %6877  ;;  %v2191_v25 = vld [vmem:[#allocation13 + $0x20] sm:$0xff]  ;;  %v2192_v27 = vld [vmem:[#allocation13 + $0x28] sm:$0xff] }
 0xd2d   :  { %v1867_v58 = vmul.f32 %v6878_v59, %v6874_v17  ;;  %v2193_v59 = vld [vmem:[#allocation13 + $0x30] sm:$0xff] }
 0xd2e   :  { %6171 = vmatprep.subr.msk.bf16.mxu1 %vm7698_vm1, %v6169_v28 }
 0xd30   :  { %v6880_v30 = vpop.eup %6879 }
 0xd31   :  { %v1866_v31 = vmul.f32 %v6880_v30, %v6876_v18  ;;  %v2194_v30 = vld [vmem:[#allocation13 + $0x38] sm:$0xff] }
 0xd33   :  { %5640 = vmatprep.mubr.msk.f32.mxu1 %vm613_vm2, %v1866_v31  ;;  %v6191_v31 = vpack.c.bf16 %v2194_v30, %v2193_v59 }
 0xd34   :  { %5641 = vmatmul.mubr.msk.f32.vlgmr.msra.gmra.mrb[14].mxu1 %vm613_vm2, %v1867_v58  ;;  %v2195_v58 = vld [vmem:[#allocation13 + $0x40] sm:$0xff] }
 0xd35   :  { %6174 = vmatpush3.bf16.xpose.msk.msra.mxu1 %vm7698_vm1, %v6169_v28  ;;  %5647 = vmatprep.mubr.msk.f32.mxu1 %vm523_vm0, %v1956_v32  ;;  %v6187_v28 = vpack.c.bf16 %v2192_v27, %v2191_v25  ;;  %v2196_v32 = vld [vmem:[#allocation13 + $0x48] sm:$0xff] }
 0xd3c   :  { %5648 = vmatmul.mubr.msk.f32.vlgmr.msra.gmra.mrb[16].mxu1 %vm523_vm0, %v1958_v57  ;;  %v6195_v57 = vpack.c.bf16 %v2196_v32, %v2195_v58  ;;  %v2373_v58 = vld [vmem:[#allocation14 + $0x18] sm:$0xff] }
 0xe07   :  { %v7919_v34 = vpop.f32.mrb[14].mxu1 }
 0xe08   :  { %v7921_v50 = vpop.f32.mrb[15].mxu1 }
 0xe09   :  { %v6665_v29 = vpack.i.bf16 %v7919_v34, %v7921_v50 }
 0xe0f   :  { %v5649_v56 = vpop.f32.mrb[16].mxu1 }
 0xe10   :  { %v2047_v39 = vmul.f32 0.17677669, %v5649_v56  ;;  %v2037_v40 = vpop.f32.mrb[17].mxu1  ;;  %v2197_v56 = vld [vmem:[#allocation13 + $0x50] sm:$0xff] }
 0xe11   :  { %v2046_v41 = vmul.f32 0.17677669, %v2037_v40 }
 0xe12   :  { %v2051_v44 = vsel %vm613_vm2, %v2047_v39, -inf }
 0xe13   :  { %2052 = vmax.xlane.f32.xlu1 %v2051_v44  ;;  %v2048_v24 = vsel %vm613_vm2, %v2046_v41, -inf  ;;  %v2200_v44 = vld [vmem:[#allocation13 + $0x68] sm:$0xff] }
 0xe14   :  { %2049 = vmax.xlane.f32.xlu0 %v2048_v24 }
 0xe24   :  { %6641 = vrot.lane.b32.xlu1 %v7821_v38, %s7329_s5 }
 0xe28   :  { %6651 = vrot.lane.b32.xlu1 %v6650_v4, %s7328_s25 }
 0xe2c   :  { %6656 = vrot.lane.b32.xlu1 %v6655_v43, %s7327_s8  ;;  %v2188_v43 = vld [vmem:[#allocation13 + $0x8] sm:$0xff] }
 0xe2d   :  { %v6179_v9 = vpack.c.bf16 %v2188_v43, %v2187_v45 }
 0xea0   :  { %v2053_v46 = vpop.xlane.xlu1 %2052 }
 0xea1   :  { %v2055_v51 = vsub.f32 %v2047_v39, %v2053_v46  ;;  %v2050_v52 = vpop.xlane.xlu0 %2049  ;;  %v2198_v39 = vld [vmem:[#allocation13 + $0x58] sm:$0xff]  ;;  %v2201_v46 = vld [vmem:[#allocation13 + $0x70] sm:$0xff] }
 0xea2   :  { %v2054_v54 = vsub.f32 %v2046_v41, %v2050_v52  ;;  %v6199_v40 = vpack.c.bf16 %v2198_v39, %v2197_v56  ;;  %v2199_v41 = vld [vmem:[#allocation13 + $0x60] sm:$0xff]  ;;  %v2495_v56 = vld [vmem:[#allocation16 + $0x48] sm:$0xff] }
 0xea3   :  { %v2058_v55 = vmul.f32 1.442695, %v2055_v51  ;;  %v6203_v24 = vpack.c.bf16 %v2200_v44, %v2199_v41  ;;  %v2202_v51 = vld [vmem:[#allocation13 + $0x78] sm:$0xff]  ;;  %v2375_v41 = vld [vmem:[#allocation14 + $0x28] sm:$0xff] }
 0xea4   :  { %v2056_v60 = vmul.f32 1.442695, %v2054_v54  ;;  %v6642_v61 = vpop.permute.xlu1 %6641  ;;  %v6207_v54 = vpack.c.bf16 %v2202_v51, %v2201_v46  ;;  %v2497_v46 = vld [vmem:[#allocation16 + $0x58] sm:$0xff] }
 0xea5   :  { %v6644_v62 = vunpack.i.h.bf16 %v6642_v61  ;;  %v6643_v8 = vunpack.i.l.bf16 %v6642_v61 }
 0xea6   :  { %6881 = vpow2.f32 %v2056_v60 }
 0xea7   :  { %v6175_v38 = vpack.c.bf16 %v6644_v62, %v6643_v8  ;;  %6883 = vpow2.f32 %v2058_v55 }
 0xea8   :  { %v6652_v12 = vpop.permute.xlu1 %6651 }
 0xea9   :  { %6176 = vmatprep.subr.bf16.mxu0 %v6175_v38  ;;  %v6653_v35 = vunpack.i.l.bf16 %v6652_v12  ;;  %v6654_v60 = vunpack.i.h.bf16 %v6652_v12 }
 0xeaa   :  { %6178 = vmatpush3.bf16.msra.mxu0 %v6175_v38 }
 0xeab   :  { %6180 = vmatprep.subr.bf16.mxu0 %v6179_v9 }
 0xeac   :  { %v6657_v47 = vpop.permute.xlu1 %6656 }
 0xead   :  { %v6658_v21 = vunpack.i.l.bf16 %v6657_v47  ;;  %v6659_v62 = vunpack.i.h.bf16 %v6657_v47 }
 0xeb0   :  { %v6882_v1 = vpop.eup %6881 }
 0xeb1   :  { %v2060_v2 = vsel %vm613_vm2, %v6882_v1, 0.0  ;;  %v6884_v4 = vpop.eup %6883 }
 0xeb2   :  { %2061 = vadd.xlane.f32.xlu0 %v2060_v2  ;;  %v2063_v53 = vsel %vm613_vm2, %v6884_v4, 0.0 }
 0xeb6   :  { %2064 = vadd.xlane.f32.xlu0 %v2063_v53 }
 0xecc   :  { %6646 = vrot.lane.b32.xlu0 %v6645_v49, %s7329_s5  ;;  %v2190_v49 = vld [vmem:[#allocation13 + $0x18] sm:$0xff] }
 0xecd   :  { %v6183_v23 = vpack.c.bf16 %v2190_v49, %v2189_v48  ;;  %v2491_v48 = vld [vmem:[#allocation16 + $0x28] sm:$0xff]  ;;  %v2370_v49 = vld [vmem:[#allocation14] sm:$0xff] }
 0xf3f   :  { %v2062_v10 = vpop.xlane.xlu0 %2061 }
 0xf40   :  { %6885 = vrcp.f32 %v2062_v10 }
 0xf43   :  { %v2065_v11 = vpop.xlane.xlu0 %2064 }
 0xf44   :  { %6887 = vrcp.f32 %v2065_v11  ;;  %v6978_v11 = vld [vmem:[#allocation2] sm:$0xff] }
 0xf47   :  { %v6647_v13 = vpop.permute.xlu0 %6646 }
 0xf48   :  { %v6648_v14 = vunpack.i.l.bf16 %v6647_v13  ;;  %v6649_v52 = vunpack.i.h.bf16 %v6647_v13  ;;  %v2486_v13 = vld [vmem:[#allocation16] sm:$0xff] }
 0xf4a   :  { %v6886_v15 = vpop.eup %6885  ;;  %v1349_v17 = vsel %vm523_vm0, %v7861_v36, %v6648_v14  ;;  %v1350_v55 = vsel %vm523_vm0, %v7859_v63, %v6649_v52  ;;  %v2487_v14 = vld [vmem:[#allocation16 + $0x8] sm:$0xff]  ;;  %v2376_v52 = vld [vmem:[#allocation14 + $0x30] sm:$0xff] }
 0xf4b   :  { %v2068_v16 = vmul.f32 %v6886_v15, %v6882_v1  ;;  %v1352_v33 = vsel %vm1351_vm3, %v1349_v17, %v6653_v35  ;;  %v1353_v61 = vsel %vm1351_vm3, %v1350_v55, %v6654_v60  ;;  %v2488_v15 = vld [vmem:[#allocation16 + $0x10] sm:$0xff]  ;;  %v2489_v17 = vld [vmem:[#allocation16 + $0x18] sm:$0xff]  ;;  %v2490_v35 = vld [vmem:[#allocation16 + $0x20] sm:$0xff] }
 0xf4c   :  { %v1355_v36 = vsel %vm1354_vm4, %v1352_v33, %v6658_v21  ;;  %v1356_v8 = vsel %vm1354_vm4, %v1353_v61, %v6659_v62  ;;  %v6247_v47 = vpack.c.bf16 %v2489_v17, %v2488_v15  ;;  %v6251_v21 = vpack.c.bf16 %v2491_v48, %v2490_v35  ;;  %v2498_v60 = vld [vmem:[#allocation16 + $0x60] sm:$0xff]  ;;  %v2499_v61 = vld [vmem:[#allocation16 + $0x68] sm:$0xff] }
 0xf4d   :  { %5654 = vmatprep.mubr.msk.f32.mxu0 %vm613_vm2, %v2068_v16  ;;  %v6243_v16 = vpack.c.bf16 %v2487_v14, %v2486_v13  ;;  %v6267_v62 = vpack.c.bf16 %v2499_v61, %v2498_v60  ;;  %v2385_v14 = vld [vmem:[#allocation14 + $0x78] sm:$0xff]  ;;  %v8008_v61 = vld [vmem:[%s8533_s19] ss:$0 sm:$0xff] }
 0xf4e   :  { %v6888_v18 = vpop.eup %6887 }
 0xf4f   :  { %v2069_v22 = vmul.f32 %v6888_v18, %v6884_v4  ;;  %v7956_v4 = vld [vmem:[%s8523_s9] ss:$0 sm:$0xff]  ;;  %v2371_v18 = vld [vmem:[#allocation14 + $0x8] sm:$0xff] }
 0xf50   :  { %v6211_v33 = vpack.c.bf16 %v2371_v18, %v2370_v49 }
 0xf51   :  { %5655 = vmatmul.mubr.msk.f32.vlgmr.msra.gmra.mrb[24].mxu0 %vm613_vm2, %v2069_v22 }
 0xf52   :  { %6182 = vmatpush3.bf16.msra.mxu0 %v6179_v9  ;;  %5689 = vmatprep.mubr.f32.mxu0 %v1355_v36  ;;  %v6977_v9 = vld [vmem:[#allocation2 + $0x8] sm:$0xff] }
 0xf53   :  { %6184 = vmatprep.subr.bf16.mxu0 %v6183_v23  ;;  %6212 = vmatprep.subr.bf16.mxu1 %v6211_v33 }
 0xf54   :  { %6214 = vmatpush3.bf16.msra.mxu1 %v6211_v33 }
 0xf56   :  { %6186 = vmatpush3.bf16.msra.mxu0 %v6183_v23 }
 0xf57   :  { %6188 = vmatprep.subr.bf16.mxu0 %v6187_v28 }
 0xf5a   :  { %6190 = vmatpush3.bf16.msra.mxu0 %v6187_v28 }
 0xf5b   :  { %6192 = vmatprep.subr.bf16.mxu0 %v6191_v31 }
 0xf5e   :  { %6194 = vmatpush3.bf16.msra.mxu0 %v6191_v31  ;;  %v2372_v31 = vld [vmem:[#allocation14 + $0x10] sm:$0xff] }
 0xf5f   :  { %6196 = vmatprep.subr.bf16.mxu0 %v6195_v57  ;;  %v6215_v32 = vpack.c.bf16 %v2373_v58, %v2372_v31  ;;  %v7986_v58 = vld [vmem:[#allocation5 + $0x8] sm:$0xff] }
 0xf61   :  { %6216 = vmatprep.subr.bf16.mxu1 %v6215_v32 }
 0xf62   :  { %6198 = vmatpush3.bf16.msra.mxu0 %v6195_v57  ;;  %v2494_v57 = vld [vmem:[#allocation16 + $0x40] sm:$0xff]  ;;  %6218 = vmatpush3.bf16.msra.mxu1 %v6215_v32  ;;  %v271_v32 = vld [vmem:[#allocation8 + $0x8] sm:$0xff] }
 0xf63   :  { %6200 = vmatprep.subr.bf16.mxu0 %v6199_v40  ;;  %v6259_v39 = vpack.c.bf16 %v2495_v56, %v2494_v57 }
 0xf66   :  { %6202 = vmatpush3.bf16.msra.mxu0 %v6199_v40  ;;  %v2374_v40 = vld [vmem:[#allocation14 + $0x20] sm:$0xff] }
 0xf67   :  { %6204 = vmatprep.subr.bf16.mxu0 %v6203_v24  ;;  %v6219_v44 = vpack.c.bf16 %v2375_v41, %v2374_v40  ;;  %v272_v40 = vld [vmem:[#allocation8 + $0x10] sm:$0xff] }
 0xf69   :  { %6220 = vmatprep.subr.bf16.mxu1 %v6219_v44 }
 0xf6a   :  { %6206 = vmatpush3.bf16.msra.mxu0 %v6203_v24  ;;  %v2496_v24 = vld [vmem:[#allocation16 + $0x50] sm:$0xff]  ;;  %6222 = vmatpush3.bf16.msra.mxu1 %v6219_v44  ;;  %v7994_v44 = vld [vmem:[#allocation5 + $0x18] sm:$0xff] }
 0xf6b   :  { %6208 = vmatprep.subr.bf16.mxu0 %v6207_v54  ;;  %v6263_v51 = vpack.c.bf16 %v2497_v46, %v2496_v24  ;;  %v273_v24 = vld [vmem:[#allocation8 + $0x18] sm:$0xff]  ;;  %v7999_v46 = vld [vmem:[%s8532_s18] ss:$0 sm:$0xff] }
 0xf6e   :  { %6210 = vmatpush3.bf16.msra.mxu0 %v6207_v54  ;;  %v2377_v54 = vld [vmem:[#allocation14 + $0x38] sm:$0xff] }
 0xf6f   :  { %6244 = vmatprep.subr.bf16.mxu0 %v6243_v16  ;;  %v6223_v55 = vpack.c.bf16 %v2377_v54, %v2376_v52  ;;  %v2481_v52 = vadd.f32 %v273_v24, %v7994_v44 }
 0xf71   :  { %5690 = vmatmul.mubr.f32.vlgmr.msra.gmra.mrb[26].mxu0 %v1356_v8  ;;  %6224 = vmatprep.subr.bf16.mxu1 %v6223_v55  ;;  %v2378_v8 = vld [vmem:[#allocation14 + $0x40] sm:$0xff] }
 0xf72   :  { %6246 = vmatpush3.bf16.msra.mxu0 %v6243_v16  ;;  %6226 = vmatpush3.bf16.msra.mxu1 %v6223_v55 }
 0xf73   :  { %6248 = vmatprep.subr.bf16.mxu0 %v6247_v47 }
 0xf76   :  { %6250 = vmatpush3.bf16.msra.mxu0 %v6247_v47 }
 0xf77   :  { %6252 = vmatprep.subr.bf16.mxu0 %v6251_v21 }
 0xf7a   :  { %6254 = vmatpush3.bf16.msra.mxu0 %v6251_v21  ;;  %v7977_v21 = vld [vmem:[#allocation5] sm:$0xff] }
0x1024   :  { %v5656_v38 = vpop.f32.mrb[24].mxu0 }
0x1025   :  { %v2148_v1 = vpop.f32.mrb[25].mxu0 }
0x1026   :  { %v6670_v2 = vpack.i.bf16 %v5656_v38, %v2148_v1  ;;  %v2379_v38 = vld [vmem:[#allocation14 + $0x48] sm:$0xff] }
0x1027   :  { %v6227_v1 = vpack.c.bf16 %v2379_v38, %v2378_v8  ;;  %v6979_v38 = vld [vmem:[#allocation7] sm:$0xff] }
0x1029   :  { %6228 = vmatprep.subr.bf16.mxu1 %v6227_v1 }
0x102a   :  { %6230 = vmatpush3.bf16.msra.mxu1 %v6227_v1 }
0x1044   :  { %v5691_v53 = vpop.f32.mrb[26].mxu0 }
0x1045   :  { %v2282_v63 = vadd.f32 %v5691_v53, %v7956_v4  ;;  %v2276_v45 = vpop.f32.mrb[27].mxu0  ;;  %v2501_v53 = vld [vmem:[#allocation16 + $0x78] sm:$0xff] }
0x1046   :  { %v2277_v43 = vadd.f32 %v7956_v4, %v2276_v45  ;;  %v2380_v45 = vld [vmem:[#allocation14 + $0x50] sm:$0xff] }
0x1047   :  { %v2296_v10 = vadd.f32 %v6977_v9, %v2282_v63 }
0x1048   :  { %v2295_v12 = vadd.f32 %v6978_v11, %v2277_v43  ;;  %v2381_v43 = vld [vmem:[#allocation14 + $0x58] sm:$0xff]  ;;  %v2383_v11 = vld [vmem:[#allocation14 + $0x68] sm:$0xff] }
0x1049   :  { %2301 = vadd.xlane.f32.xlu1 %v2296_v10  ;;  %v6231_v9 = vpack.c.bf16 %v2381_v43, %v2380_v45  ;;  %v8022_v43 = vld [vmem:[#allocation5 + $0x28] sm:$0xff] }
0x104a   :  { %2299 = vadd.xlane.f32.xlu0 %v2295_v12 }
0x104b   :  { %6232 = vmatprep.subr.bf16.mxu1 %v6231_v9 }
0x104c   :  { %6234 = vmatpush3.bf16.msra.mxu1 %v6231_v9  ;;  %v275_v9 = vld [vmem:[#allocation8 + $0x28] sm:$0xff] }
0x105a   :  { %6661 = vrot.lane.b32.xlu1 %v6660_v6, %s7329_s5  ;;  %v6255_v6 = vpack.c.bf16 %v2493_v3, %v2492_v42  ;;  %v270_v42 = vld [vmem:[#allocation8] sm:$0xff] }
0x105b   :  { %v2478_v31 = vadd.f32 %v270_v42, %v7977_v21 }
0x105c   :  { %6256 = vmatprep.subr.bf16.mxu0 %v6255_v6 }
0x105d   :  { %6258 = vmatpush3.bf16.msra.mxu0 %v6255_v6 }
0x105e   :  { %6671 = vrot.lane.b32.xlu1 %v6670_v2, %s7327_s8  ;;  %6260 = vmatprep.subr.bf16.mxu0 %v6259_v39  ;;  %v2500_v2 = vld [vmem:[#allocation16 + $0x70] sm:$0xff] }
0x105f   :  { %v6271_v63 = vpack.c.bf16 %v2501_v53, %v2500_v2  ;;  %v6980_v2 = vld [vmem:[#allocation7 + $0x8] sm:$0xff]  ;;  %v8019_v53 = vld [vmem:[#allocation5 + $0x20] sm:$0xff] }
0x1061   :  { %6262 = vmatpush3.bf16.msra.mxu0 %v6259_v39  ;;  %v7990_v39 = vld [vmem:[#allocation5 + $0x10] sm:$0xff] }
0x1062   :  { %6264 = vmatprep.subr.bf16.mxu0 %v6263_v51  ;;  %v2480_v41 = vadd.f32 %v272_v40, %v7990_v39 }
0x1065   :  { %6266 = vmatpush3.bf16.msra.mxu0 %v6263_v51 }
0x1066   :  { %6268 = vmatprep.subr.bf16.mxu0 %v6267_v62 }
0x1069   :  { %6270 = vmatpush3.bf16.msra.mxu0 %v6267_v62 }
0x106a   :  { %6272 = vmatprep.subr.bf16.mxu0 %v6271_v63 }
0x106d   :  { %6274 = vmatpush3.bf16.msra.mxu0 %v6271_v63  ;;  %v274_v63 = vld [vmem:[#allocation8 + $0x20] sm:$0xff] }
0x106e   :  { %v2482_v45 = vadd.f32 %v274_v63, %v8019_v53 }
0x10d6   :  { %v2302_v22 = vpop.xlane.xlu1 %2301 }
0x10d7   :  { %v2309_v23 = vmul.f32 0.0078125, %v2302_v22  ;;  %v2300_v25 = vpop.xlane.xlu0 %2299 }
0x10d8   :  { %v2308_v27 = vmul.f32 0.0078125, %v2300_v25 }
0x10d9   :  { %v7965_v36 = vsub.f32 %v2296_v10, %v2309_v23  ;;  %v2382_v10 = vld [vmem:[#allocation14 + $0x60] sm:$0xff] }
0x10da   :  { %v7969_v59 = vsub.f32 %v2295_v12, %v2308_v27  ;;  %v2384_v12 = vld [vmem:[#allocation14 + $0x70] sm:$0xff]  ;;  %v6235_v13 = vpack.c.bf16 %v2383_v11, %v2382_v10  ;;  %v6662_v50 = vpop.permute.xlu1 %6661  ;;  %v2483_v10 = vadd.f32 %v275_v9, %v8022_v43 }
0x10db   :  { %v2317_v28 = vmul.f32 %v7965_v36, %v7965_v36  ;;  %v6239_v15 = vpack.c.bf16 %v2385_v14, %v2384_v12  ;;  %v6664_v47 = vunpack.i.h.bf16 %v6662_v50  ;;  %v6663_v48 = vunpack.i.l.bf16 %v6662_v50  ;;  %v8025_v11 = vld [vmem:[#allocation5 + $0x30] sm:$0xff]  ;;  %v8028_v14 = vld [vmem:[#allocation5 + $0x38] sm:$0xff] }
0x10dc   :  { %v2316_v30 = vmul.f32 %v7969_v59, %v7969_v59  ;;  %6236 = vmatprep.subr.bf16.mxu1 %v6235_v13  ;;  %v276_v12 = vld [vmem:[#allocation8 + $0x30] sm:$0xff] }
0x10dd   :  { %2322 = vadd.xlane.f32.xlu0 %v2317_v28  ;;  %6238 = vmatpush3.bf16.msra.mxu1 %v6235_v13  ;;  %v2181_v25 = vsel %vm523_vm0, %v7871_v7, %v6663_v48  ;;  %v2182_v27 = vsel %vm523_vm0, %v7869_v5, %v6664_v47  ;;  %v2479_v5 = vadd.f32 %v271_v32, %v7986_v58  ;;  %v6981_v47 = vld [vmem:[#allocation2 + $0x18] sm:$0xff]  ;;  %v8053_v32 = vld [vmem:[%s8525_s11] ss:$0 sm:$0xff] }
0x10de   :  { %6240 = vmatprep.subr.bf16.mxu1 %v6239_v15  ;;  %v6672_v49 = vpop.permute.xlu1 %6671  ;;  %v2484_v13 = vadd.f32 %v276_v12, %v8025_v11 }
0x10df   :  { %v6674_v22 = vunpack.i.h.bf16 %v6672_v49  ;;  %v6673_v23 = vunpack.i.l.bf16 %v6672_v49 }
0x10e1   :  { %2320 = vadd.xlane.f32.xlu0 %v2316_v30  ;;  %6242 = vmatpush3.bf16.msra.mxu1 %v6239_v15  ;;  %v277_v15 = vld [vmem:[#allocation8 + $0x38] sm:$0xff] }
0x10f7   :  { %6666 = vrot.lane.b32.xlu0 %v6665_v29, %s7328_s25 }
0x116a   :  { %v2323_v34 = vpop.xlane.xlu0 %2322 }
0x116b   :  { %v2329_v29 = vmul.f32 0.0078125, %v2323_v34  ;;  %v2485_v34 = vadd.f32 %v277_v15, %v8028_v14 }
0x116d   :  { %v2333_v16 = vadd.f32 1e-05, %v2329_v29 }
0x116e   :  { %v2321_v17 = vpop.xlane.xlu0 %2320 }
0x116f   :  { %6889 = vrsqrt.f32 %v2333_v16  ;;  %v2328_v35 = vmul.f32 0.0078125, %v2321_v17 }
0x1171   :  { %v2332_v18 = vadd.f32 1e-05, %v2328_v35  ;;  %v8036_v35 = vld [vmem:[%s8527_s13] ss:$0 sm:$0xff] }
0x1172   :  { %v6667_v33 = vpop.permute.xlu0 %6666 }
0x1173   :  { %6891 = vrsqrt.f32 %v2332_v18  ;;  %v6669_v3 = vunpack.i.h.bf16 %v6667_v33  ;;  %v6668_v6 = vunpack.i.l.bf16 %v6667_v33  ;;  %v6982_v18 = vld [vmem:[#allocation2 + $0x10] sm:$0xff] }
0x1175   :  { %v2183_v28 = vsel %vm1351_vm3, %v2181_v25, %v6668_v6  ;;  %v2184_v30 = vsel %vm1351_vm3, %v2182_v27, %v6669_v3 }
0x1176   :  { %v2185_v57 = vsel %vm1354_vm4, %v2183_v28, %v6673_v23  ;;  %v2186_v56 = vsel %vm1354_vm4, %v2184_v30, %v6674_v22 }
0x1177   :  { %5692 = vmatprep.mubr.f32.mxu0 %v2185_v57 }
0x1178   :  { %5693 = vmatmul.mubr.f32.gmra.mrb[28].mxu0 %v2186_v56 }
0x1179   :  { %v6890_v7 = vpop.eup %6889  ;;  %5765 = vmatprep.mubr.f32.mxu0 %v2478_v31 }
0x117a   :  { %v2341_v51 = vmul.f32 %v6890_v7, %v7965_v36 }
0x117c   :  { %5766 = vmatmul.mubr.f32.vlgmr.msra.gmra.mrb[30].mxu0 %v2479_v5  ;;  %v2352_v55 = vmul.f32 %v7999_v46, %v2341_v51 }
0x117d   :  { %v6892_v54 = vpop.eup %6891  ;;  %5768 = vmatprep.mubr.f32.mxu0 %v2480_v41 }
0x117e   :  { %v2340_v60 = vmul.f32 %v6892_v54, %v7969_v59  ;;  %v8012_v8 = vadd.f32 %v8008_v61, %v2352_v55 }
0x1180   :  { %5769 = vmatmul.mubr.f32.gmra.mrb[32].mxu0 %v2481_v52  ;;  %v2351_v62 = vmul.f32 %v7999_v46, %v2340_v60  ;;  %v2367_v59 = vadd.f32 %v6980_v2, %v8012_v8 }
0x1181   :  { %5771 = vmatprep.mubr.f32.mxu0 %v2482_v45 }
0x1182   :  { %v8015_v36 = vadd.f32 %v8008_v61, %v2351_v62 }
0x1184   :  { %v2366_v1 = vadd.f32 %v6979_v38, %v8015_v36  ;;  %5772 = vmatmul.mubr.f32.gmra.mrb[34].mxu0 %v2483_v10 }
0x1185   :  { %5774 = vmatprep.mubr.f32.mxu0 %v2484_v13 }
0x1186   :  { %5727 = vmatprep.mubr.f32.mxu1 %v2366_v1 }
0x1187   :  { %5728 = vmatmul.mubr.f32.vlgmr.msra.gmra.mrb[18].mxu1 %v2367_v59 }
0x1188   :  { %5775 = vmatmul.mubr.f32.gmra.mrb[36].mxu0 %v2485_v34 }
0x124b   :  { %v5694_v50 = vpop.f32.mrb[28].mxu0 }
0x124c   :  { %v2292_v29 = vadd.f32 %v5694_v50, %v7956_v4  ;;  %v2286_v16 = vpop.f32.mrb[29].mxu0  ;;  %v2614_v50 = vld [vmem:[#allocation17] sm:$0xff] }
0x124d   :  { %v2287_v17 = vadd.f32 %v7956_v4, %v2286_v16 }
0x124e   :  { %v2298_v48 = vadd.f32 %v6981_v47, %v2292_v29  ;;  %v2615_v29 = vld [vmem:[#allocation17 + $0x8] sm:$0xff]  ;;  %v2616_v47 = vld [vmem:[#allocation17 + $0x10] sm:$0xff] }
0x124f   :  { %v5767_v49 = vpop.f32.mrb[30].mxu0  ;;  %v2297_v33 = vadd.f32 %v6982_v18, %v2287_v17  ;;  %v6275_v16 = vpack.c.bf16 %v2615_v29, %v2614_v50 }
0x1250   :  { %v2581_v42 = vadd.f32 %v5767_v49, %v8036_v35  ;;  %2305 = vadd.xlane.f32.xlu0 %v2298_v48  ;;  %v2575_v3 = vpop.f32.mrb[31].mxu0  ;;  %v2618_v49 = vld [vmem:[#allocation17 + $0x20] sm:$0xff] }
0x1251   :  { %v2576_v6 = vadd.f32 %v8036_v35, %v2575_v3  ;;  %2303 = vadd.xlane.f32.xlu1 %v2297_v33  ;;  %6276 = vmatprep.subr.bf16.mxu1 %v6275_v16  ;;  %v2620_v3 = vld [vmem:[#allocation17 + $0x30] sm:$0xff] }
0x1252   :  { %6278 = vmatpush3.bf16.msra.mxu1 %v6275_v16 }
0x1253   :  { %v6307_v22 = vpack.c.bf16 %v2581_v42, %v2576_v6  ;;  %v5770_v23 = vpop.f32.mrb[32].mxu0  ;;  %v8040_v4 = vpack.i.bf16 %v2581_v42, %v2576_v6  ;;  %v2621_v6 = vld [vmem:[#allocation17 + $0x38] sm:$0xff] }
0x1254   :  { %v2591_v25 = vadd.f32 %v5770_v23, %v8036_v35  ;;  %v2585_v27 = vpop.f32.mrb[33].mxu0  ;;  %v2622_v23 = vld [vmem:[#allocation17 + $0x40] sm:$0xff] }
0x1255   :  { %6309 = vmatprep.subr.msk.bf16.mxu0 %vm7698_vm1, %v6307_v22  ;;  %v2586_v28 = vadd.f32 %v8036_v35, %v2585_v27 }
0x1256   :  { %6312 = vmatpush3.bf16.xpose.msk.msra.mxu0 %vm7698_vm1, %v6307_v22  ;;  %v6287_v22 = vpack.c.bf16 %v2621_v6, %v2620_v3 }
0x1257   :  { %v6313_v30 = vpack.c.bf16 %v2591_v25, %v2586_v28  ;;  %v8048_v31 = vpack.i.bf16 %v2591_v25, %v2586_v28  ;;  %v8077_v7 = vpop.f32.mrb[34].mxu0  ;;  %v2623_v25 = vld [vmem:[#allocation17 + $0x48] sm:$0xff]  ;;  %v2624_v28 = vld [vmem:[#allocation17 + $0x50] sm:$0xff] }
0x1258   :  { %v8079_v41 = vpop.f32.mrb[35].mxu0  ;;  %v6291_v27 = vpack.c.bf16 %v2623_v25, %v2622_v23  ;;  %v6983_v23 = vld [vmem:[#allocation7 + $0x10] sm:$0xff] }
0x1259   :  { %6315 = vmatprep.subr.msk.bf16.mxu0 %vm7698_vm1, %v6313_v30 }
0x125a   :  { %v5729_v57 = vpop.f32.mrb[18].mxu1 }
0x125b   :  { %v2459_v56 = vpop.f32.mrb[19].mxu1  ;;  %v8067_v5 = vadd.f32 %v5729_v57, %v8053_v32  ;;  %v8081_v24 = vpop.f32.mrb[36].mxu0 }
0x125c   :  { %v8058_v40 = vadd.f32 %v8053_v32, %v2459_v56  ;;  %v8083_v51 = vpop.f32.mrb[37].mxu0  ;;  %v2626_v56 = vld [vmem:[#allocation17 + $0x60] sm:$0xff] }
0x125e   :  { %6318 = vmatpush3.bf16.xpose.msk.msra.mxu0 %vm7698_vm1, %v6313_v30  ;;  %5829 = vmatprep.mubr.msk.f32.mxu0 %vm523_vm0, %v8058_v40  ;;  %v2625_v30 = vld [vmem:[#allocation17 + $0x58] sm:$0xff] }
0x125f   :  { %v6295_v57 = vpack.c.bf16 %v2625_v30, %v2624_v28 }
0x1262   :  { %6681 = vrot.lane.b32.xlu1 %v8048_v31, %s7327_s8 }
0x1265   :  { %5830 = vmatmul.mubr.msk.f32.vlgmr.msra.gmra.mrb[38].mxu0 %vm523_vm0, %v8067_v5 }
0x1266   :  { %6676 = vrot.lane.b32.xlu0 %v8040_v4, %s7327_s8  ;;  %2940 = vrot.lane.b32.xlu1 %v8058_v40, %s7327_s8 }
0x126a   :  { %2942 = vrot.lane.b32.xlu0 %v8067_v5, %s7327_s8 }
0x12dd   :  { %v2306_v52 = vpop.xlane.xlu0 %2305 }
0x12de   :  { %v2311_v54 = vmul.f32 0.0078125, %v2306_v52  ;;  %v2304_v55 = vpop.xlane.xlu1 %2303  ;;  %v2627_v52 = vld [vmem:[#allocation17 + $0x68] sm:$0xff] }
0x12df   :  { %v2310_v60 = vmul.f32 0.0078125, %v2304_v55  ;;  %v6299_v55 = vpack.c.bf16 %v2627_v52, %v2626_v56 }
0x12e0   :  { %v8085_v62 = vsub.f32 %v2298_v48, %v2311_v54  ;;  %v2617_v48 = vld [vmem:[#allocation17 + $0x18] sm:$0xff]  ;;  %v2628_v54 = vld [vmem:[#allocation17 + $0x70] sm:$0xff] }
0x12e1   :  { %v8087_v38 = vsub.f32 %v2297_v33, %v2310_v60  ;;  %v6677_v1 = vpop.permute.xlu0 %6676  ;;  %v6279_v18 = vpack.c.bf16 %v2617_v48, %v2616_v47  ;;  %v2619_v33 = vld [vmem:[#allocation17 + $0x28] sm:$0xff]  ;;  %v2629_v60 = vld [vmem:[#allocation17 + $0x78] sm:$0xff] }
0x12e2   :  { %v6679_v2 = vunpack.i.h.bf16 %v6677_v1  ;;  %v6678_v59 = vunpack.i.l.bf16 %v6677_v1  ;;  %v6682_v63 = vpop.permute.xlu1 %6681  ;;  %v2319_v45 = vmul.f32 %v8085_v62, %v8085_v62  ;;  %v6283_v42 = vpack.c.bf16 %v2619_v33, %v2618_v49 }
0x12e3   :  { %v6684_v9 = vunpack.i.h.bf16 %v6682_v63  ;;  %v6683_v10 = vunpack.i.l.bf16 %v6682_v63  ;;  %v2318_v12 = vmul.f32 %v8087_v38, %v8087_v38  ;;  %6280 = vmatprep.subr.bf16.mxu1 %v6279_v18  ;;  %v6303_v1 = vpack.c.bf16 %v2629_v60, %v2628_v54 }
0x12e4   :  { %v6327_v13 = vpack.c.bf16 %v6679_v2, %v6678_v59  ;;  %2326 = vadd.xlane.f32.xlu0 %v2319_v45  ;;  %6282 = vmatpush3.bf16.msra.mxu1 %v6279_v18  ;;  %v2601_v2 = vadd.f32 %v8077_v7, %v8036_v35  ;;  %v2596_v59 = vadd.f32 %v8036_v35, %v8079_v41 }
0x12e5   :  { %v6333_v15 = vpack.c.bf16 %v6684_v9, %v6683_v10  ;;  %2324 = vadd.xlane.f32.xlu1 %v2318_v12  ;;  %v2943_v17 = vpop.permute.xlu0 %2942  ;;  %6284 = vmatprep.subr.bf16.mxu1 %v6283_v42  ;;  %v2611_v63 = vadd.f32 %v8081_v24, %v8036_v35  ;;  %v2606_v45 = vadd.f32 %v8036_v35, %v8083_v51 }
0x12e6   :  { %6329 = vmatprep.subr.msk.bf16.mxu0 %vm7698_vm1, %v6327_v13  ;;  %v2941_v34 = vpop.permute.xlu1 %2940  ;;  %v8111_v9 = vpack.c.bf16 %v2601_v2, %v2596_v59  ;;  %v8113_v10 = vpack.i.bf16 %v2601_v2, %v2596_v59 }
0x12e7   :  { %6332 = vmatpush3.bf16.xpose.msk.msra.mxu0 %vm7698_vm1, %v6327_v13  ;;  %5851 = vmatprep.mubr.msk.f32.mxu0 %vm523_vm0, %v2941_v34  ;;  %v8115_v34 = vpack.c.bf16 %v2611_v63, %v2606_v45  ;;  %v8117_v50 = vpack.i.bf16 %v2611_v63, %v2606_v45 }
0x12e8   :  { %6335 = vmatprep.subr.msk.bf16.mxu0 %vm7698_vm1, %v6333_v15  ;;  %6286 = vmatpush3.bf16.msra.mxu1 %v6283_v42 }
0x12e9   :  { %6288 = vmatprep.subr.bf16.mxu1 %v6287_v22 }
0x12ec   :  { %6290 = vmatpush3.bf16.msra.mxu1 %v6287_v22 }
0x12ed   :  { %6292 = vmatprep.subr.bf16.mxu1 %v6291_v27 }
0x12ef   :  { %6338 = vmatpush3.bf16.xpose.msk.msra.mxu0 %vm7698_vm1, %v6333_v15 }
0x12f0   :  { %6294 = vmatpush3.bf16.msra.mxu1 %v6291_v27  ;;  %v6984_v27 = vld [vmem:[#allocation7 + $0x18] sm:$0xff] }
0x12f1   :  { %6296 = vmatprep.subr.bf16.mxu1 %v6295_v57 }
0x12f4   :  { %6298 = vmatpush3.bf16.msra.mxu1 %v6295_v57 }
0x12f5   :  { %6300 = vmatprep.subr.bf16.mxu1 %v6299_v55 }
0x12f6   :  { %5852 = vmatmul.mubr.msk.f32.vlgmr.msra.gmra.mrb[40].mxu0 %vm523_vm0, %v2943_v17 }
0x12f8   :  { %6302 = vmatpush3.bf16.msra.mxu1 %v6299_v55 }
0x12f9   :  { %6304 = vmatprep.subr.bf16.mxu1 %v6303_v1 }
0x12fc   :  { %6306 = vmatpush3.bf16.msra.mxu1 %v6303_v1 }
0x1338   :  { %v5831_v12 = vpop.f32.mrb[38].mxu0 }
0x1339   :  { %v2836_v13 = vmul.f32 0.17677669, %v5831_v12  ;;  %v2826_v15 = vpop.f32.mrb[39].mxu0  ;;  %v5100_v12 = vld [vmem:[%s8529_s15] ss:$0 sm:$0xff] }
0x133a   :  { %v2835_v7 = vmul.f32 0.17677669, %v2826_v15 }
0x133b   :  { %v2840_v41 = vsel %vm523_vm0, %v2836_v13, -inf }
0x133c   :  { %2841 = vmax.xlane.f32.xlu1 %v2840_v41  ;;  %v2837_v24 = vsel %vm523_vm0, %v2835_v7, -inf }
0x133d   :  { %2838 = vmax.xlane.f32.xlu0 %v2837_v24 }
0x1371   :  { %v2327_v29 = vpop.xlane.xlu0 %2326 }
0x1372   :  { %v2331_v35 = vmul.f32 0.0078125, %v2327_v29  ;;  %v2325_v51 = vpop.xlane.xlu1 %2324 }
0x1373   :  { %v2330_v16 = vmul.f32 0.0078125, %v2325_v51 }
0x1374   :  { %v2335_v17 = vadd.f32 1e-05, %v2331_v35 }
0x1375   :  { %v2334_v47 = vadd.f32 1e-05, %v2330_v16 }
0x1376   :  { %6893 = vrsqrt.f32 %v2335_v17 }
0x1377   :  { %6895 = vrsqrt.f32 %v2334_v47 }
0x1380   :  { %v6894_v48 = vpop.eup %6893 }
0x1381   :  { %v6896_v49 = vpop.eup %6895  ;;  %v2343_v18 = vmul.f32 %v6894_v48, %v8085_v62 }
0x1382   :  { %v2342_v33 = vmul.f32 %v6896_v49, %v8087_v38 }
0x1383   :  { %v2354_v42 = vmul.f32 %v7999_v46, %v2343_v18 }
0x1384   :  { %v2353_v3 = vmul.f32 %v7999_v46, %v2342_v33 }
0x1385   :  { %v8126_v6 = vadd.f32 %v8008_v61, %v2354_v42 }
0x1386   :  { %v8129_v22 = vadd.f32 %v8008_v61, %v2353_v3 }
0x1387   :  { %v2369_v28 = vadd.f32 %v6984_v27, %v8126_v6 }
0x1388   :  { %v2368_v25 = vadd.f32 %v6983_v23, %v8129_v22 }
0x138a   :  { %5730 = vmatprep.mubr.f32.mxu1 %v2368_v25 }
0x138b   :  { %5731 = vmatmul.mubr.f32.gmra.mrb[20].mxu1 %v2369_v28 }
0x138c   :  { %5809 = vmatprep.mubr.f32.mxu1 %v7977_v21 }
0x138f   :  { %5810 = vmatmul.mubr.f32.vlgmr.msra.gmra.mrb[22].mxu1 %v7986_v58 }
0x1390   :  { %5812 = vmatprep.mubr.f32.mxu1 %v7990_v39 }
0x1393   :  { %5813 = vmatmul.mubr.f32.gmra.mrb[24].mxu1 %v7994_v44 }
0x1394   :  { %5815 = vmatprep.mubr.f32.mxu1 %v8019_v53 }
0x1397   :  { %5816 = vmatmul.mubr.f32.gmra.mrb[26].mxu1 %v8022_v43 }
0x1398   :  { %5818 = vmatprep.mubr.f32.mxu1 %v8025_v11 }
0x139b   :  { %5819 = vmatmul.mubr.f32.gmra.mrb[28].mxu1 %v8028_v14 }
0x13c9   :  { %v2842_v46 = vpop.xlane.xlu1 %2841  ;;  %v5853_v61 = vpop.f32.mrb[40].mxu0 }
0x13ca   :  { %v2844_v62 = vsub.f32 %v2836_v13, %v2842_v46  ;;  %v3040_v38 = vmul.f32 0.17677669, %v5853_v61  ;;  %v2839_v30 = vpop.xlane.xlu0 %2838  ;;  %v3030_v21 = vpop.f32.mrb[41].mxu0 }
0x13cb   :  { %v2843_v57 = vsub.f32 %v2835_v7, %v2839_v30  ;;  %v3039_v58 = vmul.f32 0.17677669, %v3030_v21 }
0x13cc   :  { %v2847_v56 = vmul.f32 1.442695, %v2844_v62  ;;  %v3044_v39 = vsel %vm523_vm0, %v3040_v38, -inf }
0x13cd   :  { %v2845_v44 = vmul.f32 1.442695, %v2843_v57  ;;  %3045 = vmax.xlane.f32.xlu1 %v3044_v39  ;;  %v3041_v53 = vsel %vm523_vm0, %v3039_v58, -inf }
0x13ce   :  { %6897 = vpow2.f32 %v2847_v56  ;;  %3042 = vmax.xlane.f32.xlu0 %v3041_v53 }
0x13cf   :  { %6899 = vpow2.f32 %v2845_v44 }
0x13d8   :  { %v6898_v43 = vpop.eup %6897 }
0x13d9   :  { %v6900_v11 = vpop.eup %6899  ;;  %v2852_v14 = vsel %vm523_vm0, %v6898_v43, 0.0 }
0x13da   :  { %2853 = vadd.xlane.f32.xlu1 %v2852_v14  ;;  %v2849_v52 = vsel %vm523_vm0, %v6900_v11, 0.0 }
0x13db   :  { %2850 = vadd.xlane.f32.xlu0 %v2849_v52 }
0x145a   :  { %v3046_v54 = vpop.xlane.xlu1 %3045 }
0x145b   :  { %v3048_v55 = vsub.f32 %v3040_v38, %v3046_v54  ;;  %v3043_v60 = vpop.xlane.xlu0 %3042 }
0x145c   :  { %v3047_v1 = vsub.f32 %v3039_v58, %v3043_v60 }
0x145d   :  { %v3051_v2 = vmul.f32 1.442695, %v3048_v55 }
0x145e   :  { %v3049_v59 = vmul.f32 1.442695, %v3047_v1  ;;  %v8145_v63 = vpop.f32.mrb[20].mxu1 }
0x145f   :  { %6901 = vpow2.f32 %v3051_v2  ;;  %v8147_v45 = vpop.f32.mrb[21].mxu1 }
0x1460   :  { %6903 = vpow2.f32 %v3049_v59 }
0x1462   :  { %v5811_v13 = vpop.f32.mrb[22].mxu1 }
0x1463   :  { %v2709_v15 = vadd.f32 %v5811_v13, %v5100_v12  ;;  %v2703_v7 = vpop.f32.mrb[23].mxu1 }
0x1464   :  { %v2704_v41 = vadd.f32 %v5100_v12, %v2703_v7 }
0x1466   :  { %v5814_v24 = vpop.f32.mrb[24].mxu1  ;;  %v6319_v29 = vpack.c.bf16 %v2709_v15, %v2704_v41  ;;  %v8152_v35 = vpack.i.bf16 %v2709_v15, %v2704_v41 }
0x1467   :  { %v2854_v51 = vpop.xlane.xlu1 %2853  ;;  %v2719_v16 = vadd.f32 %v5814_v24, %v5100_v12  ;;  %v2713_v17 = vpop.f32.mrb[25].mxu1 }
0x1468   :  { %6905 = vrcp.f32 %v2854_v51  ;;  %v2851_v47 = vpop.xlane.xlu0 %2850  ;;  %v2714_v48 = vadd.f32 %v5100_v12, %v2713_v17  ;;  %6320 = vmatprep.subr.bf16.mxu1 %v6319_v29 }
0x1469   :  { %v6902_v49 = vpop.eup %6901  ;;  %6907 = vrcp.f32 %v2851_v47  ;;  %6322 = vmatpush3.bf16.msra.mxu1 %v6319_v29 }
0x146a   :  { %v6904_v18 = vpop.eup %6903  ;;  %v3056_v33 = vsel %vm523_vm0, %v6902_v49, 0.0  ;;  %v6323_v42 = vpack.c.bf16 %v2719_v16, %v2714_v48  ;;  %v8155_v3 = vpack.i.bf16 %v2719_v16, %v2714_v48  ;;  %v5817_v61 = vpop.f32.mrb[26].mxu1 }
0x146b   :  { %3057 = vadd.xlane.f32.xlu1 %v3056_v33  ;;  %v3053_v23 = vsel %vm523_vm0, %v6904_v18, 0.0  ;;  %v2729_v62 = vadd.f32 %v5817_v61, %v5100_v12  ;;  %v2723_v38 = vpop.f32.mrb[27].mxu1 }
0x146c   :  { %3054 = vadd.xlane.f32.xlu0 %v3053_v23  ;;  %6324 = vmatprep.subr.bf16.mxu1 %v6323_v42  ;;  %v2724_v30 = vadd.f32 %v5100_v12, %v2723_v38 }
0x146d   :  { %6326 = vmatpush3.bf16.msra.mxu1 %v6323_v42 }
0x146e   :  { %v5820_v21 = vpop.f32.mrb[28].mxu1  ;;  %v8190_v33 = vpack.i.bf16 %v2729_v62, %v2724_v30 }
0x146f   :  { %v2739_v57 = vadd.f32 %v5820_v21, %v5100_v12  ;;  %v2733_v58 = vpop.f32.mrb[29].mxu1 }
0x1470   :  { %v2734_v56 = vadd.f32 %v5100_v12, %v2733_v58 }
0x1472   :  { %v6906_v25 = vpop.eup %6905  ;;  %v8192_v42 = vpack.c.bf16 %v2739_v57, %v2734_v56  ;;  %v8194_v23 = vpack.i.bf16 %v2739_v57, %v2734_v56 }
0x1473   :  { %v6908_v27 = vpop.eup %6907  ;;  %v2858_v46 = vmul.f32 %v6906_v25, %v6898_v43 }
0x1474   :  { %v2857_v28 = vmul.f32 %v6908_v27, %v6900_v11 }
0x1476   :  { %5840 = vmatprep.mubr.msk.f32.mxu1 %vm523_vm0, %v2857_v28 }
0x1477   :  { %5841 = vmatmul.mubr.msk.f32.vlgmr.msra.gmra.mrb[30].mxu1 %vm523_vm0, %v2858_v46 }
0x147c   :  { %6691 = vrot.lane.b32.xlu1 %v8155_v3, %s7327_s8 }
0x1480   :  { %6696 = vrot.lane.b32.xlu1 %v8040_v4, %s7328_s25 }
0x1482   :  { %6686 = vrot.lane.b32.xlu0 %v8152_v35, %s7327_s8 }
0x1484   :  { %3160 = vrot.lane.b32.xlu1 %v8058_v40, %s7328_s25 }
0x1486   :  { %6701 = vrot.lane.b32.xlu0 %v8048_v31, %s7328_s25 }
0x148a   :  { %3162 = vrot.lane.b32.xlu0 %v8067_v5, %s7328_s25 }
0x14f8   :  { %v3058_v39 = vpop.xlane.xlu1 %3057 }
0x14f9   :  { %v3055_v44 = vpop.xlane.xlu0 %3054 }
0x14fa   :  { %6909 = vrcp.f32 %v3055_v44 }
0x14fb   :  { %6911 = vrcp.f32 %v3058_v39 }
0x14fc   :  { %v6692_v53 = vpop.permute.xlu1 %6691 }
0x14fd   :  { %v6694_v43 = vunpack.i.h.bf16 %v6692_v53  ;;  %v6693_v11 = vunpack.i.l.bf16 %v6692_v53  ;;  %v6687_v14 = vpop.permute.xlu0 %6686 }
0x14fe   :  { %v6689_v52 = vunpack.i.h.bf16 %v6687_v14  ;;  %v6688_v54 = vunpack.i.l.bf16 %v6687_v14 }
0x14ff   :  { %v6343_v55 = vpack.c.bf16 %v6694_v43, %v6693_v11 }
0x1500   :  { %v6339_v60 = vpack.c.bf16 %v6689_v52, %v6688_v54  ;;  %v6697_v1 = vpop.permute.xlu1 %6696 }
0x1501   :  { %v6699_v2 = vunpack.i.h.bf16 %v6697_v1  ;;  %v6698_v59 = vunpack.i.l.bf16 %v6697_v1  ;;  %v6702_v24 = vpop.permute.xlu0 %6701 }
0x1502   :  { %6340 = vmatprep.subr.bf16.mxu1 %v6339_v60  ;;  %v6704_v51 = vunpack.i.h.bf16 %v6702_v24  ;;  %v6703_v16 = vunpack.i.l.bf16 %v6702_v24 }
0x1503   :  { %6342 = vmatpush3.bf16.msra.mxu1 %v6339_v60  ;;  %v6347_v7 = vpack.c.bf16 %v6699_v2, %v6698_v59 }
0x1504   :  { %v6910_v13 = vpop.eup %6909  ;;  %6344 = vmatprep.subr.bf16.mxu1 %v6343_v55  ;;  %v3161_v29 = vpop.permute.xlu1 %3160  ;;  %v6353_v17 = vpack.c.bf16 %v6704_v51, %v6703_v16 }
0x1505   :  { %v6912_v12 = vpop.eup %6911  ;;  %v3061_v15 = vmul.f32 %v6910_v13, %v6904_v18  ;;  %v3163_v47 = vpop.permute.xlu0 %3162  ;;  %v8188_v18 = vpack.c.bf16 %v2729_v62, %v2724_v30 }
0x1506   :  { %v3062_v41 = vmul.f32 %v6912_v12, %v6902_v49 }
0x1507   :  { %6346 = vmatpush3.bf16.msra.mxu1 %v6343_v55  ;;  %5862 = vmatprep.mubr.msk.f32.mxu1 %vm523_vm0, %v3061_v15 }
0x1508   :  { %6349 = vmatprep.subr.msk.bf16.mxu1 %vm7698_vm1, %v6347_v7 }
0x150a   :  { %5863 = vmatmul.mubr.msk.f32.vlgmr.msra.gmra.mrb[32].mxu1 %vm523_vm0, %v3062_v41 }
0x150b   :  { %5873 = vmatprep.mubr.msk.f32.mxu1 %vm523_vm0, %v3161_v29 }
0x1510   :  { %6352 = vmatpush3.bf16.xpose.msk.msra.mxu1 %vm7698_vm1, %v6347_v7 }
0x1511   :  { %6355 = vmatprep.subr.msk.bf16.mxu1 %vm7698_vm1, %v6353_v17 }
0x1518   :  { %6358 = vmatpush3.bf16.xpose.msk.msra.mxu1 %vm7698_vm1, %v6353_v17 }
0x151f   :  { %5874 = vmatmul.mubr.msk.f32.vlgmr.msra.gmra.mrb[34].mxu1 %vm523_vm0, %v3163_v47 }
0x154a   :  { %v8184_v48 = vpop.f32.mrb[30].mxu1 }
0x154b   :  { %v8186_v49 = vpop.f32.mrb[31].mxu1 }
0x15dd   :  { %v8196_v25 = vpop.f32.mrb[32].mxu1 }
0x15de   :  { %v8198_v27 = vpop.f32.mrb[33].mxu1 }
0x15df   :  { %v6795_v28 = vpack.i.bf16 %v8196_v25, %v8198_v27 }
0x15f2   :  { %v5875_v46 = vpop.f32.mrb[34].mxu1 }
0x15f3   :  { %v3260_v61 = vmul.f32 0.17677669, %v5875_v46  ;;  %v3250_v38 = vpop.f32.mrb[35].mxu1 }
0x15f4   :  { %v3259_v21 = vmul.f32 0.17677669, %v3250_v38 }
0x15f5   :  { %v3264_v58 = vsel %vm523_vm0, %v3260_v61, -inf }
0x15f6   :  { %3265 = vmax.xlane.f32.xlu0 %v3264_v58  ;;  %v3261_v62 = vsel %vm523_vm0, %v3259_v21, -inf }
0x15f7   :  { %3262 = vmax.xlane.f32.xlu1 %v3261_v62 }
0x1683   :  { %v3266_v30 = vpop.xlane.xlu0 %3265 }
0x1684   :  { %v3268_v57 = vsub.f32 %v3260_v61, %v3266_v30  ;;  %v3263_v56 = vpop.xlane.xlu1 %3262 }
0x1685   :  { %v3267_v39 = vsub.f32 %v3259_v21, %v3263_v56 }
0x1686   :  { %v3271_v44 = vmul.f32 1.442695, %v3268_v57 }
0x1687   :  { %v3269_v53 = vmul.f32 1.442695, %v3267_v39 }
0x1688   :  { %6913 = vpow2.f32 %v3271_v44 }
0x1689   :  { %6915 = vpow2.f32 %v3269_v53 }
0x1692   :  { %v6914_v43 = vpop.eup %6913 }
0x1693   :  { %v6916_v11 = vpop.eup %6915  ;;  %v3276_v14 = vsel %vm523_vm0, %v6914_v43, 0.0 }
0x1694   :  { %3277 = vadd.xlane.f32.xlu1 %v3276_v14  ;;  %v3273_v52 = vsel %vm523_vm0, %v6916_v11, 0.0 }
0x1695   :  { %3274 = vadd.xlane.f32.xlu0 %v3273_v52 }
0x16a5   :  { %6711 = vrot.lane.b32.xlu1 %v8155_v3, %s7328_s25 }
0x16a9   :  { %6716 = vrot.lane.b32.xlu1 %v8040_v4, %s7329_s5 }
0x16ab   :  { %6706 = vrot.lane.b32.xlu0 %v8152_v35, %s7328_s25 }
0x16ad   :  { %3376 = vrot.lane.b32.xlu1 %v8058_v40, %s7329_s5 }
0x16af   :  { %6721 = vrot.lane.b32.xlu0 %v8048_v31, %s7329_s5 }
0x16b3   :  { %3378 = vrot.lane.b32.xlu0 %v8067_v5, %s7329_s5 }
0x1721   :  { %v3278_v54 = vpop.xlane.xlu1 %3277 }
0x1722   :  { %v3275_v55 = vpop.xlane.xlu0 %3274 }
0x1723   :  { %6917 = vrcp.f32 %v3275_v55 }
0x1724   :  { %6919 = vrcp.f32 %v3278_v54 }
0x1725   :  { %v6712_v60 = vpop.permute.xlu1 %6711 }
0x1726   :  { %v6707_v1 = vpop.permute.xlu0 %6706  ;;  %v6714_v2 = vunpack.i.h.bf16 %v6712_v60  ;;  %v6713_v4 = vunpack.i.l.bf16 %v6712_v60 }
0x1727   :  { %v6709_v59 = vunpack.i.h.bf16 %v6707_v1  ;;  %v6708_v13 = vunpack.i.l.bf16 %v6707_v1 }
0x1728   :  { %v6363_v7 = vpack.c.bf16 %v6714_v2, %v6713_v4 }
0x1729   :  { %v6359_v12 = vpack.c.bf16 %v6709_v59, %v6708_v13  ;;  %v6717_v15 = vpop.permute.xlu1 %6716 }
0x172a   :  { %v6719_v40 = vunpack.i.h.bf16 %v6717_v15  ;;  %v6718_v41 = vunpack.i.l.bf16 %v6717_v15  ;;  %v6722_v16 = vpop.permute.xlu0 %6721 }
0x172b   :  { %6360 = vmatprep.subr.bf16.mxu0 %v6359_v12  ;;  %v6724_v47 = vunpack.i.h.bf16 %v6722_v16  ;;  %v6723_v46 = vunpack.i.l.bf16 %v6722_v16 }
0x172c   :  { %6362 = vmatpush3.bf16.msra.mxu0 %v6359_v12  ;;  %v6367_v29 = vpack.c.bf16 %v6719_v40, %v6718_v41 }
0x172d   :  { %v6918_v31 = vpop.eup %6917  ;;  %6364 = vmatprep.subr.bf16.mxu0 %v6363_v7  ;;  %v3377_v17 = vpop.permute.xlu1 %3376  ;;  %v6373_v61 = vpack.c.bf16 %v6724_v47, %v6723_v46 }
0x172e   :  { %v6920_v5 = vpop.eup %6919  ;;  %v3281_v24 = vmul.f32 %v6918_v31, %v6916_v11  ;;  %v3379_v38 = vpop.permute.xlu0 %3378 }
0x172f   :  { %v3282_v51 = vmul.f32 %v6920_v5, %v6914_v43 }
0x1730   :  { %6366 = vmatpush3.bf16.msra.mxu0 %v6363_v7  ;;  %5884 = vmatprep.mubr.msk.f32.mxu0 %vm523_vm0, %v3281_v24 }
0x1731   :  { %6369 = vmatprep.subr.msk.bf16.mxu0 %vm7698_vm1, %v6367_v29 }
0x1733   :  { %5885 = vmatmul.mubr.msk.f32.vlgmr.msra.gmra.mrb[42].mxu0 %vm523_vm0, %v3282_v51 }
0x1734   :  { %5895 = vmatprep.mubr.msk.f32.mxu0 %vm523_vm0, %v3377_v17 }
0x1739   :  { %6372 = vmatpush3.bf16.xpose.msk.msra.mxu0 %vm7698_vm1, %v6367_v29  ;;  %v8254_v29 = vadd.f32 %v8053_v32, %v8147_v45  ;;  %v8270_v45 = vadd.f32 %v8145_v63, %v8053_v32 }
0x173a   :  { %6375 = vmatprep.subr.msk.bf16.mxu0 %vm7698_vm1, %v6373_v61 }
0x1741   :  { %6378 = vmatpush3.bf16.xpose.msk.msra.mxu0 %vm7698_vm1, %v6373_v61 }
0x1742   :  { %6400 = vmatprep.subr.bf16.mxu0 %v8188_v18 }
0x1748   :  { %5896 = vmatmul.mubr.msk.f32.vlgmr.msra.gmra.mrb[44].mxu0 %vm523_vm0, %v3379_v38 }
0x1749   :  { %6402 = vmatpush3.bf16.msra.mxu0 %v8188_v18 }
0x174a   :  { %6404 = vmatprep.subr.bf16.mxu0 %v8192_v42 }
0x174d   :  { %6406 = vmatpush3.bf16.msra.mxu0 %v8192_v42 }
0x1806   :  { %v8234_v21 = vpop.f32.mrb[42].mxu0 }
0x1807   :  { %v8236_v58 = vpop.f32.mrb[43].mxu0 }
0x1808   :  { %v6800_v62 = vpack.i.bf16 %v8234_v21, %v8236_v58  ;;  %v4502_v58 = vld [vmem:[#allocation19] sm:$0xff] }
0x181b   :  { %v5897_v30 = vpop.f32.mrb[44].mxu0 }
0x181c   :  { %v3476_v57 = vmul.f32 0.17677669, %v5897_v30  ;;  %v3466_v56 = vpop.f32.mrb[45].mxu0 }
0x181d   :  { %v3475_v39 = vmul.f32 0.17677669, %v3466_v56 }
0x181e   :  { %v3480_v44 = vsel %vm523_vm0, %v3476_v57, -inf }
0x181f   :  { %3481 = vmax.xlane.f32.xlu0 %v3480_v44  ;;  %v3477_v18 = vsel %vm523_vm0, %v3475_v39, -inf }
0x1820   :  { %3478 = vmax.xlane.f32.xlu1 %v3477_v18 }
0x18ac   :  { %v3482_v53 = vpop.xlane.xlu0 %3481 }
0x18ad   :  { %v3484_v43 = vsub.f32 %v3476_v57, %v3482_v53  ;;  %v3479_v42 = vpop.xlane.xlu1 %3478 }
0x18ae   :  { %v3483_v11 = vsub.f32 %v3475_v39, %v3479_v42 }
0x18af   :  { %v3487_v14 = vmul.f32 1.442695, %v3484_v43 }
0x18b0   :  { %v3485_v52 = vmul.f32 1.442695, %v3483_v11 }
0x18b1   :  { %6921 = vpow2.f32 %v3487_v14 }
0x18b2   :  { %6923 = vpow2.f32 %v3485_v52 }
0x18bb   :  { %v6922_v54 = vpop.eup %6921 }
0x18bc   :  { %v6924_v55 = vpop.eup %6923  ;;  %v3492_v60 = vsel %vm523_vm0, %v6922_v54, 0.0 }
0x18bd   :  { %3493 = vadd.xlane.f32.xlu1 %v3492_v60  ;;  %v3489_v1 = vsel %vm523_vm0, %v6924_v55, 0.0 }
0x18be   :  { %3490 = vadd.xlane.f32.xlu0 %v3489_v1 }
0x18ce   :  { %6731 = vrot.lane.b32.xlu1 %v8155_v3, %s7329_s5 }
0x18d4   :  { %6726 = vrot.lane.b32.xlu0 %v8152_v35, %s7329_s5 }
0x194a   :  { %v3494_v2 = vpop.xlane.xlu1 %3493 }
0x194b   :  { %v3491_v4 = vpop.xlane.xlu0 %3490 }
0x194c   :  { %6925 = vrcp.f32 %v3491_v4 }
0x194d   :  { %6927 = vrcp.f32 %v3494_v2 }
0x194e   :  { %v6732_v59 = vpop.permute.xlu1 %6731 }
0x194f   :  { %v6727_v13 = vpop.permute.xlu0 %6726  ;;  %v6734_v12 = vunpack.i.h.bf16 %v6732_v59  ;;  %v6733_v15 = vunpack.i.l.bf16 %v6732_v59 }
0x1950   :  { %v6729_v7 = vunpack.i.h.bf16 %v6727_v13  ;;  %v6728_v40 = vunpack.i.l.bf16 %v6727_v13 }
0x1951   :  { %v6383_v31 = vpack.c.bf16 %v6734_v12, %v6733_v15 }
0x1952   :  { %v6379_v41 = vpack.c.bf16 %v6729_v7, %v6728_v40 }
0x1954   :  { %6380 = vmatprep.subr.bf16.mxu1 %v6379_v41 }
0x1955   :  { %6382 = vmatpush3.bf16.msra.mxu1 %v6379_v41 }
0x1956   :  { %v6926_v5 = vpop.eup %6925  ;;  %6384 = vmatprep.subr.bf16.mxu1 %v6383_v31 }
0x1957   :  { %v6928_v3 = vpop.eup %6927  ;;  %v3497_v24 = vmul.f32 %v6926_v5, %v6924_v55 }
0x1958   :  { %v3498_v35 = vmul.f32 %v6928_v3, %v6922_v54 }
0x1959   :  { %6386 = vmatpush3.bf16.msra.mxu1 %v6383_v31  ;;  %5906 = vmatprep.mubr.msk.f32.mxu1 %vm523_vm0, %v3497_v24 }
0x195a   :  { %6389 = vmatprep.subr.msk.bf16.mxu1 %vm7698_vm1, %v8111_v9 }
0x195c   :  { %5907 = vmatmul.mubr.msk.f32.vlgmr.msra.gmra.mrb[36].mxu1 %vm523_vm0, %v3498_v35 }
0x195d   :  { %5917 = vmatprep.mubr.msk.f32.mxu1 %vm523_vm0, %v8254_v29 }
0x1962   :  { %6392 = vmatpush3.bf16.xpose.msk.msra.mxu1 %vm7698_vm1, %v8111_v9 }
0x1963   :  { %6395 = vmatprep.subr.msk.bf16.mxu1 %vm7698_vm1, %v8115_v34 }
0x196a   :  { %6398 = vmatpush3.bf16.xpose.msk.msra.mxu1 %vm7698_vm1, %v8115_v34 }
0x1971   :  { %5918 = vmatmul.mubr.msk.f32.vlgmr.msra.gmra.mrb[38].mxu1 %vm523_vm0, %v8270_v45 }
0x1a2f   :  { %v8274_v51 = vpop.f32.mrb[36].mxu1 }
0x1a30   :  { %v8276_v16 = vpop.f32.mrb[37].mxu1 }
0x1a31   :  { %v6805_v9 = vpack.i.bf16 %v8274_v51, %v8276_v16 }
0x1a44   :  { %v5919_v17 = vpop.f32.mrb[38].mxu1 }
0x1a45   :  { %v3716_v47 = vmul.f32 0.17677669, %v5919_v17  ;;  %v3706_v46 = vpop.f32.mrb[39].mxu1 }
0x1a46   :  { %v3715_v61 = vmul.f32 0.17677669, %v3706_v46 }
0x1a47   :  { %v3720_v34 = vsel %vm523_vm0, %v3716_v47, -inf }
0x1a48   :  { %3721 = vmax.xlane.f32.xlu0 %v3720_v34  ;;  %v3717_v32 = vsel %vm523_vm0, %v3715_v61, -inf }
0x1a49   :  { %3718 = vmax.xlane.f32.xlu1 %v3717_v32 }
0x1ad5   :  { %v3722_v63 = vpop.xlane.xlu0 %3721 }
0x1ad6   :  { %v3724_v38 = vsub.f32 %v3716_v47, %v3722_v63  ;;  %v3719_v30 = vpop.xlane.xlu1 %3718 }
0x1ad7   :  { %v3723_v57 = vsub.f32 %v3715_v61, %v3719_v30 }
0x1ad8   :  { %v3727_v56 = vmul.f32 1.442695, %v3724_v38 }
0x1ad9   :  { %v3725_v39 = vmul.f32 1.442695, %v3723_v57 }
0x1ada   :  { %6929 = vpow2.f32 %v3727_v56 }
0x1adb   :  { %6931 = vpow2.f32 %v3725_v39 }
0x1ae4   :  { %v6930_v44 = vpop.eup %6929 }
0x1ae5   :  { %v6932_v18 = vpop.eup %6931  ;;  %v3732_v53 = vsel %vm523_vm0, %v6930_v44, 0.0 }
0x1ae6   :  { %3733 = vadd.xlane.f32.xlu1 %v3732_v53  ;;  %v3729_v43 = vsel %vm523_vm0, %v6932_v18, 0.0 }
0x1ae7   :  { %3730 = vadd.xlane.f32.xlu0 %v3729_v43 }
0x1af7   :  { %6741 = vrot.lane.b32.xlu1 %v8117_v50, %s7327_s8 }
0x1afb   :  { %3820 = vrot.lane.b32.xlu1 %v8254_v29, %s7327_s8 }
0x1afd   :  { %6736 = vrot.lane.b32.xlu0 %v8113_v10, %s7327_s8 }
0x1b01   :  { %3822 = vrot.lane.b32.xlu0 %v8270_v45, %s7327_s8 }
0x1b73   :  { %v3734_v42 = vpop.xlane.xlu1 %3733 }
0x1b74   :  { %6933 = vrcp.f32 %v3734_v42  ;;  %v3731_v11 = vpop.xlane.xlu0 %3730 }
0x1b75   :  { %6935 = vrcp.f32 %v3731_v11 }
0x1b77   :  { %v6742_v60 = vpop.permute.xlu1 %6741 }
0x1b78   :  { %v6737_v14 = vpop.permute.xlu0 %6736  ;;  %v6744_v4 = vunpack.i.h.bf16 %v6742_v60  ;;  %v6743_v59 = vunpack.i.l.bf16 %v6742_v60 }
0x1b79   :  { %v6739_v52 = vunpack.i.h.bf16 %v6737_v14  ;;  %v6738_v54 = vunpack.i.l.bf16 %v6737_v14 }
0x1b7a   :  { %v6413_v15 = vpack.c.bf16 %v6744_v4, %v6743_v59 }
0x1b7b   :  { %v6407_v55 = vpack.c.bf16 %v6739_v52, %v6738_v54  ;;  %v3821_v7 = vpop.permute.xlu1 %3820 }
0x1b7c   :  { %v3823_v40 = vpop.permute.xlu0 %3822 }
0x1b7d   :  { %6409 = vmatprep.subr.msk.bf16.mxu0 %vm7698_vm1, %v6407_v55 }
0x1b7e   :  { %v6934_v1 = vpop.eup %6933 }
0x1b7f   :  { %v6936_v2 = vpop.eup %6935  ;;  %v3738_v12 = vmul.f32 %v6934_v1, %v6930_v44 }
0x1b80   :  { %v3737_v13 = vmul.f32 %v6936_v2, %v6932_v18 }
0x1b82   :  { %5928 = vmatprep.mubr.msk.f32.mxu0 %vm523_vm0, %v3737_v13 }
0x1b83   :  { %5929 = vmatmul.mubr.msk.f32.vlgmr.msra.gmra.mrb[46].mxu0 %vm523_vm0, %v3738_v12 }
0x1b84   :  { %6412 = vmatpush3.bf16.xpose.msk.msra.mxu0 %vm7698_vm1, %v6407_v55  ;;  %5939 = vmatprep.mubr.msk.f32.mxu0 %vm523_vm0, %v3821_v7 }
0x1b85   :  { %6415 = vmatprep.subr.msk.bf16.mxu0 %vm7698_vm1, %v6413_v15 }
0x1b8c   :  { %6418 = vmatpush3.bf16.xpose.msk.msra.mxu0 %vm7698_vm1, %v6413_v15 }
0x1b93   :  { %5940 = vmatmul.mubr.msk.f32.vlgmr.msra.gmra.mrb[48].mxu0 %vm523_vm0, %v3823_v40 }
0x1c56   :  { %v8304_v41 = vpop.f32.mrb[46].mxu0 }
0x1c57   :  { %v8306_v31 = vpop.f32.mrb[47].mxu0 }
0x1c66   :  { %v5941_v5 = vpop.f32.mrb[48].mxu0 }
0x1c67   :  { %v3920_v3 = vmul.f32 0.17677669, %v5941_v5  ;;  %v3910_v24 = vpop.f32.mrb[49].mxu0 }
0x1c68   :  { %v3919_v35 = vmul.f32 0.17677669, %v3910_v24 }
0x1c69   :  { %v3924_v17 = vsel %vm523_vm0, %v3920_v3, -inf }
0x1c6a   :  { %3925 = vmax.xlane.f32.xlu0 %v3924_v17  ;;  %v3921_v47 = vsel %vm523_vm0, %v3919_v35, -inf }
0x1c6b   :  { %3922 = vmax.xlane.f32.xlu1 %v3921_v47 }
0x1cf7   :  { %v3926_v46 = vpop.xlane.xlu0 %3925 }
0x1cf8   :  { %v3928_v61 = vsub.f32 %v3920_v3, %v3926_v46  ;;  %v3923_v34 = vpop.xlane.xlu1 %3922 }
0x1cf9   :  { %v3927_v32 = vsub.f32 %v3919_v35, %v3923_v34 }
0x1cfa   :  { %v3931_v63 = vmul.f32 1.442695, %v3928_v61 }
0x1cfb   :  { %v3929_v38 = vmul.f32 1.442695, %v3927_v32 }
0x1cfc   :  { %6937 = vpow2.f32 %v3931_v63 }
0x1cfd   :  { %6939 = vpow2.f32 %v3929_v38 }
0x1d06   :  { %v6938_v30 = vpop.eup %6937 }
0x1d07   :  { %v6940_v57 = vpop.eup %6939  ;;  %v3936_v56 = vsel %vm523_vm0, %v6938_v30, 0.0 }
0x1d08   :  { %3937 = vadd.xlane.f32.xlu1 %v3936_v56  ;;  %v3933_v39 = vsel %vm523_vm0, %v6940_v57, 0.0 }
0x1d09   :  { %3934 = vadd.xlane.f32.xlu0 %v3933_v39 }
0x1d19   :  { %6751 = vrot.lane.b32.xlu1 %v8194_v23, %s7327_s8 }
0x1d1d   :  { %6756 = vrot.lane.b32.xlu1 %v8113_v10, %s7328_s25 }
0x1d1f   :  { %6746 = vrot.lane.b32.xlu0 %v8190_v33, %s7327_s8 }
0x1d21   :  { %4040 = vrot.lane.b32.xlu1 %v8254_v29, %s7328_s25 }
0x1d23   :  { %6761 = vrot.lane.b32.xlu0 %v8117_v50, %s7328_s25 }
0x1d27   :  { %4042 = vrot.lane.b32.xlu0 %v8270_v45, %s7328_s25 }
0x1d95   :  { %v3938_v44 = vpop.xlane.xlu1 %3937 }
0x1d96   :  { %v3935_v18 = vpop.xlane.xlu0 %3934 }
0x1d97   :  { %6941 = vrcp.f32 %v3935_v18 }
0x1d98   :  { %6943 = vrcp.f32 %v3938_v44 }
0x1d99   :  { %v6752_v53 = vpop.permute.xlu1 %6751 }
0x1d9a   :  { %v6747_v43 = vpop.permute.xlu0 %6746  ;;  %v6754_v42 = vunpack.i.h.bf16 %v6752_v53  ;;  %v6753_v11 = vunpack.i.l.bf16 %v6752_v53 }
0x1d9b   :  { %v6749_v14 = vunpack.i.h.bf16 %v6747_v43  ;;  %v6748_v52 = vunpack.i.l.bf16 %v6747_v43 }
0x1d9c   :  { %v6423_v60 = vpack.c.bf16 %v6754_v42, %v6753_v11 }
0x1d9d   :  { %v6419_v54 = vpack.c.bf16 %v6749_v14, %v6748_v52  ;;  %v6757_v55 = vpop.permute.xlu1 %6756 }
0x1d9e   :  { %v6759_v1 = vunpack.i.h.bf16 %v6757_v55  ;;  %v6758_v2 = vunpack.i.l.bf16 %v6757_v55  ;;  %v6762_v7 = vpop.permute.xlu0 %6761 }
0x1d9f   :  { %6420 = vmatprep.subr.bf16.mxu1 %v6419_v54  ;;  %v6764_v5 = vunpack.i.h.bf16 %v6762_v7  ;;  %v6763_v3 = vunpack.i.l.bf16 %v6762_v7 }
0x1da0   :  { %6422 = vmatpush3.bf16.msra.mxu1 %v6419_v54  ;;  %v6427_v12 = vpack.c.bf16 %v6759_v1, %v6758_v2 }
0x1da1   :  { %v6942_v4 = vpop.eup %6941  ;;  %6424 = vmatprep.subr.bf16.mxu1 %v6423_v60  ;;  %v4041_v40 = vpop.permute.xlu1 %4040  ;;  %v6433_v24 = vpack.c.bf16 %v6764_v5, %v6763_v3 }
0x1da2   :  { %v6944_v59 = vpop.eup %6943  ;;  %v3941_v13 = vmul.f32 %v6942_v4, %v6940_v57  ;;  %v4043_v35 = vpop.permute.xlu0 %4042 }
0x1da3   :  { %v3942_v15 = vmul.f32 %v6944_v59, %v6938_v30 }
0x1da4   :  { %6426 = vmatpush3.bf16.msra.mxu1 %v6423_v60  ;;  %5950 = vmatprep.mubr.msk.f32.mxu1 %vm523_vm0, %v3941_v13 }
0x1da5   :  { %6429 = vmatprep.subr.msk.bf16.mxu1 %vm7698_vm1, %v6427_v12 }
0x1da7   :  { %5951 = vmatmul.mubr.msk.f32.vlgmr.msra.gmra.mrb[40].mxu1 %vm523_vm0, %v3942_v15 }
0x1da8   :  { %5961 = vmatprep.mubr.msk.f32.mxu1 %vm523_vm0, %v4041_v40 }
0x1dad   :  { %6432 = vmatpush3.bf16.xpose.msk.msra.mxu1 %vm7698_vm1, %v6427_v12 }
0x1dae   :  { %6435 = vmatprep.subr.msk.bf16.mxu1 %vm7698_vm1, %v6433_v24 }
0x1db5   :  { %6438 = vmatpush3.bf16.xpose.msk.msra.mxu1 %vm7698_vm1, %v6433_v24 }
0x1dbc   :  { %5962 = vmatmul.mubr.msk.f32.vlgmr.msra.gmra.mrb[42].mxu1 %vm523_vm0, %v4043_v35 }
0x1e7a   :  { %v8336_v17 = vpop.f32.mrb[40].mxu1 }
0x1e7b   :  { %v8338_v47 = vpop.f32.mrb[41].mxu1 }
0x1e7c   :  { %v6810_v46 = vpack.i.bf16 %v8336_v17, %v8338_v47 }
0x1e8f   :  { %v5963_v61 = vpop.f32.mrb[42].mxu1 }
0x1e90   :  { %v4140_v34 = vmul.f32 0.17677669, %v5963_v61  ;;  %v4130_v32 = vpop.f32.mrb[43].mxu1 }
0x1e91   :  { %v4139_v63 = vmul.f32 0.17677669, %v4130_v32 }
0x1e92   :  { %v4144_v38 = vsel %vm523_vm0, %v4140_v34, -inf }
0x1e93   :  { %4145 = vmax.xlane.f32.xlu0 %v4144_v38  ;;  %v4141_v30 = vsel %vm523_vm0, %v4139_v63, -inf }
0x1e94   :  { %4142 = vmax.xlane.f32.xlu1 %v4141_v30 }
0x1f20   :  { %v4146_v57 = vpop.xlane.xlu0 %4145 }
0x1f21   :  { %v4148_v56 = vsub.f32 %v4140_v34, %v4146_v57  ;;  %v4143_v39 = vpop.xlane.xlu1 %4142 }
0x1f22   :  { %v4147_v44 = vsub.f32 %v4139_v63, %v4143_v39 }
0x1f23   :  { %v4151_v18 = vmul.f32 1.442695, %v4148_v56 }
0x1f24   :  { %v4149_v53 = vmul.f32 1.442695, %v4147_v44 }
0x1f25   :  { %6945 = vpow2.f32 %v4151_v18 }
0x1f26   :  { %6947 = vpow2.f32 %v4149_v53 }
0x1f2f   :  { %v6946_v43 = vpop.eup %6945 }
0x1f30   :  { %v6948_v42 = vpop.eup %6947  ;;  %v4156_v11 = vsel %vm523_vm0, %v6946_v43, 0.0 }
0x1f31   :  { %4157 = vadd.xlane.f32.xlu1 %v4156_v11  ;;  %v4153_v14 = vsel %vm523_vm0, %v6948_v42, 0.0 }
0x1f32   :  { %4154 = vadd.xlane.f32.xlu0 %v4153_v14 }
0x1f42   :  { %6771 = vrot.lane.b32.xlu1 %v8194_v23, %s7328_s25 }
0x1f46   :  { %6776 = vrot.lane.b32.xlu1 %v8113_v10, %s7329_s5 }
0x1f48   :  { %6766 = vrot.lane.b32.xlu0 %v8190_v33, %s7328_s25 }
0x1f4a   :  { %4256 = vrot.lane.b32.xlu1 %v8254_v29, %s7329_s5 }
0x1f4c   :  { %6781 = vrot.lane.b32.xlu0 %v8117_v50, %s7329_s5 }
0x1f50   :  { %4258 = vrot.lane.b32.xlu0 %v8270_v45, %s7329_s5 }
0x1fbe   :  { %v4158_v52 = vpop.xlane.xlu1 %4157 }
0x1fbf   :  { %v4155_v54 = vpop.xlane.xlu0 %4154 }
0x1fc0   :  { %6949 = vrcp.f32 %v4155_v54 }
0x1fc1   :  { %6951 = vrcp.f32 %v4158_v52 }
0x1fc2   :  { %v6772_v55 = vpop.permute.xlu1 %6771 }
0x1fc3   :  { %v6767_v60 = vpop.permute.xlu0 %6766  ;;  %v6774_v1 = vunpack.i.h.bf16 %v6772_v55  ;;  %v6773_v10 = vunpack.i.l.bf16 %v6772_v55 }
0x1fc4   :  { %v6769_v2 = vunpack.i.h.bf16 %v6767_v60  ;;  %v6768_v4 = vunpack.i.l.bf16 %v6767_v60 }
0x1fc5   :  { %v6443_v12 = vpack.c.bf16 %v6774_v1, %v6773_v10 }
0x1fc6   :  { %v6439_v59 = vpack.c.bf16 %v6769_v2, %v6768_v4  ;;  %v6777_v13 = vpop.permute.xlu1 %6776 }
0x1fc7   :  { %v6779_v29 = vunpack.i.h.bf16 %v6777_v13  ;;  %v6778_v15 = vunpack.i.l.bf16 %v6777_v13  ;;  %v6782_v3 = vpop.permute.xlu0 %6781 }
0x1fc8   :  { %6440 = vmatprep.subr.bf16.mxu0 %v6439_v59  ;;  %v6784_v35 = vunpack.i.h.bf16 %v6782_v3  ;;  %v6783_v61 = vunpack.i.l.bf16 %v6782_v3 }
0x1fc9   :  { %6442 = vmatpush3.bf16.msra.mxu0 %v6439_v59  ;;  %v6447_v40 = vpack.c.bf16 %v6779_v29, %v6778_v15  ;;  %v4504_v15 = vld [vmem:[#allocation19 + $0x10] sm:$0xff] }
0x1fca   :  { %v6950_v50 = vpop.eup %6949  ;;  %6444 = vmatprep.subr.bf16.mxu0 %v6443_v12  ;;  %v4257_v24 = vpop.permute.xlu1 %4256  ;;  %v6453_v34 = vpack.c.bf16 %v6784_v35, %v6783_v61  ;;  %v4507_v35 = vld [vmem:[#allocation19 + $0x28] sm:$0xff] }
0x1fcb   :  { %v6952_v45 = vpop.eup %6951  ;;  %v4161_v7 = vmul.f32 %v6950_v50, %v6948_v42  ;;  %v4259_v32 = vpop.permute.xlu0 %4258  ;;  %v4505_v50 = vld [vmem:[#allocation19 + $0x18] sm:$0xff] }
0x1fcc   :  { %v4162_v5 = vmul.f32 %v6952_v45, %v6946_v43 }
0x1fcd   :  { %6446 = vmatpush3.bf16.msra.mxu0 %v6443_v12  ;;  %5972 = vmatprep.mubr.msk.f32.mxu0 %vm523_vm0, %v4161_v7 }
0x1fce   :  { %6449 = vmatprep.subr.msk.bf16.mxu0 %vm7698_vm1, %v6447_v40 }
0x1fd0   :  { %5973 = vmatmul.mubr.msk.f32.vlgmr.msra.gmra.mrb[50].mxu0 %vm523_vm0, %v4162_v5  ;;  %v6471_v5 = vpack.c.bf16 %v4505_v50, %v4504_v15  ;;  %v4683_v50 = vld [vmem:[#allocation20 + $0x8] sm:$0xff] }
0x1fd1   :  { %5983 = vmatprep.mubr.msk.f32.mxu0 %vm523_vm0, %v4257_v24  ;;  %v4506_v24 = vld [vmem:[#allocation19 + $0x20] sm:$0xff] }
0x1fd6   :  { %6452 = vmatpush3.bf16.xpose.msk.msra.mxu0 %vm7698_vm1, %v6447_v40 }
0x1fd7   :  { %6455 = vmatprep.subr.msk.bf16.mxu0 %vm7698_vm1, %v6453_v34 }
0x1fde   :  { %6458 = vmatpush3.bf16.xpose.msk.msra.mxu0 %vm7698_vm1, %v6453_v34  ;;  %v6475_v34 = vpack.c.bf16 %v4507_v35, %v4506_v24 }
0x1fe5   :  { %5984 = vmatmul.mubr.msk.f32.vlgmr.msra.gmra.mrb[52].mxu0 %vm523_vm0, %v4259_v32  ;;  %v4508_v32 = vld [vmem:[#allocation19 + $0x30] sm:$0xff] }
0x1fe6   :  { %4790 = vmatprep.mubr.f32.mxu0 %v7326_v0 }
0x20a3   :  { %v5974_v63 = vpop.f32.mrb[50].mxu0 }
0x20a4   :  { %v4247_v38 = vpop.f32.mrb[51].mxu0 }
0x20a5   :  { %v6815_v30 = vpack.i.bf16 %v5974_v63, %v4247_v38  ;;  %v4510_v38 = vld [vmem:[#allocation19 + $0x40] sm:$0xff] }
0x20b8   :  { %v5985_v57 = vpop.f32.mrb[52].mxu0 }
0x20b9   :  { %v4356_v56 = vmul.f32 0.17677669, %v5985_v57  ;;  %v4346_v39 = vpop.f32.mrb[53].mxu0 }
0x20ba   :  { %v4355_v44 = vmul.f32 0.17677669, %v4346_v39  ;;  %v4513_v39 = vld [vmem:[#allocation19 + $0x58] sm:$0xff] }
0x20bb   :  { %v4360_v18 = vsel %vm523_vm0, %v4356_v56, -inf }
0x20bc   :  { %4361 = vmax.xlane.f32.xlu0 %v4360_v18  ;;  %v4357_v53 = vsel %vm523_vm0, %v4355_v44, -inf  ;;  %v4514_v18 = vld [vmem:[#allocation19 + $0x60] sm:$0xff] }
0x20bd   :  { %4358 = vmax.xlane.f32.xlu1 %v4357_v53  ;;  %v4515_v53 = vld [vmem:[#allocation19 + $0x68] sm:$0xff] }
0x2149   :  { %v4362_v37 = vpop.xlane.xlu0 %4361 }
0x214a   :  { %v4364_v43 = vsub.f32 %v4356_v56, %v4362_v37  ;;  %v4359_v42 = vpop.xlane.xlu1 %4358  ;;  %v4512_v56 = vld [vmem:[#allocation19 + $0x50] sm:$0xff]  ;;  %v6491_v37 = vpack.c.bf16 %v4515_v53, %v4514_v18 }
0x214b   :  { %v4363_v11 = vsub.f32 %v4355_v44, %v4359_v42  ;;  %v6487_v44 = vpack.c.bf16 %v4513_v39, %v4512_v56  ;;  %v4517_v42 = vld [vmem:[#allocation19 + $0x78] sm:$0xff] }
0x214c   :  { %v4367_v14 = vmul.f32 1.442695, %v4364_v43  ;;  %v4516_v43 = vld [vmem:[#allocation19 + $0x70] sm:$0xff] }
0x214d   :  { %v4365_v52 = vmul.f32 1.442695, %v4363_v11  ;;  %v6495_v11 = vpack.c.bf16 %v4517_v42, %v4516_v43 }
0x214e   :  { %6953 = vpow2.f32 %v4367_v14 }
0x214f   :  { %6955 = vpow2.f32 %v4365_v52 }
0x2158   :  { %v6954_v54 = vpop.eup %6953 }
0x2159   :  { %v6956_v55 = vpop.eup %6955  ;;  %v4372_v60 = vsel %vm523_vm0, %v6954_v54, 0.0 }
0x215a   :  { %4373 = vadd.xlane.f32.xlu1 %v4372_v60  ;;  %v4369_v1 = vsel %vm523_vm0, %v6956_v55, 0.0 }
0x215b   :  { %4370 = vadd.xlane.f32.xlu0 %v4369_v1 }
0x216b   :  { %6791 = vrot.lane.b32.xlu1 %v8194_v23, %s7329_s5 }
0x216f   :  { %6796 = vrot.lane.b32.xlu1 %v6795_v28, %s7329_s5 }
0x2171   :  { %6786 = vrot.lane.b32.xlu0 %v8190_v33, %s7329_s5 }
0x2173   :  { %6806 = vrot.lane.b32.xlu1 %v6805_v9, %s7327_s8 }
0x2175   :  { %6801 = vrot.lane.b32.xlu0 %v6800_v62, %s7328_s25  ;;  %v4503_v62 = vld [vmem:[#allocation19 + $0x8] sm:$0xff] }
0x2176   :  { %v6467_v59 = vpack.c.bf16 %v4503_v62, %v4502_v58 }
0x2177   :  { %6816 = vrot.lane.b32.xlu1 %v6815_v30, %s7328_s25  ;;  %v4511_v30 = vld [vmem:[#allocation19 + $0x48] sm:$0xff] }
0x2178   :  { %v6483_v57 = vpack.c.bf16 %v4511_v30, %v4510_v38 }
0x2179   :  { %6811 = vrot.lane.b32.xlu0 %v6810_v46, %s7329_s5 }
0x21e7   :  { %v4374_v23 = vpop.xlane.xlu1 %4373 }
0x21e8   :  { %v4371_v25 = vpop.xlane.xlu0 %4370 }
0x21e9   :  { %6957 = vrcp.f32 %v4371_v25 }
0x21ea   :  { %6959 = vrcp.f32 %v4374_v23 }
0x21eb   :  { %v6792_v33 = vpop.permute.xlu1 %6791 }
0x21ec   :  { %v6787_v27 = vpop.permute.xlu0 %6786  ;;  %v6794_v28 = vunpack.i.h.bf16 %v6792_v33  ;;  %v6793_v51 = vunpack.i.l.bf16 %v6792_v33 }
0x21ed   :  { %v6789_v16 = vunpack.i.h.bf16 %v6787_v27  ;;  %v6788_v9 = vunpack.i.l.bf16 %v6787_v27  ;;  %v5165_v27 = vld [vmem:[%s8531_s17] ss:$0 sm:$0xff] }
0x21ee   :  { %v6463_v2 = vpack.c.bf16 %v6794_v28, %v6793_v51 }
0x21ef   :  { %v6459_v10 = vpack.c.bf16 %v6789_v16, %v6788_v9  ;;  %v8396_v21 = vpop.permute.xlu1 %6796 }
0x21f0   :  { %v6798_v4 = vunpack.i.l.bf16 %v8396_v21  ;;  %v6802_v17 = vpop.permute.xlu0 %6801  ;;  %v6799_v14 = vunpack.i.h.bf16 %v8396_v21 }
0x21f1   :  { %6460 = vmatprep.subr.bf16.mxu1 %v6459_v10  ;;  %v6803_v12 = vunpack.i.l.bf16 %v6802_v17  ;;  %v6804_v52 = vunpack.i.h.bf16 %v6802_v17 }
0x21f2   :  { %6462 = vmatpush3.bf16.msra.mxu1 %v6459_v10  ;;  %v3616_v7 = vsel %vm523_vm0, %v8186_v49, %v6798_v4  ;;  %v4509_v49 = vld [vmem:[#allocation19 + $0x38] sm:$0xff] }
0x21f3   :  { %v6958_v47 = vpop.eup %6957  ;;  %v6807_v46 = vpop.permute.xlu1 %6806  ;;  %6464 = vmatprep.subr.bf16.mxu1 %v6463_v2  ;;  %v3618_v3 = vsel %vm1351_vm3, %v3616_v7, %v6803_v12  ;;  %v6479_v63 = vpack.c.bf16 %v4509_v49, %v4508_v32  ;;  %v4682_v7 = vld [vmem:[#allocation20] sm:$0xff] }
0x21f4   :  { %v6960_v13 = vpop.eup %6959  ;;  %v4377_v29 = vmul.f32 %v6958_v47, %v6956_v55  ;;  %v6808_v45 = vunpack.i.l.bf16 %v6807_v46  ;;  %v6809_v55 = vunpack.i.h.bf16 %v6807_v46  ;;  %v6812_v21 = vpop.permute.xlu0 %6811 }
0x21f5   :  { %v4378_v40 = vmul.f32 %v6960_v13, %v6954_v54  ;;  %v3617_v54 = vsel %vm523_vm0, %v8184_v48, %v6799_v14  ;;  %v6814_v62 = vunpack.i.h.bf16 %v6812_v21  ;;  %v4693_v14 = vld [vmem:[#allocation20 + $0x58] sm:$0xff] }
0x21f6   :  { %6466 = vmatpush3.bf16.msra.mxu1 %v6463_v2  ;;  %5994 = vmatprep.mubr.msk.f32.mxu1 %vm523_vm0, %v4377_v29  ;;  %v3620_v61 = vsel %vm1354_vm4, %v3618_v3, %v6808_v45  ;;  %v3619_v60 = vsel %vm1351_vm3, %v3617_v54, %v6804_v52  ;;  %v6813_v2 = vunpack.i.l.bf16 %v6812_v21  ;;  %v4685_v45 = vld [vmem:[#allocation20 + $0x18] sm:$0xff]  ;;  %v4687_v3 = vld [vmem:[#allocation20 + $0x28] sm:$0xff]  ;;  %v4690_v54 = vld [vmem:[#allocation20 + $0x40] sm:$0xff] }
0x21f7   :  { %6468 = vmatprep.subr.bf16.mxu1 %v6467_v59  ;;  %v3621_v1 = vsel %vm1354_vm4, %v3619_v60, %v6809_v55  ;;  %v6817_v58 = vpop.permute.xlu1 %6816  ;;  %v4497_v12 = vsel %vm523_vm0, %v8304_v41, %v6814_v62  ;;  %v4686_v41 = vld [vmem:[#allocation20 + $0x20] sm:$0xff]  ;;  %v4692_v55 = vld [vmem:[#allocation20 + $0x50] sm:$0xff]  ;;  %v4695_v60 = vld [vmem:[#allocation20 + $0x68] sm:$0xff] }
0x21f8   :  { %v6819_v4 = vunpack.i.h.bf16 %v6817_v58  ;;  %v6818_v17 = vunpack.i.l.bf16 %v6817_v58  ;;  %v4496_v13 = vsel %vm523_vm0, %v8306_v31, %v6813_v2  ;;  %v4689_v31 = vld [vmem:[#allocation20 + $0x38] sm:$0xff]  ;;  %v4702_v58 = vld [vmem:[#allocation20 + $0xa0] sm:$0xff]  ;;  %v4704_v2 = vld [vmem:[#allocation20 + $0xb0] sm:$0xff] }
0x21f9   :  { %5995 = vmatmul.mubr.msk.f32.vlgmr.msra.gmra.mrb[44].mxu1 %vm523_vm0, %v4378_v40  ;;  %v6499_v40 = vpack.c.bf16 %v4685_v45, %v4683_v50  ;;  %v6503_v35 = vpack.c.bf16 %v4689_v31, %v4687_v3  ;;  %v4705_v21 = vld [vmem:[#allocation20 + $0xb8] sm:$0xff]  ;;  %v4712_v50 = vld [vmem:[#allocation20 + $0xf0] sm:$0xff] }
0x21fa   :  { %6470 = vmatpush3.bf16.msra.mxu1 %v6467_v59  ;;  %6029 = vmatprep.mubr.f32.mxu1 %v3620_v61  ;;  %v4688_v61 = vld [vmem:[#allocation20 + $0x30] sm:$0xff] }
0x21fb   :  { %6472 = vmatprep.subr.bf16.mxu1 %v6471_v5  ;;  %6500 = vmatprep.subr.bf16.mxu0 %v6499_v40 }
0x21fe   :  { %6474 = vmatpush3.bf16.msra.mxu1 %v6471_v5  ;;  %v4684_v5 = vld [vmem:[#allocation20 + $0x10] sm:$0xff] }
0x21ff   :  { %6476 = vmatprep.subr.bf16.mxu1 %v6475_v34  ;;  %v6501_v24 = vpack.c.bf16 %v4684_v5, %v4682_v7 }
0x2201   :  { %6502 = vmatpush1.bf16.msra.mxu0 %v6501_v24 }
0x2202   :  { %6478 = vmatpush3.bf16.msra.mxu1 %v6475_v34  ;;  %v6505_v34 = vpack.c.bf16 %v4688_v61, %v4686_v41  ;;  %6504 = vmatprep.subr.bf16.mxu0 %v6503_v35 }
0x2203   :  { %6480 = vmatprep.subr.bf16.mxu1 %v6479_v63 }
0x2205   :  { %6506 = vmatpush1.bf16.msra.mxu0 %v6505_v34 }
0x2206   :  { %6482 = vmatpush3.bf16.msra.mxu1 %v6479_v63 }
0x2207   :  { %6484 = vmatprep.subr.bf16.mxu1 %v6483_v57 }
0x220a   :  { %6486 = vmatpush3.bf16.msra.mxu1 %v6483_v57 }
0x220b   :  { %6488 = vmatprep.subr.bf16.mxu1 %v6487_v44 }
0x220e   :  { %6490 = vmatpush3.bf16.msra.mxu1 %v6487_v44 }
0x220f   :  { %6492 = vmatprep.subr.bf16.mxu1 %v6491_v37 }
0x2212   :  { %6494 = vmatpush3.bf16.msra.mxu1 %v6491_v37 }
0x2213   :  { %6496 = vmatprep.subr.bf16.mxu1 %v6495_v11 }
0x2216   :  { %6498 = vmatpush3.bf16.msra.mxu1 %v6495_v11  ;;  %v4691_v11 = vld [vmem:[#allocation20 + $0x48] sm:$0xff] }
0x2217   :  { %v6507_v52 = vpack.c.bf16 %v4693_v14, %v4691_v11  ;;  %v4840_v14 = vld [vmem:[#allocation22 + $0x88] sm:$0xff] }
0x2219   :  { %6030 = vmatmul.mubr.f32.vlgmr.msra.gmra.mrb[46].mxu1 %v3621_v1  ;;  %6508 = vmatprep.subr.bf16.mxu0 %v6507_v52  ;;  %v4823_v52 = vld [vmem:[#allocation22] sm:$0xff] }
0x22cc   :  { %v5996_v23 = vpop.f32.mrb[44].mxu1 }
0x22cd   :  { %v4463_v25 = vpop.f32.mrb[45].mxu1 }
0x22ce   :  { %v6820_v33 = vpack.i.bf16 %v5996_v23, %v4463_v25  ;;  %v4694_v23 = vld [vmem:[#allocation20 + $0x60] sm:$0xff]  ;;  %v4696_v25 = vld [vmem:[#allocation20 + $0x70] sm:$0xff] }
0x22d0   :  { %6821 = vrot.lane.b32.xlu0 %v6820_v33, %s7327_s8  ;;  %v6513_v33 = vpack.c.bf16 %v4696_v25, %v4694_v23  ;;  %v4825_v23 = vld [vmem:[#allocation22 + $0x10] sm:$0xff]  ;;  %v4826_v25 = vld [vmem:[#allocation22 + $0x18] sm:$0xff] }
0x22ec   :  { %v6031_v28 = vpop.f32.mrb[46].mxu1 }
0x22ed   :  { %v4597_v51 = vadd.f32 %v6031_v28, %v5165_v27  ;;  %v4591_v16 = vpop.f32.mrb[47].mxu1  ;;  %v4701_v28 = vld [vmem:[#allocation20 + $0x98] sm:$0xff] }
0x22ee   :  { %v4592_v48 = vadd.f32 %v5165_v27, %v4591_v16  ;;  %v4698_v16 = vld [vmem:[#allocation20 + $0x80] sm:$0xff] }
0x22ef   :  { %v4611_v9 = vadd.f32 %v4597_v51, %v8012_v8  ;;  %v4498_v8 = vsel %vm1351_vm3, %v4496_v13, %v6818_v17  ;;  %v4709_v17 = vld [vmem:[#allocation20 + $0xd8] sm:$0xff]  ;;  %v4708_v13 = vld [vmem:[#allocation20 + $0xd0] sm:$0xff] }
0x22f0   :  { %v4610_v10 = vadd.f32 %v4592_v48, %v8015_v36  ;;  %v4499_v36 = vsel %vm1351_vm3, %v4497_v12, %v6819_v4  ;;  %v4700_v48 = vld [vmem:[#allocation20 + $0x90] sm:$0xff]  ;;  %v4707_v4 = vld [vmem:[#allocation20 + $0xc8] sm:$0xff] }
0x22f1   :  { %4616 = vadd.xlane.f32.xlu0 %v4611_v9  ;;  %v4711_v12 = vld [vmem:[#allocation20 + $0xe8] sm:$0xff] }
0x22f2   :  { %4614 = vadd.xlane.f32.xlu1 %v4610_v10 }
0x2342   :  { %v6822_v47 = vpop.permute.xlu0 %6821 }
0x2343   :  { %v6824_v46 = vunpack.i.h.bf16 %v6822_v47  ;;  %v6823_v59 = vunpack.i.l.bf16 %v6822_v47  ;;  %v6521_v47 = vpack.c.bf16 %v4704_v2, %v4702_v58  ;;  %v4830_v2 = vld [vmem:[#allocation22 + $0x38] sm:$0xff] }
0x2345   :  { %v4500_v29 = vsel %vm1354_vm4, %v4498_v8, %v6823_v59  ;;  %v4501_v15 = vsel %vm1354_vm4, %v4499_v36, %v6824_v46  ;;  %v6523_v46 = vpack.c.bf16 %v4709_v17, %v4707_v4  ;;  %v4706_v59 = vld [vmem:[#allocation20 + $0xc0] sm:$0xff]  ;;  %v4713_v8 = vld [vmem:[#allocation20 + $0xf8] sm:$0xff]  ;;  %v4848_v17 = vld [vmem:[#allocation22 + $0xc8] sm:$0xff] }
0x2346   :  { %6032 = vmatprep.mubr.f32.mxu1 %v4500_v29  ;;  %v6525_v36 = vpack.c.bf16 %v4708_v13, %v4706_v59  ;;  %v6527_v29 = vpack.c.bf16 %v4713_v8, %v4711_v12  ;;  %v4847_v4 = vld [vmem:[#allocation22 + $0xc0] sm:$0xff]  ;;  %v4832_v13 = vld [vmem:[#allocation22 + $0x48] sm:$0xff]  ;;  %v4849_v12 = vld [vmem:[#allocation22 + $0xd0] sm:$0xff] }
0x2347   :  { %6033 = vmatmul.mubr.f32.gmra.mrb[48].mxu1 %v4501_v15  ;;  %v4710_v15 = vld [vmem:[#allocation20 + $0xe0] sm:$0xff]  ;;  %v4850_v8 = vld [vmem:[#allocation22 + $0xd8] sm:$0xff] }
0x2348   :  { %v6529_v45 = vpack.c.bf16 %v4712_v50, %v4710_v15  ;;  %v4831_v59 = vld [vmem:[#allocation22 + $0x40] sm:$0xff]  ;;  %v4833_v15 = vld [vmem:[#allocation22 + $0x50] sm:$0xff]  ;;  %v4834_v50 = vld [vmem:[#allocation22 + $0x58] sm:$0xff] }
0x237e   :  { %v4617_v32 = vpop.xlane.xlu0 %4616 }
0x237f   :  { %v4615_v49 = vpop.xlane.xlu1 %4614  ;;  %v4623_v63 = vmul.f32 0.0078125, %v4617_v32 }
0x2380   :  { %v4622_v38 = vmul.f32 0.0078125, %v4615_v49 }
0x2381   :  { %v8424_v44 = vsub.f32 %v4611_v9, %v4623_v63  ;;  %v6517_v9 = vpack.c.bf16 %v4700_v48, %v4698_v16  ;;  %v4827_v16 = vld [vmem:[#allocation22 + $0x20] sm:$0xff]  ;;  %v4828_v48 = vld [vmem:[#allocation22 + $0x28] sm:$0xff] }
0x2382   :  { %v8427_v53 = vsub.f32 %v4610_v10, %v4622_v38  ;;  %v4703_v10 = vld [vmem:[#allocation20 + $0xa8] sm:$0xff] }
0x2383   :  { %v4631_v43 = vmul.f32 %v8424_v44, %v8424_v44  ;;  %v6519_v62 = vpack.c.bf16 %v4705_v21, %v4703_v10  ;;  %v4846_v10 = vld [vmem:[#allocation22 + $0xb8] sm:$0xff]  ;;  %v6541_v21 = vpack.c.bf16 %v4828_v48, %v4827_v16 }
0x2384   :  { %v4630_v42 = vmul.f32 %v8427_v53, %v8427_v53 }
0x241a   :  { %v6034_v30 = vpop.f32.mrb[48].mxu1 }
0x241b   :  { %v4607_v57 = vadd.f32 %v6034_v30, %v5165_v27  ;;  %v4601_v56 = vpop.f32.mrb[49].mxu1 }
0x241c   :  { %v4602_v39 = vadd.f32 %v5165_v27, %v4601_v56  ;;  %v4699_v27 = vld [vmem:[#allocation20 + $0x88] sm:$0xff]  ;;  %v8445_v56 = vld [vmem:[%s8532_s18 + $0x1] ss:$0 sm:$0xff] }
0x241d   :  { %v4613_v18 = vadd.f32 %v4607_v57, %v8126_v6  ;;  %v6509_v6 = vpack.c.bf16 %v4692_v55, %v4690_v54  ;;  %v6515_v51 = vpack.c.bf16 %v4701_v28, %v4699_v27  ;;  %v4824_v55 = vld [vmem:[#allocation22 + $0x8] sm:$0xff]  ;;  %v6537_v28 = vpack.c.bf16 %v4826_v25, %v4825_v23 }
0x241e   :  { %v4612_v37 = vadd.f32 %v4602_v39, %v8129_v22  ;;  %v4697_v22 = vld [vmem:[#allocation20 + $0x78] sm:$0xff]  ;;  %v4844_v27 = vld [vmem:[#allocation22 + $0xa8] sm:$0xff] }
0x241f   :  { %4620 = vadd.xlane.f32.xlu1 %v4613_v18  ;;  %6510 = vmatpush1.bf16.msra.mxu0 %v6509_v6  ;;  %v6511_v1 = vpack.c.bf16 %v4697_v22, %v4695_v60  ;;  %v4841_v6 = vld [vmem:[#allocation22 + $0x90] sm:$0xff]  ;;  %v4842_v60 = vld [vmem:[#allocation22 + $0x98] sm:$0xff]  ;;  %v6533_v22 = vpack.c.bf16 %v4824_v55, %v4823_v52 }
0x2420   :  { %4618 = vadd.xlane.f32.xlu0 %v4612_v37 }
0x2421   :  { %6512 = vmatprep.subr.bf16.mxu0 %v6511_v1  ;;  %v6535_v1 = vpack.c.bf16 %v4842_v60, %v4841_v6 }
0x2423   :  { %4636 = vadd.xlane.f32.xlu1 %v4631_v43  ;;  %6514 = vmatpush1.bf16.msra.mxu0 %v6513_v33  ;;  %v4843_v33 = vld [vmem:[#allocation22 + $0xa0] sm:$0xff] }
0x2424   :  { %4634 = vadd.xlane.f32.xlu0 %v4630_v42  ;;  %6516 = vmatprep.subr.bf16.mxu0 %v6515_v51  ;;  %v6539_v51 = vpack.c.bf16 %v4844_v27, %v4843_v33 }
0x2427   :  { %6518 = vmatpush1.bf16.msra.mxu0 %v6517_v9  ;;  %v4845_v9 = vld [vmem:[#allocation22 + $0xb0] sm:$0xff] }
0x2428   :  { %6520 = vmatprep.subr.bf16.mxu0 %v6519_v62  ;;  %v6543_v58 = vpack.c.bf16 %v4846_v10, %v4845_v9  ;;  %v4829_v62 = vld [vmem:[#allocation22 + $0x30] sm:$0xff] }
0x242b   :  { %6522 = vmatpush1.bf16.msra.mxu0 %v6521_v47  ;;  %v6545_v47 = vpack.c.bf16 %v4830_v2, %v4829_v62 }
0x242c   :  { %6524 = vmatprep.subr.bf16.mxu0 %v6523_v46  ;;  %v6547_v46 = vpack.c.bf16 %v4848_v17, %v4847_v4 }
0x242f   :  { %6526 = vmatpush1.bf16.msra.mxu0 %v6525_v36  ;;  %v6549_v36 = vpack.c.bf16 %v4832_v13, %v4831_v59  ;;  %v5170_v13 = vld [vmem:[%s8571_s23] ss:$0 sm:$0xff] }
0x2430   :  { %6528 = vmatprep.subr.bf16.mxu0 %v6527_v29  ;;  %v6551_v29 = vpack.c.bf16 %v4850_v8, %v4849_v12 }
0x2433   :  { %6530 = vmatpush1.bf16.msra.mxu0 %v6529_v45  ;;  %v4851_v45 = vld [vmem:[#allocation22 + $0xe0] sm:$0xff] }
0x24ac   :  { %v4621_v7 = vpop.xlane.xlu1 %4620 }
0x24ad   :  { %v4625_v40 = vmul.f32 0.0078125, %v4621_v7  ;;  %v4619_v5 = vpop.xlane.xlu0 %4618  ;;  %v4852_v7 = vld [vmem:[#allocation22 + $0xe8] sm:$0xff] }
0x24ae   :  { %v4624_v3 = vmul.f32 0.0078125, %v4619_v5  ;;  %v6555_v5 = vpack.c.bf16 %v4852_v7, %v4851_v45 }
0x24af   :  { %v8434_v31 = vsub.f32 %v4613_v18, %v4625_v40  ;;  %v6553_v40 = vpack.c.bf16 %v4834_v50, %v4833_v15 }
0x24b0   :  { %v8436_v24 = vsub.f32 %v4612_v37, %v4624_v3  ;;  %v4637_v35 = vpop.xlane.xlu1 %4636  ;;  %v8452_v37 = vld [vmem:[%s8533_s19 + $0x1] ss:$0 sm:$0xff] }
0x24b1   :  { %v4643_v41 = vmul.f32 0.0078125, %v4637_v35  ;;  %v4635_v61 = vpop.xlane.xlu0 %4634  ;;  %v4633_v34 = vmul.f32 %v8434_v31, %v8434_v31  ;;  %v4835_v3 = vld [vmem:[#allocation22 + $0x60] sm:$0xff]  ;;  %v4836_v35 = vld [vmem:[#allocation22 + $0x68] sm:$0xff] }
0x24b2   :  { %v4642_v32 = vmul.f32 0.0078125, %v4635_v61  ;;  %v4632_v49 = vmul.f32 %v8436_v24, %v8436_v24  ;;  %v4853_v61 = vld [vmem:[#allocation22 + $0xf0] sm:$0xff] }
0x24b3   :  { %v4647_v63 = vadd.f32 1e-05, %v4643_v41  ;;  %4640 = vadd.xlane.f32.xlu1 %v4633_v34  ;;  %v6557_v41 = vpack.c.bf16 %v4836_v35, %v4835_v3  ;;  %v4854_v34 = vld [vmem:[#allocation22 + $0xf8] sm:$0xff] }
0x24b4   :  { %v4646_v38 = vadd.f32 1e-05, %v4642_v32  ;;  %4638 = vadd.xlane.f32.xlu0 %v4632_v49  ;;  %v6559_v32 = vpack.c.bf16 %v4854_v34, %v4853_v61  ;;  %v4837_v49 = vld [vmem:[#allocation22 + $0x70] sm:$0xff] }
0x24b5   :  { %6961 = vrsqrt.f32 %v4647_v63  ;;  %v4838_v63 = vld [vmem:[#allocation22 + $0x78] sm:$0xff] }
0x24b6   :  { %6963 = vrsqrt.f32 %v4646_v38  ;;  %v6561_v38 = vpack.c.bf16 %v4838_v63, %v4837_v49 }
0x24bf   :  { %v6962_v30 = vpop.eup %6961 }
0x24c0   :  { %v6964_v57 = vpop.eup %6963  ;;  %v4655_v18 = vmul.f32 %v6962_v30, %v8424_v44  ;;  %v4839_v44 = vld [vmem:[#allocation22 + $0x80] sm:$0xff] }
0x24c1   :  { %v4654_v39 = vmul.f32 %v6964_v57, %v8427_v53  ;;  %v6531_v54 = vpack.c.bf16 %v4840_v14, %v4839_v44 }
0x24c2   :  { %v4667_v11 = vmul.f32 %v8445_v56, %v4655_v18 }
0x24c3   :  { %v4666_v43 = vmul.f32 %v8445_v56, %v4654_v39  ;;  %6532 = vmatprep.subr.bf16.mxu1 %v6531_v54 }
0x24c4   :  { %v8462_v53 = vadd.f32 %v8452_v37, %v4667_v11  ;;  %6534 = vmatpush3.bf16.msra.mxu1 %v6533_v22 }
0x24c5   :  { %v8456_v42 = vadd.f32 %v8452_v37, %v4666_v43  ;;  %6536 = vmatprep.subr.bf16.mxu1 %v6535_v1 }
0x24c7   :  { %4791 = vmatmul.mubr.f32.vlgmr.msra.gmra.mrb[54].mxu0 %v8456_v42 }
0x24c8   :  { %4796 = vmatprep.mubr.f32.mxu0 %v7326_v0  ;;  %6538 = vmatpush3.bf16.msra.mxu1 %v6537_v28 }
0x24c9   :  { %6540 = vmatprep.subr.bf16.mxu1 %v6539_v51 }
0x24cb   :  { %4797 = vmatmul.mubr.f32.gmra.mrb[56].mxu0 %v8462_v53 }
0x24cc   :  { %4802 = vmatprep.mubr.f32.mxu0 %v7326_v0  ;;  %6542 = vmatpush3.bf16.msra.mxu1 %v6541_v21 }
0x24cd   :  { %6544 = vmatprep.subr.bf16.mxu1 %v6543_v58 }
0x24d0   :  { %6546 = vmatpush3.bf16.msra.mxu1 %v6545_v47 }
0x24d1   :  { %6548 = vmatprep.subr.bf16.mxu1 %v6547_v46 }
0x24d4   :  { %6550 = vmatpush3.bf16.msra.mxu1 %v6549_v36 }
0x24d5   :  { %6552 = vmatprep.subr.bf16.mxu1 %v6551_v29 }
0x24d8   :  { %6554 = vmatpush3.bf16.msra.mxu1 %v6553_v40 }
0x24d9   :  { %6556 = vmatprep.subr.bf16.mxu1 %v6555_v5 }
0x24dc   :  { %6558 = vmatpush3.bf16.msra.mxu1 %v6557_v41 }
0x24dd   :  { %6560 = vmatprep.subr.bf16.mxu1 %v6559_v32 }
0x24e0   :  { %6562 = vmatpush3.bf16.msra.mxu1 %v6561_v38 }
0x2540   :  { %v4641_v30 = vpop.xlane.xlu1 %4640 }
0x2541   :  { %v4645_v57 = vmul.f32 0.0078125, %v4641_v30  ;;  %v4639_v39 = vpop.xlane.xlu0 %4638 }
0x2542   :  { %v4644_v18 = vmul.f32 0.0078125, %v4639_v39 }
0x2543   :  { %v4649_v43 = vadd.f32 1e-05, %v4645_v57 }
0x2544   :  { %v4648_v11 = vadd.f32 1e-05, %v4644_v18 }
0x2545   :  { %6965 = vrsqrt.f32 %v4649_v43 }
0x2546   :  { %6967 = vrsqrt.f32 %v4648_v11 }
0x254f   :  { %v6966_v44 = vpop.eup %6965 }
0x2550   :  { %v6968_v14 = vpop.eup %6967  ;;  %v4657_v54 = vmul.f32 %v6966_v44, %v8434_v31  ;;  %v4714_v31 = vld [vmem:[%s8570_s30] sm:$0x3] }
0x2551   :  { %v4656_v52 = vmul.f32 %v6968_v14, %v8436_v24  ;;  %v4719_v24 = vrot.slane %v4714_v31, %v318_v20  ;;  %v4723_v1 = vrot.slane %v4714_v31, %v322_v26 }
0x2552   :  { %v4669_v60 = vmul.f32 %v8445_v56, %v4657_v54 }
0x2553   :  { %v4668_v55 = vmul.f32 %v8445_v56, %v4656_v52 }
0x2554   :  { %v8476_v22 = vadd.f32 %v8452_v37, %v4669_v60 }
0x2555   :  { %v8470_v6 = vadd.f32 %v8452_v37, %v4668_v55 }
0x2557   :  { %4803 = vmatmul.mubr.f32.gmra.mrb[58].mxu0 %v8470_v6 }
0x2558   :  { %4808 = vmatprep.mubr.f32.mxu0 %v7326_v0 }
0x255b   :  { %4809 = vmatmul.mubr.f32.gmra.mrb[60].mxu0 %v8476_v22 }
0x259a   :  { %v4792_v56 = vpop.f32.mrb[54].mxu0 }
0x259b   :  { %v4793_v23 = vadd.f32 %v4792_v56, %v4719_v24  ;;  %v4794_v25 = vpop.f32.mrb[55].mxu0 }
0x259c   :  { %v4795_v33 = vadd.f32 %v4794_v25, %v4723_v1 }
0x259d   :  { %v4815_v37 = vmax.f32 %v4793_v23, 0.0 }
0x259e   :  { %v4816_v0 = vmax.f32 %v4795_v33, 0.0  ;;  %v4798_v27 = vpop.f32.mrb[56].mxu0 }
0x259f   :  { %v4799_v28 = vadd.f32 %v4798_v27, %v4719_v24  ;;  %v4800_v51 = vpop.f32.mrb[57].mxu0 }
0x25a0   :  { %v4801_v16 = vadd.f32 %v4800_v51, %v4723_v1  ;;  %4926 = vmatprep.mubr.f32.mxu1 %v4816_v0  ;;  %v5172_v0 = vld [vmem:[%s8532_s18 + $0x2] ss:$0 sm:$0xff]  ;;  %s7330_s18 = smov [#allocation23]  }
0x25a1   :  { %4927 = vmatmul.mubr.f32.vlgmr.msra.gmra.mrb[50].mxu1 %v4815_v37  ;;  %v4817_v9 = vmax.f32 %v4799_v28, 0.0  ;;  %v5174_v37 = vld [vmem:[%s8533_s19 + $0x2] ss:$0 sm:$0xff]  ;;  %s5028_s19 = sshll.u32 %s7330_s18, 4  ;;  %s5029_s19 = int_to_ptr.vmem [resolvable:$true] %s5028_s19 }
0x25a2   :  { %v4818_v48 = vmax.f32 %v4801_v16, 0.0  ;;  %s7271_s7 = scalar_lea.vmem %s5029_s19, 512  ;;  %p7276_p7 = scmp.lt.s32.totalorder %s5029_s19, %s5029_s19 }
0x25a3   :  { %p7272_p6 = scmp.ne.s32.totalorder %s5029_s19, %s7271_s7  ;;  %p7277_p8 = scmp.lt.s32.totalorder %s7271_s7, %s7271_s7 }
0x25a4   :  { %4931 = vmatprep.mubr.f32.mxu1 %v4818_v48 }
0x25a5   :  { %4932 = vmatmul.mubr.f32.gmra.mrb[52].mxu1 %v4817_v9  ;;  %p7278_p9 = por %p7277_p8, %p7276_p7 }
0x25a7   :  { %p7279_p10 = pnand %p7278_p9, %p7272_p6 }
0x262a   :  { %v4804_v20 = vpop.f32.mrb[58].mxu0 }
0x262b   :  { %v4805_v10 = vadd.f32 %v4804_v20, %v4719_v24  ;;  %v4806_v19 = vpop.f32.mrb[59].mxu0 }
0x262c   :  { %v4807_v26 = vadd.f32 %v4806_v19, %v4723_v1 }
0x262d   :  { %v4819_v62 = vmax.f32 %v4805_v10, 0.0 }
0x262e   :  { %v4820_v21 = vmax.f32 %v4807_v26, 0.0  ;;  %v4810_v58 = vpop.f32.mrb[60].mxu0 }
0x262f   :  { %v4811_v2 = vadd.f32 %v4810_v58, %v4719_v24  ;;  %v4812_v4 = vpop.f32.mrb[61].mxu0 }
0x2630   :  { %v4813_v17 = vadd.f32 %v4812_v4, %v4723_v1  ;;  %4936 = vmatprep.mubr.f32.mxu1 %v4820_v21 }
0x2631   :  { %4937 = vmatmul.mubr.f32.gmra.mrb[54].mxu1 %v4819_v62  ;;  %v4821_v46 = vmax.f32 %v4811_v2, 0.0 }
0x2632   :  { %v4822_v47 = vmax.f32 %v4813_v17, 0.0 }
0x2634   :  { %4941 = vmatprep.mubr.f32.mxu1 %v4822_v47 }
0x2635   :  { %4942 = vmatmul.mubr.f32.gmra.mrb[56].mxu1 %v4821_v46 }
0x2674   :  { %v5495_v59 = vpop.f32.mrb[50].mxu1 }
0x2675   :  { %v5496_v12 = vpop.f32.mrb[51].mxu1 }
0x2676   :  { %v5497_v8 = vadd.f32 %v5496_v12, %v5495_v59 }
0x2678   :  { %v4929_v36 = vadd.f32 %v5497_v8, %v5170_v13  ;;  %v5498_v29 = vpop.f32.mrb[52].mxu1 }
0x2679   :  { %v5499_v15 = vpop.f32.mrb[53].mxu1 }
0x267a   :  { %v5500_v50 = vadd.f32 %v5499_v15, %v5498_v29  ;;  %v4947_v45 = vadd.f32 %v4929_v36, %v8456_v42 }
0x267c   :  { %v4934_v7 = vadd.f32 %v5500_v50, %v5170_v13  ;;  %4951 = vadd.xlane.f32.xlu0 %v4947_v45 }
0x267e   :  { %v4948_v40 = vadd.f32 %v4934_v7, %v8462_v53 }
0x2680   :  { %4953 = vadd.xlane.f32.xlu1 %v4948_v40 }
0x2704   :  { %v5501_v5 = vpop.f32.mrb[54].mxu1 }
0x2705   :  { %v5502_v3 = vpop.f32.mrb[55].mxu1 }
0x2706   :  { %v5503_v35 = vadd.f32 %v5502_v3, %v5501_v5 }
0x2708   :  { %v4939_v41 = vadd.f32 %v5503_v35, %v5170_v13  ;;  %v5504_v61 = vpop.f32.mrb[56].mxu1 }
0x2709   :  { %v4952_v34 = vpop.xlane.xlu0 %4951  ;;  %v5505_v32 = vpop.f32.mrb[57].mxu1 }
0x270a   :  { %v4959_v49 = vmul.f32 0.0078125, %v4952_v34  ;;  %v5506_v63 = vadd.f32 %v5505_v32, %v5504_v61  ;;  %v4949_v38 = vadd.f32 %v4939_v41, %v8470_v6 }
0x270c   :  { %v4963_v30 = vsub.f32 %v4947_v45, %v4959_v49  ;;  %v4944_v57 = vadd.f32 %v5506_v63, %v5170_v13  ;;  %4955 = vadd.xlane.f32.xlu0 %v4949_v38 }
0x270d   :  { %v4954_v42 = vpop.xlane.xlu1 %4953 }
0x270e   :  { %v4960_v39 = vmul.f32 0.0078125, %v4954_v42  ;;  %v4967_v18 = vmul.f32 %v4963_v30, %v4963_v30  ;;  %v4950_v53 = vadd.f32 %v4944_v57, %v8476_v22 }
0x2710   :  { %v4964_v43 = vsub.f32 %v4948_v40, %v4960_v39  ;;  %4971 = vadd.xlane.f32.xlu0 %v4967_v18  ;;  %4957 = vadd.xlane.f32.xlu1 %v4950_v53 }
0x2712   :  { %v4968_v11 = vmul.f32 %v4964_v43, %v4964_v43 }
0x2714   :  { %4973 = vadd.xlane.f32.xlu1 %v4968_v11 }
0x2799   :  { %v4956_v44 = vpop.xlane.xlu0 %4955 }
0x279a   :  { %v4961_v14 = vmul.f32 0.0078125, %v4956_v44 }
0x279c   :  { %v4965_v52 = vsub.f32 %v4949_v38, %v4961_v14 }
0x279d   :  { %v4972_v54 = vpop.xlane.xlu0 %4971  ;;  %v4958_v55 = vpop.xlane.xlu1 %4957 }
0x279e   :  { %v4979_v60 = vmul.f32 0.0078125, %v4972_v54  ;;  %v4962_v6 = vmul.f32 0.0078125, %v4958_v55  ;;  %v4969_v31 = vmul.f32 %v4965_v52, %v4965_v52 }
0x27a0   :  { %v4983_v24 = vadd.f32 1e-05, %v4979_v60  ;;  %v4966_v1 = vsub.f32 %v4950_v53, %v4962_v6  ;;  %4975 = vadd.xlane.f32.xlu0 %v4969_v31 }
0x27a1   :  { %v4974_v56 = vpop.xlane.xlu1 %4973 }
0x27a2   :  { %6969 = vrsqrt.f32 %v4983_v24  ;;  %v4980_v23 = vmul.f32 0.0078125, %v4974_v56  ;;  %v4970_v22 = vmul.f32 %v4966_v1, %v4966_v1 }
0x27a4   :  { %v4984_v25 = vadd.f32 1e-05, %v4980_v23  ;;  %4977 = vadd.xlane.f32.xlu1 %v4970_v22 }
0x27a6   :  { %6971 = vrsqrt.f32 %v4984_v25 }
0x27ac   :  { %v6970_v33 = vpop.eup %6969 }
0x27ad   :  { %v4991_v27 = vmul.f32 %v6970_v33, %v4963_v30 }
0x27af   :  { %v5003_v28 = vmul.f32 %v5172_v0, %v4991_v27 }
0x27b0   :  { %v6972_v51 = vpop.eup %6971 }
0x27b1   :  { %v4992_v16 = vmul.f32 %v6972_v51, %v4964_v43  ;;  %v5015_v48 = vadd.f32 %v5174_v37, %v5003_v28 }
0x27b3   :  { %v5004_v9 = vmul.f32 %v5172_v0, %v4992_v16  ;;  %5019 = vst [vmem:[#allocation23] sm:$0xff] %v5015_v48 }
0x27b5   :  { %v5016_v20 = vadd.f32 %v5174_v37, %v5004_v9 }
0x27b7   :  { %5020 = vst [vmem:[#allocation23 + $0x8] sm:$0xff] %v5016_v20 }
0x282d   :  { %v4976_v10 = vpop.xlane.xlu0 %4975 }
0x282e   :  { %v4981_v19 = vmul.f32 0.0078125, %v4976_v10 }
0x2830   :  { %v4985_v26 = vadd.f32 1e-05, %v4981_v19 }
0x2831   :  { %v4978_v21 = vpop.xlane.xlu1 %4977 }
0x2832   :  { %6973 = vrsqrt.f32 %v4985_v26  ;;  %v4982_v58 = vmul.f32 0.0078125, %v4978_v21 }
0x2834   :  { %v4986_v62 = vadd.f32 1e-05, %v4982_v58 }
0x2836   :  { %6975 = vrsqrt.f32 %v4986_v62 }
0x283c   :  { %v6974_v2 = vpop.eup %6973 }
0x283d   :  { %v4993_v4 = vmul.f32 %v6974_v2, %v4965_v52 }
0x283f   :  { %v5005_v17 = vmul.f32 %v5172_v0, %v4993_v4 }
0x2840   :  { %v6976_v47 = vpop.eup %6975 }
0x2841   :  { %v4994_v46 = vmul.f32 %v6976_v47, %v4966_v1  ;;  %v5017_v59 = vadd.f32 %v5174_v37, %v5005_v17 }
0x2843   :  { %v5006_v13 = vmul.f32 %v5172_v0, %v4994_v46  ;;  %5021 = vst [vmem:[#allocation23 + $0x10] sm:$0xff] %v5017_v59 }
0x2845   :  { %v5018_v12 = vadd.f32 %v5174_v37, %v5006_v13 }
0x2847   :  { %5022 = vst [vmem:[#allocation23 + $0x18] sm:$0xff] %v5018_v12 }
0x2848   :  { %7282 = shalt.err (!%p7279_p10)
}
0x2849   :  { %s8572_s28 = sld [smem:[#allocation43_spill]] }
0x284f   :  { %s7283_s27 = scalar_lea.hbm %s8572_s28, 512 }
0x2850   :  { %p7284_p11 = scmp.ne.s32.totalorder %s8572_s28, %s7283_s27  ;;  %p7287_p12 = scmp.lt.u32.totalorder %s7283_s27, %s8572_s28 }
0x2852   :  { %p7289_p13 = pnand %p7287_p12, %p7284_p11 }
0x2854   :  { %7292 = shalt.err (!%p7289_p13)
}
0x2855   :  { %5034 = dma.vmem_to_hbm [thread:$0]  %s5029_s19, 512, %s8572_s28, [#allocation4], %s7311_s4, %s7311_s4, %s7312_s1  }
0x2856   :  { %7307 = dma.done.wait [#allocation4], 512  }
0x2857   :  { %7308 = vsyncadd [#allocation4], 4294966784 }
0x2858   :  { %5038 = vsyncpa [#allocation3], 1 }
0x2859   :  { %5039 = vsyncpa [#allocation6], 1 }
0x285a   :  { %5040 = vsyncpa [#allocation9], 1 }
0x285b   :  { %5041 = vsyncpa [#allocation12], 1 }
0x285c   :  { %5042 = vsyncpa [#allocation15], 1 }
0x285d   :  { %5043 = vsyncpa [#allocation18], 1 }
0x285e   :  { %5044 = vsyncpa [#allocation21], 1 }
0x285f   :  { %5045 = vsyncpa [#allocation4], 1 }

</bundles_post_ra>
